<compile_context>
chip_gen: v5e
topology: v5e:2x2
jax: 0.10.0
libtpu: 0.0.40
codegen_flags: <defaults>
</compile_context>

<pallas_src>
import functools
import math

import numpy as np
import jax
import jax.numpy as jnp
from jax.experimental import pallas as pl
from jax.experimental.pallas import tpu as pltpu


# ----------------------------------------------------------------------------
# Fixed module configuration (constructor args of the reference instance)
# ----------------------------------------------------------------------------

CFG = dict(
    patch_size=3, dilation_patch=1,
    conv_channels=64, n_box_channels=16, roi_output_size=3,
    hidden_size=32, n_layers=1, output_size=6,
    avg_box_features=True, correlation_only=False, use_env_features=False,
    correlation_last_only=False, sum_lstm_layers=True,
)
CFG["input_size"] = 6 + CFG["n_box_channels"]   # locations_per_box=1, multiplier=1

C31_CIN_PAD = 48   # 32 redirected + patch^2(=9) correlation channels, padded to 48


# ----------------------------------------------------------------------------
# In-kernel helpers
# ----------------------------------------------------------------------------

def _leaky(x):
    return jnp.where(x > 0, x, 0.1 * x)


def _pad_hw(x, pad):
    """Zero-pad a (H, W, C) value by `pad` on H and W, inside the kernel."""
    H, W, C = x.shape
    zr = jnp.zeros((pad, W, C), x.dtype)
    x = jnp.concatenate([zr, x, zr], axis=0)
    zc = jnp.zeros((H + 2 * pad, pad, C), x.dtype)
    return jnp.concatenate([zc, x, zc], axis=1)


def _conv3x3_im2col(x, w_ref, b_ref):
    """'same' 3x3 conv + bias + LeakyReLU(0.1) as ONE im2col MXU matmul.

    x: (H, W, Cin) bf16 value; w_ref: (9*Cin, Cout) bf16; b_ref: (1, Cout) f32.
    Returns (H*W, Cout) f32.
    """
    H, W, Cin = x.shape
    xp = _pad_hw(x, 1)
    cols = [xp[ky:ky + H, kx:kx + W, :].reshape(H * W, Cin)
            for ky in range(3) for kx in range(3)]
    col = jnp.concatenate(cols, axis=-1)                      # (H*W, 9*Cin) bf16
    acc = jnp.dot(col, w_ref[...], preferred_element_type=jnp.float32) + b_ref[...]
    return _leaky(acc)


# ----------------------------------------------------------------------------
# Pallas kernel 1: per-pair correlation + conv tower + RoIAlign-average pooling
# ----------------------------------------------------------------------------

def _vision_kernel(keep_ref,                     # scalar prefetch (unused in body)
                   f1_ref, f2_ref, wmap_ref,
                   wred_ref, bred_ref, w31_ref, b31_ref,
                   w4_ref, b4_ref, w41_ref, b41_ref,
                   o_ref, *, H, W, P, dil, C, c31_cin):
    del keep_ref
    f1 = f1_ref[0]                               # (H, W, C) bf16
    f2 = f2_ref[0]                               # (H, W, C) bf16

    # ---- FlowNet correlation (kernel_size=1): in-kernel halo pad, bf16 mul,
    #      f32 accumulate; 1/C folded into f1 once (exact in bf16). ----
    pad = dil * (P // 2)
    f2p = _pad_hw(f2, pad)                       # (H+2p, W+2p, C) bf16
    f1s = f1 * (1.0 / C)                         # stays bf16 (weak-typed scale)
    planes = []
    for py in range(P):
        for px in range(P):
            dy, dx = py * dil, px * dil
            prod = (f1s * f2p[dy:dy + H, dx:dx + W, :]).astype(jnp.float32)
            planes.append(jnp.sum(prod, axis=-1))
    corr = _leaky(jnp.stack(planes, axis=-1))    # (H, W, P*P) f32

    # ---- conv_redir 1x1: bf16 x bf16 MXU matmul, f32 accumulate ----
    red = jnp.dot(f1.reshape(H * W, C), wred_ref[...],
                  preferred_element_type=jnp.float32) + bred_ref[...]
    red = _leaky(red).reshape(H, W, 32)

    # ---- channel concat (+ zero pad 41 -> c31_cin) ----
    parts = [red, corr]
    pad_ch = c31_cin - (32 + P * P)
    if pad_ch > 0:
        parts.append(jnp.zeros((H, W, pad_ch), jnp.float32))
    x = jnp.concatenate(parts, axis=-1)          # (H, W, c31_cin)

    # ---- conv3_1 -> conv4 -> conv4_1, each a single bf16 im2col matmul ----
    c31 = _conv3x3_im2col(x.astype(jnp.bfloat16), w31_ref, b31_ref)          # (H*W, 64)
    c4 = _conv3x3_im2col(c31.astype(jnp.bfloat16).reshape(H, W, -1), w4_ref, b4_ref)
    c41 = _conv3x3_im2col(c4.astype(jnp.bfloat16).reshape(H, W, -1), w41_ref, b41_ref)

    # ---- RoIAlign + average pooling fused as (1, H*W) x (H*W, nbc) matmul ----
    wm = wmap_ref[...].reshape(1, H * W)
    pooled = jnp.dot(wm, c41, preferred_element_type=jnp.float32)            # (1, nbc)
    o_ref[...] = pooled.reshape(1, 1, -1)


def vision_tower(frames_bf16, keep_idx, wmaps, p, H, W, P, dil, C, c31_cin, nbc):
    """frames_bf16: (T, H, W, C) bf16 NHWC; keep_idx: (Nk,) int32; wmaps: (Nk, H, W).
    Returns (Nk, 1, nbc) f32 pooled box features."""
    Nk = keep_idx.shape[0]
    kern = functools.partial(_vision_kernel, H=H, W=W, P=P, dil=dil, C=C,
                             c31_cin=c31_cin)
    grid_spec = pltpu.PrefetchScalarGridSpec(
        num_scalar_prefetch=1,
        grid=(Nk,),
        in_specs=[
            # frame pair, gathered via the scalar-prefetch keep table
            pl.BlockSpec((1, H, W, C), lambda i, keep: (keep[i], 0, 0, 0)),
            pl.BlockSpec((1, H, W, C), lambda i, keep: (keep[i] + 1, 0, 0, 0)),
            # per-pair RoI weight map
            pl.BlockSpec((1, H, W), lambda i, keep: (i, 0, 0)),
            # weights: constant index maps -> DMA'd once, resident across the grid
            pl.BlockSpec(p["wred"].shape, lambda i, keep: (0, 0)),
            pl.BlockSpec(p["bred"].shape, lambda i, keep: (0, 0)),
            pl.BlockSpec(p["w31"].shape, lambda i, keep: (0, 0)),
            pl.BlockSpec(p["b31"].shape, lambda i, keep: (0, 0)),
            pl.BlockSpec(p["w4"].shape, lambda i, keep: (0, 0)),
            pl.BlockSpec(p["b4"].shape, lambda i, keep: (0, 0)),
            pl.BlockSpec(p["w41"].shape, lambda i, keep: (0, 0)),
            pl.BlockSpec(p["b41"].shape, lambda i, keep: (0, 0)),
        ],
        out_specs=pl.BlockSpec((1, 1, nbc), lambda i, keep: (i, 0, 0)),
    )
    return pl.pallas_call(
        kern,
        grid_spec=grid_spec,
        out_shape=jax.ShapeDtypeStruct((Nk, 1, nbc), jnp.float32),
        compiler_params=pltpu.CompilerParams(
            dimension_semantics=("parallel",),          # megacore sharding on v7x
            vmem_limit_bytes=32 * 1024 * 1024,          # explicit; per-pair set is tiny
        ),
    )(keep_idx, frames_bf16, frames_bf16, wmaps,
      p["wred"], p["bred"], p["w31"], p["b31"], p["w4"], p["b4"], p["w41"], p["b41"])


# ----------------------------------------------------------------------------
# Pallas kernel 2: selection matmuls + encoder LSTM (unrolled) + decoder + head
# ----------------------------------------------------------------------------

def _seq_kernel(box_ref, diffs_ref, senc_ref, sdec_ref, dhead_ref,
                ewih_ref, ewhh_ref, eb_ref,
                dwih_ref, dwhh_ref, db_ref,
                lw_ref, lb_ref, o_ref, *, L, Hdim):
    Nk, _, nbc = box_ref.shape
    B = diffs_ref.shape[0]

    bf = box_ref[...].reshape(Nk, nbc)            # (Nk, nbc) f32 pooled box feats
    diffs = diffs_ref[...]                        # (B, L, F)
    senc = senc_ref[...]                          # (L, B, Nk) selection
    ewih = ewih_ref[...]
    ewhh = ewhh_ref[...]
    eb = eb_ref[...]

    def gates_to_hc(gates, c_prev):
        # full (B, 4H=128) lane-aligned nonlinearities, then slice i/f/g/o
        sg = jax.nn.sigmoid(gates)
        th = jnp.tanh(gates)
        i_g = sg[:, 0:Hdim]
        f_g = sg[:, Hdim:2 * Hdim]
        g_g = th[:, 2 * Hdim:3 * Hdim]
        o_g = sg[:, 3 * Hdim:4 * Hdim]
        c_new = f_g * c_prev + i_g * g_g
        return o_g * jnp.tanh(c_new), c_new

    h = jnp.zeros((B, Hdim), jnp.float32)
    c = jnp.zeros((B, Hdim), jnp.float32)
    for t in range(L):                            # static unroll (L fixed, small)
        box_t = jnp.dot(senc[t], bf, preferred_element_type=jnp.float32)  # (B, nbc)
        x_t = jnp.concatenate([diffs[:, t, :], box_t], axis=-1)           # (B, I)
        g = (jnp.dot(x_t, ewih, preferred_element_type=jnp.float32)
             + jnp.dot(h, ewhh, preferred_element_type=jnp.float32) + eb)
        h, c = gates_to_hc(g, c)

    # decoder single step: h0 = encoder h_n, c0 = 0 (matches the reference),
    # fused with relu + output linear (n_layers=1, sum over layers = identity)
    dec_box = jnp.dot(sdec_ref[...], bf, preferred_element_type=jnp.float32)
    dec_x = jnp.concatenate([dhead_ref[...], dec_box], axis=-1)
    g = (jnp.dot(dec_x, dwih_ref[...], preferred_element_type=jnp.float32)
         + jnp.dot(h, dwhh_ref[...], preferred_element_type=jnp.float32) + db_ref[...])
    h_dec, _ = gates_to_hc(g, jnp.zeros((B, Hdim), jnp.float32))
    h_relu = jnp.maximum(h_dec, 0.0)
    o_ref[...] = (jnp.dot(h_relu, lw_ref[...], preferred_element_type=jnp.float32)
                  + lb_ref[...])


def seq_head(box_feat, diffs, s_enc, s_dec, dec_head, params, L, Hdim, out_dim):
    B = diffs.shape[0]
    kern = functools.partial(_seq_kernel, L=L, Hdim=Hdim)
    return pl.pallas_call(
        kern,
        out_shape=jax.ShapeDtypeStruct((B, out_dim), jnp.float32),
    )(box_feat, diffs, s_enc, s_dec, dec_head,
      params["enc_wih_t"], params["enc_whh_t"], params["enc_b"].reshape(1, -1),
      params["dec_wih_t"], params["dec_whh_t"], params["dec_b"].reshape(1, -1),
      params["lin_w_t"], params["lin_b"].reshape(1, -1))


# ----------------------------------------------------------------------------
# JAX glue: vectorized RoIAlign weight maps (scatter-free) + weight re-layout
# ----------------------------------------------------------------------------

def roi_weight_maps(boxes, H, W, R, sr, scale):
    """torchvision roi_align(aligned=False) + average over bins/samples as a
    per-box (H, W) weight map (separable-bilinear formulation):
    sum_{h,w} wmap[n,h,w] * feat[n,h,w,:] == averaged RoIAlign feature."""
    boxes = boxes.astype(jnp.float32)
    x1 = boxes[:, 0] * scale
    y1 = boxes[:, 1] * scale
    x2 = boxes[:, 2] * scale
    y2 = boxes[:, 3] * scale
    roi_w = jnp.maximum(x2 - x1, 1.0)
    roi_h = jnp.maximum(y2 - y1, 1.0)
    bin_w = roi_w / R
    bin_h = roi_h / R
    count = float(R * R * sr * sr)

    off = (np.repeat(np.arange(R), sr) +
           (np.tile(np.arange(sr), R) + 0.5) / sr).astype(np.float32)     # (R*sr,)
    ys = y1[:, None] + off[None, :] * bin_h[:, None]                      # (N, S)
    xs = x1[:, None] + off[None, :] * bin_w[:, None]                      # (N, S)

    def axis_basis(coords, size):
        valid = (coords > -1.0) & (coords < float(size))
        c = jnp.maximum(coords, 0.0)
        low = jnp.minimum(jnp.floor(c), size - 1).astype(jnp.int32)
        high = jnp.minimum(low + 1, size - 1)
        c = jnp.where(low >= size - 1, float(size - 1), c)
        l = c - low.astype(jnp.float32)
        idx = jnp.arange(size)[None, None, :]
        basis = ((1.0 - l)[..., None] * (idx == low[..., None]) +
                 l[..., None] * (idx == high[..., None]))
        return basis, valid

    By, vy = axis_basis(ys, H)                                            # (N,S,H),(N,S)
    Bx, vx = axis_basis(xs, W)                                            # (N,S,W),(N,S)
    v = (vy[:, :, None] & vx[:, None, :]).astype(jnp.float32) / count     # (N,S,S)
    tmp = jnp.einsum('nab,nbj->naj', v, Bx)                               # (N,S,W)
    return jnp.einsum('nai,naj->nij', By, tmp)                            # (N,H,W)


def _im2col_weight(w, cin_pad):
    """(Cout, Cin, 3, 3) torch conv weight -> (9*cin_pad, Cout) bf16 im2col layout."""
    cout, cin = w.shape[0], w.shape[1]
    w = jnp.transpose(w, (2, 3, 1, 0))                        # (3,3,Cin,Cout)
    if cin_pad > cin:
        w = jnp.pad(w, ((0, 0), (0, 0), (0, cin_pad - cin), (0, 0)))
    return w.reshape(9 * cin_pad, cout).astype(jnp.bfloat16)


# ----------------------------------------------------------------------------
# Parameters
# ----------------------------------------------------------------------------

def init_params(key, cfg):
    def nrm(k, shape, scale=0.05):
        return scale * jax.random.normal(k, shape, dtype=jnp.float32)

    ks = list(jax.random.split(key, 24))
    P2 = cfg["patch_size"] ** 2
    cc, nbc = cfg["conv_channels"], cfg["n_box_channels"]
    H, I = cfg["hidden_size"], cfg["input_size"]
    in31 = P2 + 32  # correlation_only=False -> 32 redirected channels + P^2
    p = {}
    p["conv_redir_w"] = nrm(ks[0], (32, 256, 1, 1)); p["conv_redir_b"] = nrm(ks[1], (32,), 0.01)
    p["conv3_1_w"] = nrm(ks[2], (cc, in31, 3, 3));   p["conv3_1_b"] = nrm(ks[3], (cc,), 0.01)
    p["conv4_w"] = nrm(ks[4], (cc, cc, 3, 3));       p["conv4_b"] = nrm(ks[5], (cc,), 0.01)
    p["conv4_1_w"] = nrm(ks[6], (nbc, cc, 3, 3));    p["conv4_1_b"] = nrm(ks[7], (nbc,), 0.01)
    # encoder / decoder LSTMs (n_layers=1); store transposed weights + summed bias
    p["enc_wih_t"] = nrm(ks[8], (4 * H, I)).T
    p["enc_whh_t"] = nrm(ks[9], (4 * H, H)).T
    p["enc_b"] = nrm(ks[10], (4 * H,), 0.01) + nrm(ks[11], (4 * H,), 0.01)
    p["dec_wih_t"] = nrm(ks[12], (4 * H, I)).T
    p["dec_whh_t"] = nrm(ks[13], (4 * H, H)).T
    p["dec_b"] = nrm(ks[14], (4 * H,), 0.01) + nrm(ks[15], (4 * H,), 0.01)
    p["lin_w_t"] = nrm(ks[16], (cfg["output_size"], H)).T
    p["lin_b"] = nrm(ks[17], (cfg["output_size"],), 0.01)
    return p


# ----------------------------------------------------------------------------
# Module-level jitted forward (no per-call retrace)
# ----------------------------------------------------------------------------

@jax.jit
def _forward_impl(params, diffs, boxes_resized, feats_nchw, keep_idx,
                  s_enc, s_dec, dec_head, scale):
    P = CFG["patch_size"]
    dil = CFG["dilation_patch"]
    R = CFG["roi_output_size"]
    nbc = CFG["n_box_channels"]
    Hh = CFG["hidden_size"]
    B, L, _ = diffs.shape
    T, C, Hf, Wf = feats_nchw.shape

    # bf16 BEFORE the NCHW -> NHWC transpose (halves the transpose HBM traffic)
    frames = jnp.transpose(feats_nchw.astype(jnp.bfloat16), (0, 2, 3, 1))  # (T,H,W,C)

    # scatter-free RoIAlign weight maps for the kept pairs only
    wmaps = roi_weight_maps(boxes_resized[keep_idx], Hf, Wf, R, 2, scale)  # (Nk,H,W)

    # conv weights rearranged once for the fused kernel (bf16 operands)
    vis_p = dict(
        wred=params["conv_redir_w"].reshape(32, 256).T.astype(jnp.bfloat16),
        bred=params["conv_redir_b"].reshape(1, -1),
        w31=_im2col_weight(params["conv3_1_w"], C31_CIN_PAD),
        b31=params["conv3_1_b"].reshape(1, -1),
        w4=_im2col_weight(params["conv4_w"], CFG["conv_channels"]),
        b4=params["conv4_b"].reshape(1, -1),
        w41=_im2col_weight(params["conv4_1_w"], CFG["conv_channels"]),
        b41=params["conv4_1_b"].reshape(1, -1),
    )

    # fused pallas call 1: per-pair correlation + conv tower + RoI pooling
    box_feat = vision_tower(frames, keep_idx, wmaps, vis_p,
                            Hf, Wf, P, dil, C, C31_CIN_PAD, nbc)           # (Nk,1,nbc)

    # fused pallas call 2: selection + encoder LSTM + decoder + relu + linear
    out = seq_head(box_feat, diffs.astype(jnp.float32), s_enc, s_dec, dec_head,
                   params, L, Hh, CFG["output_size"])
    return out[:, None, :]                                                 # (B,1,6)


def correlation_seq2seq_forward(params, diffs, boxes_target, boxes_resized,
                                image_features_nchw, image_sizes, lengths_list, cfg):
    assert boxes_target.shape[1] == 1
    assert cfg["avg_box_features"] and cfg["sum_lstm_layers"] and cfg["n_layers"] == 1
    assert not cfg["correlation_only"] and not cfg["use_env_features"]

    B, L, Fdim = diffs.shape
    T = image_features_nchw.shape[0]
    Hf = image_features_nchw.shape[2]

    # ----- static python/numpy bookkeeping from `lengths` (mirrors .tolist()) -----
    lengths = [int(l) for l in lengths_list]
    assert all(l >= 2 for l in lengths), "tracks must have >= 2 frames"
    bounds = (np.cumsum(lengths) - 1).tolist()
    keep = sorted(set(range(T - 1)) - set(bounds[:-1]))
    keep_np = np.asarray(keep, dtype=np.int32)
    Nk = len(keep)
    assert Nk > 0

    corr_lengths = [l - 1 for l in lengths]
    target_idc = (np.cumsum(corr_lengths) - 1).tolist()
    in_idc = sorted(set(range(Nk)) - set(target_idc))

    # selection tensors: which pooled box feature feeds which (time, track) slot
    s_enc = np.zeros((L, B, Nk), np.float32)
    if len(in_idc) > 0 and not cfg["correlation_last_only"]:
        mask_positions = []
        for i, l in enumerate(corr_lengths):
            if l - 1 > 0:
                for pos in range(L - (l - 1), L):
                    mask_positions.append((i, pos))
        for (bi, pos), ci in zip(mask_positions, in_idc):
            s_enc[pos, bi, ci] = 1.0
    s_dec = np.zeros((B, Nk), np.float32)
    for bi, ci in enumerate(target_idc):
        s_dec[bi, ci] = 1.0
    dec_head = np.zeros((B, Fdim), np.float32)
    dec_head[:, Fdim - 2] = 1.0

    # MultiScaleRoIAlign canonical-scale heuristic
    img_h = float(np.asarray(image_sizes)[keep_np][0][0])
    scale = 2.0 ** round(math.log2(Hf / img_h))

    return _forward_impl(params, diffs, boxes_resized, image_features_nchw,
                         jnp.asarray(keep_np),
                         jnp.asarray(s_enc), jnp.asarray(s_dec), jnp.asarray(dec_head),
                         jnp.asarray(scale, dtype=jnp.float32))


# ----------------------------------------------------------------------------
# Main
# ----------------------------------------------------------------------------

if __name__ == "__main__":
    key = jax.random.PRNGKey(0)
    k_par, k_feat, k_diff, k_xy, k_wh, k_tgt = jax.random.split(key, 6)

    cfg = CFG
    params = init_params(k_par, cfg)

    # synthetic inputs
    lengths = [4, 4]                      # 2 tracks, 4 frames each
    B, L = 2, 4
    T = sum(lengths)                      # 8 frames total
    Hf = Wf = 8                           # feature-map spatial size
    image_features = jax.random.normal(k_feat, (T, 256, Hf, Wf), dtype=jnp.float32) * 0.5
    diffs = jax.random.normal(k_diff, (B, L, 6), dtype=jnp.float32) * 0.1
    xy1 = jax.random.uniform(k_xy, (T, 2), minval=0.5, maxval=3.0)
    wh = jax.random.uniform(k_wh, (T, 2), minval=2.0, maxval=4.0)
    boxes_resized = jnp.concatenate([xy1, xy1 + wh], axis=-1)         # (T,4) x1,y1,x2,y2
    image_sizes = jnp.full((T, 2), Hf, dtype=jnp.int32)               # image == feature size -> scale 1
    boxes_target = jax.random.normal(k_tgt, (B, 1, 4), dtype=jnp.float32)

    out = correlation_seq2seq_forward(params, diffs, boxes_target, boxes_resized,
                                      image_features, image_sizes, lengths, cfg)
    out = jax.block_until_ready(out)
    assert out.shape == (B, 1, 6) and out.dtype == jnp.float32
    assert bool(jnp.all(jnp.isfinite(out)))
    print("KERNEL_OK")
</pallas_src>

<mosaic_0001>
module attributes {stable_mosaic.version = 11 : i64} {
  func.func @_vision_kernel(%arg0: i32, %arg1: memref<6xi32, #tpu.memory_space<smem>>, %arg2: memref<1x8x8x256xbf16, #tpu.memory_space<vmem>>, %arg3: memref<1x8x8x256xbf16, #tpu.memory_space<vmem>>, %arg4: memref<1x8x8xf32, #tpu.memory_space<vmem>>, %arg5: memref<256x32xbf16, #tpu.memory_space<vmem>>, %arg6: memref<1x32xf32, #tpu.memory_space<vmem>>, %arg7: memref<432x64xbf16, #tpu.memory_space<vmem>>, %arg8: memref<1x64xf32, #tpu.memory_space<vmem>>, %arg9: memref<576x64xbf16, #tpu.memory_space<vmem>>, %arg10: memref<1x64xf32, #tpu.memory_space<vmem>>, %arg11: memref<576x16xbf16, #tpu.memory_space<vmem>>, %arg12: memref<1x16xf32, #tpu.memory_space<vmem>>, %arg13: memref<1x1x16xf32, #tpu.memory_space<vmem>>) attributes {dimension_semantics = [#tpu.dimension_semantics<parallel>], iteration_bounds = array<i64: 6>, scalar_prefetch = 1 : i64, scratch_operands = 0 : i64, tpu.core_type = #tpu.core_type<tc>, window_params = [{transform_indices = @transform_0, window_bounds = array<i64: 1, 8, 8, 256>}, {transform_indices = @transform_1, window_bounds = array<i64: 1, 8, 8, 256>}, {transform_indices = @transform_2, window_bounds = array<i64: 1, 8, 8>}, {pipeline_mode = #tpu.pipeline_mode<synchronous>, transform_indices = @transform_3, window_bounds = array<i64: 256, 32>}, {pipeline_mode = #tpu.pipeline_mode<synchronous>, transform_indices = @transform_4, window_bounds = array<i64: 1, 32>}, {pipeline_mode = #tpu.pipeline_mode<synchronous>, transform_indices = @transform_5, window_bounds = array<i64: 432, 64>}, {pipeline_mode = #tpu.pipeline_mode<synchronous>, transform_indices = @transform_6, window_bounds = array<i64: 1, 64>}, {pipeline_mode = #tpu.pipeline_mode<synchronous>, transform_indices = @transform_7, window_bounds = array<i64: 576, 64>}, {pipeline_mode = #tpu.pipeline_mode<synchronous>, transform_indices = @transform_8, window_bounds = array<i64: 1, 64>}, {pipeline_mode = #tpu.pipeline_mode<synchronous>, transform_indices = @transform_9, window_bounds = array<i64: 576, 16>}, {pipeline_mode = #tpu.pipeline_mode<synchronous>, transform_indices = @transform_10, window_bounds = array<i64: 1, 16>}, {transform_indices = @transform_11, window_bounds = array<i64: 1, 1, 16>}]} {
    %c0 = arith.constant 0 : index
    %c0_0 = arith.constant 0 : index
    %c0_1 = arith.constant 0 : index
    %c0_2 = arith.constant 0 : index
    %0 = vector.load %arg2[%c0, %c0_0, %c0_1, %c0_2] : memref<1x8x8x256xbf16, #tpu.memory_space<vmem>>, vector<1x8x8x256xbf16>
    %1 = vector.shape_cast %0 : vector<1x8x8x256xbf16> to vector<8x8x256xbf16>
    %c0_3 = arith.constant 0 : index
    %c0_4 = arith.constant 0 : index
    %c0_5 = arith.constant 0 : index
    %c0_6 = arith.constant 0 : index
    %2 = vector.load %arg3[%c0_3, %c0_4, %c0_5, %c0_6] : memref<1x8x8x256xbf16, #tpu.memory_space<vmem>>, vector<1x8x8x256xbf16>
    %3 = vector.shape_cast %2 : vector<1x8x8x256xbf16> to vector<8x8x256xbf16>
    %cst = arith.constant 0.000000e+00 : bf16
    %4 = vector.broadcast %cst : bf16 to vector<1x8x256xbf16>
    %5 = tpu.concatenate %4, %3, %4 in 0 : vector<1x8x256xbf16>, vector<8x8x256xbf16>, vector<1x8x256xbf16> -> vector<10x8x256xbf16>
    %cst_7 = arith.constant 0.000000e+00 : bf16
    %6 = vector.broadcast %cst_7 : bf16 to vector<10x1x256xbf16>
    %7 = tpu.concatenate %6, %5, %6 in 1 : vector<10x1x256xbf16>, vector<10x8x256xbf16>, vector<10x1x256xbf16> -> vector<10x10x256xbf16>
    %cst_8 = arith.constant 3.906250e-03 : bf16
    %8 = vector.broadcast %cst_8 : bf16 to vector<8x8x256xbf16>
    %9 = arith.mulf %1, %8 : vector<8x8x256xbf16>
    %10 = vector.extract_strided_slice %7 {offsets = [0, 0, 0], sizes = [8, 8, 256], strides = [1, 1, 1]} : vector<10x10x256xbf16> to vector<8x8x256xbf16>
    %11 = arith.mulf %9, %10 : vector<8x8x256xbf16>
    %12 = arith.extf %11 : vector<8x8x256xbf16> to vector<8x8x256xf32>
    %cst_9 = arith.constant dense<0.000000e+00> : vector<8x8xf32>
    %13 = vector.multi_reduction <add>, %12, %cst_9 [2] : vector<8x8x256xf32> to vector<8x8xf32>
    %14 = vector.extract_strided_slice %7 {offsets = [0, 1, 0], sizes = [8, 8, 256], strides = [1, 1, 1]} : vector<10x10x256xbf16> to vector<8x8x256xbf16>
    %15 = arith.mulf %9, %14 : vector<8x8x256xbf16>
    %16 = arith.extf %15 : vector<8x8x256xbf16> to vector<8x8x256xf32>
    %cst_10 = arith.constant dense<0.000000e+00> : vector<8x8xf32>
    %17 = vector.multi_reduction <add>, %16, %cst_10 [2] : vector<8x8x256xf32> to vector<8x8xf32>
    %18 = vector.extract_strided_slice %7 {offsets = [0, 2, 0], sizes = [8, 8, 256], strides = [1, 1, 1]} : vector<10x10x256xbf16> to vector<8x8x256xbf16>
    %19 = arith.mulf %9, %18 : vector<8x8x256xbf16>
    %20 = arith.extf %19 : vector<8x8x256xbf16> to vector<8x8x256xf32>
    %cst_11 = arith.constant dense<0.000000e+00> : vector<8x8xf32>
    %21 = vector.multi_reduction <add>, %20, %cst_11 [2] : vector<8x8x256xf32> to vector<8x8xf32>
    %22 = vector.extract_strided_slice %7 {offsets = [1, 0, 0], sizes = [8, 8, 256], strides = [1, 1, 1]} : vector<10x10x256xbf16> to vector<8x8x256xbf16>
    %23 = arith.mulf %9, %22 : vector<8x8x256xbf16>
    %24 = arith.extf %23 : vector<8x8x256xbf16> to vector<8x8x256xf32>
    %cst_12 = arith.constant dense<0.000000e+00> : vector<8x8xf32>
    %25 = vector.multi_reduction <add>, %24, %cst_12 [2] : vector<8x8x256xf32> to vector<8x8xf32>
    %26 = vector.extract_strided_slice %7 {offsets = [1, 1, 0], sizes = [8, 8, 256], strides = [1, 1, 1]} : vector<10x10x256xbf16> to vector<8x8x256xbf16>
    %27 = arith.mulf %9, %26 : vector<8x8x256xbf16>
    %28 = arith.extf %27 : vector<8x8x256xbf16> to vector<8x8x256xf32>
    %cst_13 = arith.constant dense<0.000000e+00> : vector<8x8xf32>
    %29 = vector.multi_reduction <add>, %28, %cst_13 [2] : vector<8x8x256xf32> to vector<8x8xf32>
    %30 = vector.extract_strided_slice %7 {offsets = [1, 2, 0], sizes = [8, 8, 256], strides = [1, 1, 1]} : vector<10x10x256xbf16> to vector<8x8x256xbf16>
    %31 = arith.mulf %9, %30 : vector<8x8x256xbf16>
    %32 = arith.extf %31 : vector<8x8x256xbf16> to vector<8x8x256xf32>
    %cst_14 = arith.constant dense<0.000000e+00> : vector<8x8xf32>
    %33 = vector.multi_reduction <add>, %32, %cst_14 [2] : vector<8x8x256xf32> to vector<8x8xf32>
    %34 = vector.extract_strided_slice %7 {offsets = [2, 0, 0], sizes = [8, 8, 256], strides = [1, 1, 1]} : vector<10x10x256xbf16> to vector<8x8x256xbf16>
    %35 = arith.mulf %9, %34 : vector<8x8x256xbf16>
    %36 = arith.extf %35 : vector<8x8x256xbf16> to vector<8x8x256xf32>
    %cst_15 = arith.constant dense<0.000000e+00> : vector<8x8xf32>
    %37 = vector.multi_reduction <add>, %36, %cst_15 [2] : vector<8x8x256xf32> to vector<8x8xf32>
    %38 = vector.extract_strided_slice %7 {offsets = [2, 1, 0], sizes = [8, 8, 256], strides = [1, 1, 1]} : vector<10x10x256xbf16> to vector<8x8x256xbf16>
    %39 = arith.mulf %9, %38 : vector<8x8x256xbf16>
    %40 = arith.extf %39 : vector<8x8x256xbf16> to vector<8x8x256xf32>
    %cst_16 = arith.constant dense<0.000000e+00> : vector<8x8xf32>
    %41 = vector.multi_reduction <add>, %40, %cst_16 [2] : vector<8x8x256xf32> to vector<8x8xf32>
    %42 = vector.extract_strided_slice %7 {offsets = [2, 2, 0], sizes = [8, 8, 256], strides = [1, 1, 1]} : vector<10x10x256xbf16> to vector<8x8x256xbf16>
    %43 = arith.mulf %9, %42 : vector<8x8x256xbf16>
    %44 = arith.extf %43 : vector<8x8x256xbf16> to vector<8x8x256xf32>
    %cst_17 = arith.constant dense<0.000000e+00> : vector<8x8xf32>
    %45 = vector.multi_reduction <add>, %44, %cst_17 [2] : vector<8x8x256xf32> to vector<8x8xf32>
    %46 = vector.shape_cast %13 : vector<8x8xf32> to vector<8x8x1xf32>
    %47 = vector.shape_cast %17 : vector<8x8xf32> to vector<8x8x1xf32>
    %48 = vector.shape_cast %21 : vector<8x8xf32> to vector<8x8x1xf32>
    %49 = vector.shape_cast %25 : vector<8x8xf32> to vector<8x8x1xf32>
    %50 = vector.shape_cast %29 : vector<8x8xf32> to vector<8x8x1xf32>
    %51 = vector.shape_cast %33 : vector<8x8xf32> to vector<8x8x1xf32>
    %52 = vector.shape_cast %37 : vector<8x8xf32> to vector<8x8x1xf32>
    %53 = vector.shape_cast %41 : vector<8x8xf32> to vector<8x8x1xf32>
    %54 = vector.shape_cast %45 : vector<8x8xf32> to vector<8x8x1xf32>
    %55 = tpu.concatenate %46, %47, %48, %49, %50, %51, %52, %53, %54 in 2 : vector<8x8x1xf32>, vector<8x8x1xf32>, vector<8x8x1xf32>, vector<8x8x1xf32>, vector<8x8x1xf32>, vector<8x8x1xf32>, vector<8x8x1xf32>, vector<8x8x1xf32>, vector<8x8x1xf32> -> vector<8x8x9xf32>
    %cst_18 = arith.constant 0.000000e+00 : f32
    %56 = vector.broadcast %cst_18 : f32 to vector<8x8x9xf32>
    %57 = arith.cmpf ogt, %55, %56 : vector<8x8x9xf32>
    %cst_19 = arith.constant 1.000000e-01 : f32
    %58 = vector.broadcast %cst_19 : f32 to vector<8x8x9xf32>
    %59 = arith.mulf %58, %55 : vector<8x8x9xf32>
    %60 = arith.select %57, %55, %59 : vector<8x8x9xi1>, vector<8x8x9xf32>
    %61 = vector.shape_cast %1 : vector<8x8x256xbf16> to vector<64x256xbf16>
    %c0_20 = arith.constant 0 : index
    %c0_21 = arith.constant 0 : index
    %62 = vector.load %arg5[%c0_20, %c0_21] : memref<256x32xbf16, #tpu.memory_space<vmem>>, vector<256x32xbf16>
    %cst_22 = arith.constant dense<0.000000e+00> : vector<64x32xf32>
    %63 = tpu.matmul %61, %62, %cst_22 {dimension_numbers = #tpu.dot_dimension_numbers<[1], [0], [0], [1], [0, 0, 1, 1], [], []>} : vector<64x256xbf16>, vector<256x32xbf16>, vector<64x32xf32> -> vector<64x32xf32>
    %c0_23 = arith.constant 0 : index
    %c0_24 = arith.constant 0 : index
    %64 = vector.load %arg6[%c0_23, %c0_24] : memref<1x32xf32, #tpu.memory_space<vmem>>, vector<1x32xf32>
    %65 = vector.broadcast %64 : vector<1x32xf32> to vector<64x32xf32>
    %66 = arith.addf %63, %65 : vector<64x32xf32>
    %cst_25 = arith.constant 0.000000e+00 : f32
    %67 = vector.broadcast %cst_25 : f32 to vector<64x32xf32>
    %68 = arith.cmpf ogt, %66, %67 : vector<64x32xf32>
    %cst_26 = arith.constant 1.000000e-01 : f32
    %69 = vector.broadcast %cst_26 : f32 to vector<64x32xf32>
    %70 = arith.mulf %69, %66 : vector<64x32xf32>
    %71 = arith.select %68, %66, %70 : vector<64x32xi1>, vector<64x32xf32>
    %72 = vector.shape_cast %71 : vector<64x32xf32> to vector<8x8x32xf32>
    %cst_27 = arith.constant 0.000000e+00 : f32
    %73 = vector.broadcast %cst_27 : f32 to vector<8x8x7xf32>
    %74 = tpu.concatenate %72, %60, %73 in 2 : vector<8x8x32xf32>, vector<8x8x9xf32>, vector<8x8x7xf32> -> vector<8x8x48xf32>
    %75 = arith.truncf %74 : vector<8x8x48xf32> to vector<8x8x48xbf16>
    %cst_28 = arith.constant 0.000000e+00 : bf16
    %76 = vector.broadcast %cst_28 : bf16 to vector<1x8x48xbf16>
    %77 = tpu.concatenate %76, %75, %76 in 0 : vector<1x8x48xbf16>, vector<8x8x48xbf16>, vector<1x8x48xbf16> -> vector<10x8x48xbf16>
    %cst_29 = arith.constant 0.000000e+00 : bf16
    %78 = vector.broadcast %cst_29 : bf16 to vector<10x1x48xbf16>
    %79 = tpu.concatenate %78, %77, %78 in 1 : vector<10x1x48xbf16>, vector<10x8x48xbf16>, vector<10x1x48xbf16> -> vector<10x10x48xbf16>
    %80 = vector.extract_strided_slice %79 {offsets = [0, 0, 0], sizes = [8, 8, 48], strides = [1, 1, 1]} : vector<10x10x48xbf16> to vector<8x8x48xbf16>
    %81 = vector.shape_cast %80 : vector<8x8x48xbf16> to vector<64x48xbf16>
    %82 = vector.extract_strided_slice %79 {offsets = [0, 1, 0], sizes = [8, 8, 48], strides = [1, 1, 1]} : vector<10x10x48xbf16> to vector<8x8x48xbf16>
    %83 = vector.shape_cast %82 : vector<8x8x48xbf16> to vector<64x48xbf16>
    %84 = vector.extract_strided_slice %79 {offsets = [0, 2, 0], sizes = [8, 8, 48], strides = [1, 1, 1]} : vector<10x10x48xbf16> to vector<8x8x48xbf16>
    %85 = vector.shape_cast %84 : vector<8x8x48xbf16> to vector<64x48xbf16>
    %86 = vector.extract_strided_slice %79 {offsets = [1, 0, 0], sizes = [8, 8, 48], strides = [1, 1, 1]} : vector<10x10x48xbf16> to vector<8x8x48xbf16>
    %87 = vector.shape_cast %86 : vector<8x8x48xbf16> to vector<64x48xbf16>
    %88 = vector.extract_strided_slice %79 {offsets = [1, 1, 0], sizes = [8, 8, 48], strides = [1, 1, 1]} : vector<10x10x48xbf16> to vector<8x8x48xbf16>
    %89 = vector.shape_cast %88 : vector<8x8x48xbf16> to vector<64x48xbf16>
    %90 = vector.extract_strided_slice %79 {offsets = [1, 2, 0], sizes = [8, 8, 48], strides = [1, 1, 1]} : vector<10x10x48xbf16> to vector<8x8x48xbf16>
    %91 = vector.shape_cast %90 : vector<8x8x48xbf16> to vector<64x48xbf16>
    %92 = vector.extract_strided_slice %79 {offsets = [2, 0, 0], sizes = [8, 8, 48], strides = [1, 1, 1]} : vector<10x10x48xbf16> to vector<8x8x48xbf16>
    %93 = vector.shape_cast %92 : vector<8x8x48xbf16> to vector<64x48xbf16>
    %94 = vector.extract_strided_slice %79 {offsets = [2, 1, 0], sizes = [8, 8, 48], strides = [1, 1, 1]} : vector<10x10x48xbf16> to vector<8x8x48xbf16>
    %95 = vector.shape_cast %94 : vector<8x8x48xbf16> to vector<64x48xbf16>
    %96 = vector.extract_strided_slice %79 {offsets = [2, 2, 0], sizes = [8, 8, 48], strides = [1, 1, 1]} : vector<10x10x48xbf16> to vector<8x8x48xbf16>
    %97 = vector.shape_cast %96 : vector<8x8x48xbf16> to vector<64x48xbf16>
    %98 = tpu.concatenate %81, %83, %85, %87, %89, %91, %93, %95, %97 in 1 : vector<64x48xbf16>, vector<64x48xbf16>, vector<64x48xbf16>, vector<64x48xbf16>, vector<64x48xbf16>, vector<64x48xbf16>, vector<64x48xbf16>, vector<64x48xbf16>, vector<64x48xbf16> -> vector<64x432xbf16>
    %c0_30 = arith.constant 0 : index
    %c0_31 = arith.constant 0 : index
    %99 = vector.load %arg7[%c0_30, %c0_31] : memref<432x64xbf16, #tpu.memory_space<vmem>>, vector<432x64xbf16>
    %cst_32 = arith.constant dense<0.000000e+00> : vector<64x64xf32>
    %100 = tpu.matmul %98, %99, %cst_32 {dimension_numbers = #tpu.dot_dimension_numbers<[1], [0], [0], [1], [0, 0, 1, 1], [], []>} : vector<64x432xbf16>, vector<432x64xbf16>, vector<64x64xf32> -> vector<64x64xf32>
    %c0_33 = arith.constant 0 : index
    %c0_34 = arith.constant 0 : index
    %101 = vector.load %arg8[%c0_33, %c0_34] : memref<1x64xf32, #tpu.memory_space<vmem>>, vector<1x64xf32>
    %102 = vector.broadcast %101 : vector<1x64xf32> to vector<64x64xf32>
    %103 = arith.addf %100, %102 : vector<64x64xf32>
    %cst_35 = arith.constant 0.000000e+00 : f32
    %104 = vector.broadcast %cst_35 : f32 to vector<64x64xf32>
    %105 = arith.cmpf ogt, %103, %104 : vector<64x64xf32>
    %cst_36 = arith.constant 1.000000e-01 : f32
    %106 = vector.broadcast %cst_36 : f32 to vector<64x64xf32>
    %107 = arith.mulf %106, %103 : vector<64x64xf32>
    %108 = arith.select %105, %103, %107 : vector<64x64xi1>, vector<64x64xf32>
    %109 = arith.truncf %108 : vector<64x64xf32> to vector<64x64xbf16>
    %110 = vector.shape_cast %109 : vector<64x64xbf16> to vector<8x8x64xbf16>
    %cst_37 = arith.constant 0.000000e+00 : bf16
    %111 = vector.broadcast %cst_37 : bf16 to vector<1x8x64xbf16>
    %112 = tpu.concatenate %111, %110, %111 in 0 : vector<1x8x64xbf16>, vector<8x8x64xbf16>, vector<1x8x64xbf16> -> vector<10x8x64xbf16>
    %cst_38 = arith.constant 0.000000e+00 : bf16
    %113 = vector.broadcast %cst_38 : bf16 to vector<10x1x64xbf16>
    %114 = tpu.concatenate %113, %112, %113 in 1 : vector<10x1x64xbf16>, vector<10x8x64xbf16>, vector<10x1x64xbf16> -> vector<10x10x64xbf16>
    %115 = vector.extract_strided_slice %114 {offsets = [0, 0, 0], sizes = [8, 8, 64], strides = [1, 1, 1]} : vector<10x10x64xbf16> to vector<8x8x64xbf16>
    %116 = vector.shape_cast %115 : vector<8x8x64xbf16> to vector<64x64xbf16>
    %117 = vector.extract_strided_slice %114 {offsets = [0, 1, 0], sizes = [8, 8, 64], strides = [1, 1, 1]} : vector<10x10x64xbf16> to vector<8x8x64xbf16>
    %118 = vector.shape_cast %117 : vector<8x8x64xbf16> to vector<64x64xbf16>
    %119 = vector.extract_strided_slice %114 {offsets = [0, 2, 0], sizes = [8, 8, 64], strides = [1, 1, 1]} : vector<10x10x64xbf16> to vector<8x8x64xbf16>
    %120 = vector.shape_cast %119 : vector<8x8x64xbf16> to vector<64x64xbf16>
    %121 = vector.extract_strided_slice %114 {offsets = [1, 0, 0], sizes = [8, 8, 64], strides = [1, 1, 1]} : vector<10x10x64xbf16> to vector<8x8x64xbf16>
    %122 = vector.shape_cast %121 : vector<8x8x64xbf16> to vector<64x64xbf16>
    %123 = vector.extract_strided_slice %114 {offsets = [1, 1, 0], sizes = [8, 8, 64], strides = [1, 1, 1]} : vector<10x10x64xbf16> to vector<8x8x64xbf16>
    %124 = vector.shape_cast %123 : vector<8x8x64xbf16> to vector<64x64xbf16>
    %125 = vector.extract_strided_slice %114 {offsets = [1, 2, 0], sizes = [8, 8, 64], strides = [1, 1, 1]} : vector<10x10x64xbf16> to vector<8x8x64xbf16>
    %126 = vector.shape_cast %125 : vector<8x8x64xbf16> to vector<64x64xbf16>
    %127 = vector.extract_strided_slice %114 {offsets = [2, 0, 0], sizes = [8, 8, 64], strides = [1, 1, 1]} : vector<10x10x64xbf16> to vector<8x8x64xbf16>
    %128 = vector.shape_cast %127 : vector<8x8x64xbf16> to vector<64x64xbf16>
    %129 = vector.extract_strided_slice %114 {offsets = [2, 1, 0], sizes = [8, 8, 64], strides = [1, 1, 1]} : vector<10x10x64xbf16> to vector<8x8x64xbf16>
    %130 = vector.shape_cast %129 : vector<8x8x64xbf16> to vector<64x64xbf16>
    %131 = vector.extract_strided_slice %114 {offsets = [2, 2, 0], sizes = [8, 8, 64], strides = [1, 1, 1]} : vector<10x10x64xbf16> to vector<8x8x64xbf16>
    %132 = vector.shape_cast %131 : vector<8x8x64xbf16> to vector<64x64xbf16>
    %133 = tpu.concatenate %116, %118, %120, %122, %124, %126, %128, %130, %132 in 1 : vector<64x64xbf16>, vector<64x64xbf16>, vector<64x64xbf16>, vector<64x64xbf16>, vector<64x64xbf16>, vector<64x64xbf16>, vector<64x64xbf16>, vector<64x64xbf16>, vector<64x64xbf16> -> vector<64x576xbf16>
    %c0_39 = arith.constant 0 : index
    %c0_40 = arith.constant 0 : index
    %134 = vector.load %arg9[%c0_39, %c0_40] : memref<576x64xbf16, #tpu.memory_space<vmem>>, vector<576x64xbf16>
    %cst_41 = arith.constant dense<0.000000e+00> : vector<64x64xf32>
    %135 = tpu.matmul %133, %134, %cst_41 {dimension_numbers = #tpu.dot_dimension_numbers<[1], [0], [0], [1], [0, 0, 1, 1], [], []>} : vector<64x576xbf16>, vector<576x64xbf16>, vector<64x64xf32> -> vector<64x64xf32>
    %c0_42 = arith.constant 0 : index
    %c0_43 = arith.constant 0 : index
    %136 = vector.load %arg10[%c0_42, %c0_43] : memref<1x64xf32, #tpu.memory_space<vmem>>, vector<1x64xf32>
    %137 = vector.broadcast %136 : vector<1x64xf32> to vector<64x64xf32>
    %138 = arith.addf %135, %137 : vector<64x64xf32>
    %cst_44 = arith.constant 0.000000e+00 : f32
    %139 = vector.broadcast %cst_44 : f32 to vector<64x64xf32>
    %140 = arith.cmpf ogt, %138, %139 : vector<64x64xf32>
    %cst_45 = arith.constant 1.000000e-01 : f32
    %141 = vector.broadcast %cst_45 : f32 to vector<64x64xf32>
    %142 = arith.mulf %141, %138 : vector<64x64xf32>
    %143 = arith.select %140, %138, %142 : vector<64x64xi1>, vector<64x64xf32>
    %144 = arith.truncf %143 : vector<64x64xf32> to vector<64x64xbf16>
    %145 = vector.shape_cast %144 : vector<64x64xbf16> to vector<8x8x64xbf16>
    %cst_46 = arith.constant 0.000000e+00 : bf16
    %146 = vector.broadcast %cst_46 : bf16 to vector<1x8x64xbf16>
    %147 = tpu.concatenate %146, %145, %146 in 0 : vector<1x8x64xbf16>, vector<8x8x64xbf16>, vector<1x8x64xbf16> -> vector<10x8x64xbf16>
    %cst_47 = arith.constant 0.000000e+00 : bf16
    %148 = vector.broadcast %cst_47 : bf16 to vector<10x1x64xbf16>
    %149 = tpu.concatenate %148, %147, %148 in 1 : vector<10x1x64xbf16>, vector<10x8x64xbf16>, vector<10x1x64xbf16> -> vector<10x10x64xbf16>
    %150 = vector.extract_strided_slice %149 {offsets = [0, 0, 0], sizes = [8, 8, 64], strides = [1, 1, 1]} : vector<10x10x64xbf16> to vector<8x8x64xbf16>
    %151 = vector.shape_cast %150 : vector<8x8x64xbf16> to vector<64x64xbf16>
    %152 = vector.extract_strided_slice %149 {offsets = [0, 1, 0], sizes = [8, 8, 64], strides = [1, 1, 1]} : vector<10x10x64xbf16> to vector<8x8x64xbf16>
    %153 = vector.shape_cast %152 : vector<8x8x64xbf16> to vector<64x64xbf16>
    %154 = vector.extract_strided_slice %149 {offsets = [0, 2, 0], sizes = [8, 8, 64], strides = [1, 1, 1]} : vector<10x10x64xbf16> to vector<8x8x64xbf16>
    %155 = vector.shape_cast %154 : vector<8x8x64xbf16> to vector<64x64xbf16>
    %156 = vector.extract_strided_slice %149 {offsets = [1, 0, 0], sizes = [8, 8, 64], strides = [1, 1, 1]} : vector<10x10x64xbf16> to vector<8x8x64xbf16>
    %157 = vector.shape_cast %156 : vector<8x8x64xbf16> to vector<64x64xbf16>
    %158 = vector.extract_strided_slice %149 {offsets = [1, 1, 0], sizes = [8, 8, 64], strides = [1, 1, 1]} : vector<10x10x64xbf16> to vector<8x8x64xbf16>
    %159 = vector.shape_cast %158 : vector<8x8x64xbf16> to vector<64x64xbf16>
    %160 = vector.extract_strided_slice %149 {offsets = [1, 2, 0], sizes = [8, 8, 64], strides = [1, 1, 1]} : vector<10x10x64xbf16> to vector<8x8x64xbf16>
    %161 = vector.shape_cast %160 : vector<8x8x64xbf16> to vector<64x64xbf16>
    %162 = vector.extract_strided_slice %149 {offsets = [2, 0, 0], sizes = [8, 8, 64], strides = [1, 1, 1]} : vector<10x10x64xbf16> to vector<8x8x64xbf16>
    %163 = vector.shape_cast %162 : vector<8x8x64xbf16> to vector<64x64xbf16>
    %164 = vector.extract_strided_slice %149 {offsets = [2, 1, 0], sizes = [8, 8, 64], strides = [1, 1, 1]} : vector<10x10x64xbf16> to vector<8x8x64xbf16>
    %165 = vector.shape_cast %164 : vector<8x8x64xbf16> to vector<64x64xbf16>
    %166 = vector.extract_strided_slice %149 {offsets = [2, 2, 0], sizes = [8, 8, 64], strides = [1, 1, 1]} : vector<10x10x64xbf16> to vector<8x8x64xbf16>
    %167 = vector.shape_cast %166 : vector<8x8x64xbf16> to vector<64x64xbf16>
    %168 = tpu.concatenate %151, %153, %155, %157, %159, %161, %163, %165, %167 in 1 : vector<64x64xbf16>, vector<64x64xbf16>, vector<64x64xbf16>, vector<64x64xbf16>, vector<64x64xbf16>, vector<64x64xbf16>, vector<64x64xbf16>, vector<64x64xbf16>, vector<64x64xbf16> -> vector<64x576xbf16>
    %c0_48 = arith.constant 0 : index
    %c0_49 = arith.constant 0 : index
    %169 = vector.load %arg11[%c0_48, %c0_49] : memref<576x16xbf16, #tpu.memory_space<vmem>>, vector<576x16xbf16>
    %cst_50 = arith.constant dense<0.000000e+00> : vector<64x16xf32>
    %170 = tpu.matmul %168, %169, %cst_50 {dimension_numbers = #tpu.dot_dimension_numbers<[1], [0], [0], [1], [0, 0, 1, 1], [], []>} : vector<64x576xbf16>, vector<576x16xbf16>, vector<64x16xf32> -> vector<64x16xf32>
    %c0_51 = arith.constant 0 : index
    %c0_52 = arith.constant 0 : index
    %171 = vector.load %arg12[%c0_51, %c0_52] : memref<1x16xf32, #tpu.memory_space<vmem>>, vector<1x16xf32>
    %172 = vector.broadcast %171 : vector<1x16xf32> to vector<64x16xf32>
    %173 = arith.addf %170, %172 : vector<64x16xf32>
    %cst_53 = arith.constant 0.000000e+00 : f32
    %174 = vector.broadcast %cst_53 : f32 to vector<64x16xf32>
    %175 = arith.cmpf ogt, %173, %174 : vector<64x16xf32>
    %cst_54 = arith.constant 1.000000e-01 : f32
    %176 = vector.broadcast %cst_54 : f32 to vector<64x16xf32>
    %177 = arith.mulf %176, %173 : vector<64x16xf32>
    %178 = arith.select %175, %173, %177 : vector<64x16xi1>, vector<64x16xf32>
    %c0_55 = arith.constant 0 : index
    %c0_56 = arith.constant 0 : index
    %c0_57 = arith.constant 0 : index
    %179 = vector.load %arg4[%c0_55, %c0_56, %c0_57] : memref<1x8x8xf32, #tpu.memory_space<vmem>>, vector<1x8x8xf32>
    %180 = vector.shape_cast %179 : vector<1x8x8xf32> to vector<1x64xf32>
    %cst_58 = arith.constant dense<0.000000e+00> : vector<1x16xf32>
    %181 = tpu.matmul %180, %178, %cst_58 {dimension_numbers = #tpu.dot_dimension_numbers<[1], [0], [0], [1], [0, 0, 1, 1], [], []>} : vector<1x64xf32>, vector<64x16xf32>, vector<1x16xf32> -> vector<1x16xf32>
    %182 = vector.shape_cast %181 : vector<1x16xf32> to vector<1x1x16xf32>
    %c0_59 = arith.constant 0 : index
    %c0_60 = arith.constant 0 : index
    %c0_61 = arith.constant 0 : index
    %183 = vector.load %arg13[%c0_59, %c0_60, %c0_61] : memref<1x1x16xf32, #tpu.memory_space<vmem>>, vector<1x1x16xf32>
    tpu.vector_store %arg13[%c0_59, %c0_60, %c0_61], %182 {strides = array<i32>} : memref<1x1x16xf32, #tpu.memory_space<vmem>>, vector<1x1x16xf32>,
    return
  }
  func.func @transform_0(%arg0: i32, %arg1: memref<6xi32, #tpu.memory_space<smem>>) -> (i32, i32, i32, i32) {
    %0 = arith.index_cast %arg0 : i32 to index
    %1 = memref.load %arg1[%0] : memref<6xi32, #tpu.memory_space<smem>>
    %c0_i32 = arith.constant 0 : i32
    %c0_i32_0 = arith.constant 0 : i32
    %c0_i32_1 = arith.constant 0 : i32
    %c0_i32_2 = arith.constant 0 : i32
    return %1, %c0_i32, %c0_i32_0, %c0_i32_1 : i32, i32, i32, i32
  }
  func.func @transform_1(%arg0: i32, %arg1: memref<6xi32, #tpu.memory_space<smem>>) -> (i32, i32, i32, i32) {
    %0 = arith.index_cast %arg0 : i32 to index
    %1 = memref.load %arg1[%0] : memref<6xi32, #tpu.memory_space<smem>>
    %c1_i32 = arith.constant 1 : i32
    %2 = arith.addi %1, %c1_i32 : i32
    %c0_i32 = arith.constant 0 : i32
    %c0_i32_0 = arith.constant 0 : i32
    %c0_i32_1 = arith.constant 0 : i32
    %c0_i32_2 = arith.constant 0 : i32
    return %2, %c0_i32, %c0_i32_0, %c0_i32_1 : i32, i32, i32, i32
  }
  func.func @transform_2(%arg0: i32, %arg1: memref<6xi32, #tpu.memory_space<smem>>) -> (i32, i32, i32) {
    %c0_i32 = arith.constant 0 : i32
    %c0_i32_0 = arith.constant 0 : i32
    %c0_i32_1 = arith.constant 0 : i32
    return %arg0, %c0_i32, %c0_i32_0 : i32, i32, i32
  }
  func.func @transform_3(%arg0: i32, %arg1: memref<6xi32, #tpu.memory_space<smem>>) -> (i32, i32) {
    %c0_i32 = arith.constant 0 : i32
    %c0_i32_0 = arith.constant 0 : i32
    %c0_i32_1 = arith.constant 0 : i32
    return %c0_i32, %c0_i32_0 : i32, i32
  }
  func.func @transform_4(%arg0: i32, %arg1: memref<6xi32, #tpu.memory_space<smem>>) -> (i32, i32) {
    %c0_i32 = arith.constant 0 : i32
    %c0_i32_0 = arith.constant 0 : i32
    %c0_i32_1 = arith.constant 0 : i32
    return %c0_i32, %c0_i32_0 : i32, i32
  }
  func.func @transform_5(%arg0: i32, %arg1: memref<6xi32, #tpu.memory_space<smem>>) -> (i32, i32) {
    %c0_i32 = arith.constant 0 : i32
    %c0_i32_0 = arith.constant 0 : i32
    %c0_i32_1 = arith.constant 0 : i32
    return %c0_i32, %c0_i32_0 : i32, i32
  }
  func.func @transform_6(%arg0: i32, %arg1: memref<6xi32, #tpu.memory_space<smem>>) -> (i32, i32) {
    %c0_i32 = arith.constant 0 : i32
    %c0_i32_0 = arith.constant 0 : i32
    %c0_i32_1 = arith.constant 0 : i32
    return %c0_i32, %c0_i32_0 : i32, i32
  }
  func.func @transform_7(%arg0: i32, %arg1: memref<6xi32, #tpu.memory_space<smem>>) -> (i32, i32) {
    %c0_i32 = arith.constant 0 : i32
    %c0_i32_0 = arith.constant 0 : i32
    %c0_i32_1 = arith.constant 0 : i32
    return %c0_i32, %c0_i32_0 : i32, i32
  }
  func.func @transform_8(%arg0: i32, %arg1: memref<6xi32, #tpu.memory_space<smem>>) -> (i32, i32) {
    %c0_i32 = arith.constant 0 : i32
    %c0_i32_0 = arith.constant 0 : i32
    %c0_i32_1 = arith.constant 0 : i32
    return %c0_i32, %c0_i32_0 : i32, i32
  }
  func.func @transform_9(%arg0: i32, %arg1: memref<6xi32, #tpu.memory_space<smem>>) -> (i32, i32) {
    %c0_i32 = arith.constant 0 : i32
    %c0_i32_0 = arith.constant 0 : i32
    %c0_i32_1 = arith.constant 0 : i32
    return %c0_i32, %c0_i32_0 : i32, i32
  }
  func.func @transform_10(%arg0: i32, %arg1: memref<6xi32, #tpu.memory_space<smem>>) -> (i32, i32) {
    %c0_i32 = arith.constant 0 : i32
    %c0_i32_0 = arith.constant 0 : i32
    %c0_i32_1 = arith.constant 0 : i32
    return %c0_i32, %c0_i32_0 : i32, i32
  }
  func.func @transform_11(%arg0: i32, %arg1: memref<6xi32, #tpu.memory_space<smem>>) -> (i32, i32, i32) {
    %c0_i32 = arith.constant 0 : i32
    %c0_i32_0 = arith.constant 0 : i32
    %c0_i32_1 = arith.constant 0 : i32
    return %arg0, %c0_i32, %c0_i32_0 : i32, i32, i32
  }
}

module attributes {stable_mosaic.version = 11 : i64} {
  func.func @_seq_kernel(%arg0: memref<6x1x16xf32, #tpu.memory_space<vmem>>, %arg1: memref<2x4x6xf32, #tpu.memory_space<vmem>>, %arg2: memref<4x2x6xf32, #tpu.memory_space<vmem>>, %arg3: memref<2x6xf32, #tpu.memory_space<vmem>>, %arg4: memref<2x6xf32, #tpu.memory_space<vmem>>, %arg5: memref<22x128xf32, #tpu.memory_space<vmem>>, %arg6: memref<32x128xf32, #tpu.memory_space<vmem>>, %arg7: memref<1x128xf32, #tpu.memory_space<vmem>>, %arg8: memref<22x128xf32, #tpu.memory_space<vmem>>, %arg9: memref<32x128xf32, #tpu.memory_space<vmem>>, %arg10: memref<1x128xf32, #tpu.memory_space<vmem>>, %arg11: memref<32x6xf32, #tpu.memory_space<vmem>>, %arg12: memref<1x6xf32, #tpu.memory_space<vmem>>, %arg13: memref<2x6xf32, #tpu.memory_space<vmem>>) attributes {dimension_semantics = [], scalar_prefetch = 0 : i64, scratch_operands = 0 : i64, tpu.core_type = #tpu.core_type<tc>} {
    %c0 = arith.constant 0 : index
    %c0_0 = arith.constant 0 : index
    %c0_1 = arith.constant 0 : index
    %0 = vector.load %arg0[%c0, %c0_0, %c0_1] : memref<6x1x16xf32, #tpu.memory_space<vmem>>, vector<6x1x16xf32>
    %1 = vector.shape_cast %0 : vector<6x1x16xf32> to vector<6x16xf32>
    %c0_2 = arith.constant 0 : index
    %c0_3 = arith.constant 0 : index
    %c0_4 = arith.constant 0 : index
    %2 = vector.load %arg1[%c0_2, %c0_3, %c0_4] : memref<2x4x6xf32, #tpu.memory_space<vmem>>, vector<2x4x6xf32>
    %c0_5 = arith.constant 0 : index
    %c0_6 = arith.constant 0 : index
    %c0_7 = arith.constant 0 : index
    %3 = vector.load %arg2[%c0_5, %c0_6, %c0_7] : memref<4x2x6xf32, #tpu.memory_space<vmem>>, vector<4x2x6xf32>
    %c0_8 = arith.constant 0 : index
    %c0_9 = arith.constant 0 : index
    %4 = vector.load %arg5[%c0_8, %c0_9] : memref<22x128xf32, #tpu.memory_space<vmem>>, vector<22x128xf32>
    %c0_10 = arith.constant 0 : index
    %c0_11 = arith.constant 0 : index
    %5 = vector.load %arg6[%c0_10, %c0_11] : memref<32x128xf32, #tpu.memory_space<vmem>>, vector<32x128xf32>
    %c0_12 = arith.constant 0 : index
    %c0_13 = arith.constant 0 : index
    %6 = vector.load %arg7[%c0_12, %c0_13] : memref<1x128xf32, #tpu.memory_space<vmem>>, vector<1x128xf32>
    %cst = arith.constant 0.000000e+00 : f32
    %7 = vector.broadcast %cst : f32 to vector<2x32xf32>
    %cst_14 = arith.constant 0.000000e+00 : f32
    %8 = vector.broadcast %cst_14 : f32 to vector<2x32xf32>
    %9 = vector.extract_strided_slice %3 {offsets = [0, 0, 0], sizes = [1, 2, 6], strides = [1, 1, 1]} : vector<4x2x6xf32> to vector<1x2x6xf32>
    %10 = vector.shape_cast %9 : vector<1x2x6xf32> to vector<2x6xf32>
    %cst_15 = arith.constant dense<0.000000e+00> : vector<2x16xf32>
    %11 = tpu.matmul %10, %1, %cst_15 {dimension_numbers = #tpu.dot_dimension_numbers<[1], [0], [0], [1], [0, 0, 1, 1], [], []>} : vector<2x6xf32>, vector<6x16xf32>, vector<2x16xf32> -> vector<2x16xf32>
    %12 = vector.extract_strided_slice %2 {offsets = [0, 0, 0], sizes = [2, 1, 6], strides = [1, 1, 1]} : vector<2x4x6xf32> to vector<2x1x6xf32>
    %13 = vector.shape_cast %12 : vector<2x1x6xf32> to vector<2x6xf32>
    %14 = tpu.concatenate %13, %11 in 1 : vector<2x6xf32>, vector<2x16xf32> -> vector<2x22xf32>
    %cst_16 = arith.constant dense<0.000000e+00> : vector<2x128xf32>
    %15 = tpu.matmul %14, %4, %cst_16 {dimension_numbers = #tpu.dot_dimension_numbers<[1], [0], [0], [1], [0, 0, 1, 1], [], []>} : vector<2x22xf32>, vector<22x128xf32>, vector<2x128xf32> -> vector<2x128xf32>
    %cst_17 = arith.constant dense<0.000000e+00> : vector<2x128xf32>
    %16 = tpu.matmul %7, %5, %cst_17 {dimension_numbers = #tpu.dot_dimension_numbers<[1], [0], [0], [1], [0, 0, 1, 1], [], []>} : vector<2x32xf32>, vector<32x128xf32>, vector<2x128xf32> -> vector<2x128xf32>
    %17 = arith.addf %15, %16 : vector<2x128xf32>
    %18 = vector.broadcast %6 : vector<1x128xf32> to vector<2x128xf32>
    %19 = arith.addf %17, %18 : vector<2x128xf32>
    %20 = arith.negf %19 : vector<2x128xf32>
    %21 = math.exp %20 : vector<2x128xf32>
    %cst_18 = arith.constant 1.000000e+00 : f32
    %22 = vector.broadcast %cst_18 : f32 to vector<2x128xf32>
    %23 = arith.addf %22, %21 : vector<2x128xf32>
    %24 = arith.divf %22, %23 : vector<2x128xf32>
    %25 = math.tanh %19 : vector<2x128xf32>
    %26 = vector.extract_strided_slice %24 {offsets = [0, 0], sizes = [2, 32], strides = [1, 1]} : vector<2x128xf32> to vector<2x32xf32>
    %27 = vector.extract_strided_slice %24 {offsets = [0, 32], sizes = [2, 32], strides = [1, 1]} : vector<2x128xf32> to vector<2x32xf32>
    %28 = vector.extract_strided_slice %25 {offsets = [0, 64], sizes = [2, 32], strides = [1, 1]} : vector<2x128xf32> to vector<2x32xf32>
    %29 = vector.extract_strided_slice %24 {offsets = [0, 96], sizes = [2, 32], strides = [1, 1]} : vector<2x128xf32> to vector<2x32xf32>
    %30 = arith.mulf %27, %8 : vector<2x32xf32>
    %31 = arith.mulf %26, %28 : vector<2x32xf32>
    %32 = arith.addf %30, %31 : vector<2x32xf32>
    %33 = math.tanh %32 : vector<2x32xf32>
    %34 = arith.mulf %29, %33 : vector<2x32xf32>
    %35 = vector.extract_strided_slice %3 {offsets = [1, 0, 0], sizes = [1, 2, 6], strides = [1, 1, 1]} : vector<4x2x6xf32> to vector<1x2x6xf32>
    %36 = vector.shape_cast %35 : vector<1x2x6xf32> to vector<2x6xf32>
    %cst_19 = arith.constant dense<0.000000e+00> : vector<2x16xf32>
    %37 = tpu.matmul %36, %1, %cst_19 {dimension_numbers = #tpu.dot_dimension_numbers<[1], [0], [0], [1], [0, 0, 1, 1], [], []>} : vector<2x6xf32>, vector<6x16xf32>, vector<2x16xf32> -> vector<2x16xf32>
    %38 = vector.extract_strided_slice %2 {offsets = [0, 1, 0], sizes = [2, 1, 6], strides = [1, 1, 1]} : vector<2x4x6xf32> to vector<2x1x6xf32>
    %39 = vector.shape_cast %38 : vector<2x1x6xf32> to vector<2x6xf32>
    %40 = tpu.concatenate %39, %37 in 1 : vector<2x6xf32>, vector<2x16xf32> -> vector<2x22xf32>
    %cst_20 = arith.constant dense<0.000000e+00> : vector<2x128xf32>
    %41 = tpu.matmul %40, %4, %cst_20 {dimension_numbers = #tpu.dot_dimension_numbers<[1], [0], [0], [1], [0, 0, 1, 1], [], []>} : vector<2x22xf32>, vector<22x128xf32>, vector<2x128xf32> -> vector<2x128xf32>
    %cst_21 = arith.constant dense<0.000000e+00> : vector<2x128xf32>
    %42 = tpu.matmul %34, %5, %cst_21 {dimension_numbers = #tpu.dot_dimension_numbers<[1], [0], [0], [1], [0, 0, 1, 1], [], []>} : vector<2x32xf32>, vector<32x128xf32>, vector<2x128xf32> -> vector<2x128xf32>
    %43 = arith.addf %41, %42 : vector<2x128xf32>
    %44 = vector.broadcast %6 : vector<1x128xf32> to vector<2x128xf32>
    %45 = arith.addf %43, %44 : vector<2x128xf32>
    %46 = arith.negf %45 : vector<2x128xf32>
    %47 = math.exp %46 : vector<2x128xf32>
    %cst_22 = arith.constant 1.000000e+00 : f32
    %48 = vector.broadcast %cst_22 : f32 to vector<2x128xf32>
    %49 = arith.addf %48, %47 : vector<2x128xf32>
    %50 = arith.divf %48, %49 : vector<2x128xf32>
    %51 = math.tanh %45 : vector<2x128xf32>
    %52 = vector.extract_strided_slice %50 {offsets = [0, 0], sizes = [2, 32], strides = [1, 1]} : vector<2x128xf32> to vector<2x32xf32>
    %53 = vector.extract_strided_slice %50 {offsets = [0, 32], sizes = [2, 32], strides = [1, 1]} : vector<2x128xf32> to vector<2x32xf32>
    %54 = vector.extract_strided_slice %51 {offsets = [0, 64], sizes = [2, 32], strides = [1, 1]} : vector<2x128xf32> to vector<2x32xf32>
    %55 = vector.extract_strided_slice %50 {offsets = [0, 96], sizes = [2, 32], strides = [1, 1]} : vector<2x128xf32> to vector<2x32xf32>
    %56 = arith.mulf %53, %32 : vector<2x32xf32>
    %57 = arith.mulf %52, %54 : vector<2x32xf32>
    %58 = arith.addf %56, %57 : vector<2x32xf32>
    %59 = math.tanh %58 : vector<2x32xf32>
    %60 = arith.mulf %55, %59 : vector<2x32xf32>
    %61 = vector.extract_strided_slice %3 {offsets = [2, 0, 0], sizes = [1, 2, 6], strides = [1, 1, 1]} : vector<4x2x6xf32> to vector<1x2x6xf32>
    %62 = vector.shape_cast %61 : vector<1x2x6xf32> to vector<2x6xf32>
    %cst_23 = arith.constant dense<0.000000e+00> : vector<2x16xf32>
    %63 = tpu.matmul %62, %1, %cst_23 {dimension_numbers = #tpu.dot_dimension_numbers<[1], [0], [0], [1], [0, 0, 1, 1], [], []>} : vector<2x6xf32>, vector<6x16xf32>, vector<2x16xf32> -> vector<2x16xf32>
    %64 = vector.extract_strided_slice %2 {offsets = [0, 2, 0], sizes = [2, 1, 6], strides = [1, 1, 1]} : vector<2x4x6xf32> to vector<2x1x6xf32>
    %65 = vector.shape_cast %64 : vector<2x1x6xf32> to vector<2x6xf32>
    %66 = tpu.concatenate %65, %63 in 1 : vector<2x6xf32>, vector<2x16xf32> -> vector<2x22xf32>
    %cst_24 = arith.constant dense<0.000000e+00> : vector<2x128xf32>
    %67 = tpu.matmul %66, %4, %cst_24 {dimension_numbers = #tpu.dot_dimension_numbers<[1], [0], [0], [1], [0, 0, 1, 1], [], []>} : vector<2x22xf32>, vector<22x128xf32>, vector<2x128xf32> -> vector<2x128xf32>
    %cst_25 = arith.constant dense<0.000000e+00> : vector<2x128xf32>
    %68 = tpu.matmul %60, %5, %cst_25 {dimension_numbers = #tpu.dot_dimension_numbers<[1], [0], [0], [1], [0, 0, 1, 1], [], []>} : vector<2x32xf32>, vector<32x128xf32>, vector<2x128xf32> -> vector<2x128xf32>
    %69 = arith.addf %67, %68 : vector<2x128xf32>
    %70 = vector.broadcast %6 : vector<1x128xf32> to vector<2x128xf32>
    %71 = arith.addf %69, %70 : vector<2x128xf32>
    %72 = arith.negf %71 : vector<2x128xf32>
    %73 = math.exp %72 : vector<2x128xf32>
    %cst_26 = arith.constant 1.000000e+00 : f32
    %74 = vector.broadcast %cst_26 : f32 to vector<2x128xf32>
    %75 = arith.addf %74, %73 : vector<2x128xf32>
    %76 = arith.divf %74, %75 : vector<2x128xf32>
    %77 = math.tanh %71 : vector<2x128xf32>
    %78 = vector.extract_strided_slice %76 {offsets = [0, 0], sizes = [2, 32], strides = [1, 1]} : vector<2x128xf32> to vector<2x32xf32>
    %79 = vector.extract_strided_slice %76 {offsets = [0, 32], sizes = [2, 32], strides = [1, 1]} : vector<2x128xf32> to vector<2x32xf32>
    %80 = vector.extract_strided_slice %77 {offsets = [0, 64], sizes = [2, 32], strides = [1, 1]} : vector<2x128xf32> to vector<2x32xf32>
    %81 = vector.extract_strided_slice %76 {offsets = [0, 96], sizes = [2, 32], strides = [1, 1]} : vector<2x128xf32> to vector<2x32xf32>
    %82 = arith.mulf %79, %58 : vector<2x32xf32>
    %83 = arith.mulf %78, %80 : vector<2x32xf32>
    %84 = arith.addf %82, %83 : vector<2x32xf32>
    %85 = math.tanh %84 : vector<2x32xf32>
    %86 = arith.mulf %81, %85 : vector<2x32xf32>
    %87 = vector.extract_strided_slice %3 {offsets = [3, 0, 0], sizes = [1, 2, 6], strides = [1, 1, 1]} : vector<4x2x6xf32> to vector<1x2x6xf32>
    %88 = vector.shape_cast %87 : vector<1x2x6xf32> to vector<2x6xf32>
    %cst_27 = arith.constant dense<0.000000e+00> : vector<2x16xf32>
    %89 = tpu.matmul %88, %1, %cst_27 {dimension_numbers = #tpu.dot_dimension_numbers<[1], [0], [0], [1], [0, 0, 1, 1], [], []>} : vector<2x6xf32>, vector<6x16xf32>, vector<2x16xf32> -> vector<2x16xf32>
    %90 = vector.extract_strided_slice %2 {offsets = [0, 3, 0], sizes = [2, 1, 6], strides = [1, 1, 1]} : vector<2x4x6xf32> to vector<2x1x6xf32>
    %91 = vector.shape_cast %90 : vector<2x1x6xf32> to vector<2x6xf32>
    %92 = tpu.concatenate %91, %89 in 1 : vector<2x6xf32>, vector<2x16xf32> -> vector<2x22xf32>
    %cst_28 = arith.constant dense<0.000000e+00> : vector<2x128xf32>
    %93 = tpu.matmul %92, %4, %cst_28 {dimension_numbers = #tpu.dot_dimension_numbers<[1], [0], [0], [1], [0, 0, 1, 1], [], []>} : vector<2x22xf32>, vector<22x128xf32>, vector<2x128xf32> -> vector<2x128xf32>
    %cst_29 = arith.constant dense<0.000000e+00> : vector<2x128xf32>
    %94 = tpu.matmul %86, %5, %cst_29 {dimension_numbers = #tpu.dot_dimension_numbers<[1], [0], [0], [1], [0, 0, 1, 1], [], []>} : vector<2x32xf32>, vector<32x128xf32>, vector<2x128xf32> -> vector<2x128xf32>
    %95 = arith.addf %93, %94 : vector<2x128xf32>
    %96 = vector.broadcast %6 : vector<1x128xf32> to vector<2x128xf32>
    %97 = arith.addf %95, %96 : vector<2x128xf32>
    %98 = arith.negf %97 : vector<2x128xf32>
    %99 = math.exp %98 : vector<2x128xf32>
    %cst_30 = arith.constant 1.000000e+00 : f32
    %100 = vector.broadcast %cst_30 : f32 to vector<2x128xf32>
    %101 = arith.addf %100, %99 : vector<2x128xf32>
    %102 = arith.divf %100, %101 : vector<2x128xf32>
    %103 = math.tanh %97 : vector<2x128xf32>
    %104 = vector.extract_strided_slice %102 {offsets = [0, 0], sizes = [2, 32], strides = [1, 1]} : vector<2x128xf32> to vector<2x32xf32>
    %105 = vector.extract_strided_slice %102 {offsets = [0, 32], sizes = [2, 32], strides = [1, 1]} : vector<2x128xf32> to vector<2x32xf32>
    %106 = vector.extract_strided_slice %103 {offsets = [0, 64], sizes = [2, 32], strides = [1, 1]} : vector<2x128xf32> to vector<2x32xf32>
    %107 = vector.extract_strided_slice %102 {offsets = [0, 96], sizes = [2, 32], strides = [1, 1]} : vector<2x128xf32> to vector<2x32xf32>
    %108 = arith.mulf %105, %84 : vector<2x32xf32>
    %109 = arith.mulf %104, %106 : vector<2x32xf32>
    %110 = arith.addf %108, %109 : vector<2x32xf32>
    %111 = math.tanh %110 : vector<2x32xf32>
    %112 = arith.mulf %107, %111 : vector<2x32xf32>
    %c0_31 = arith.constant 0 : index
    %c0_32 = arith.constant 0 : index
    %113 = vector.load %arg3[%c0_31, %c0_32] : memref<2x6xf32, #tpu.memory_space<vmem>>, vector<2x6xf32>
    %cst_33 = arith.constant dense<0.000000e+00> : vector<2x16xf32>
    %114 = tpu.matmul %113, %1, %cst_33 {dimension_numbers = #tpu.dot_dimension_numbers<[1], [0], [0], [1], [0, 0, 1, 1], [], []>} : vector<2x6xf32>, vector<6x16xf32>, vector<2x16xf32> -> vector<2x16xf32>
    %c0_34 = arith.constant 0 : index
    %c0_35 = arith.constant 0 : index
    %115 = vector.load %arg4[%c0_34, %c0_35] : memref<2x6xf32, #tpu.memory_space<vmem>>, vector<2x6xf32>
    %116 = tpu.concatenate %115, %114 in 1 : vector<2x6xf32>, vector<2x16xf32> -> vector<2x22xf32>
    %c0_36 = arith.constant 0 : index
    %c0_37 = arith.constant 0 : index
    %117 = vector.load %arg8[%c0_36, %c0_37] : memref<22x128xf32, #tpu.memory_space<vmem>>, vector<22x128xf32>
    %cst_38 = arith.constant dense<0.000000e+00> : vector<2x128xf32>
    %118 = tpu.matmul %116, %117, %cst_38 {dimension_numbers = #tpu.dot_dimension_numbers<[1], [0], [0], [1], [0, 0, 1, 1], [], []>} : vector<2x22xf32>, vector<22x128xf32>, vector<2x128xf32> -> vector<2x128xf32>
    %c0_39 = arith.constant 0 : index
    %c0_40 = arith.constant 0 : index
    %119 = vector.load %arg9[%c0_39, %c0_40] : memref<32x128xf32, #tpu.memory_space<vmem>>, vector<32x128xf32>
    %cst_41 = arith.constant dense<0.000000e+00> : vector<2x128xf32>
    %120 = tpu.matmul %112, %119, %cst_41 {dimension_numbers = #tpu.dot_dimension_numbers<[1], [0], [0], [1], [0, 0, 1, 1], [], []>} : vector<2x32xf32>, vector<32x128xf32>, vector<2x128xf32> -> vector<2x128xf32>
    %121 = arith.addf %118, %120 : vector<2x128xf32>
    %c0_42 = arith.constant 0 : index
    %c0_43 = arith.constant 0 : index
    %122 = vector.load %arg10[%c0_42, %c0_43] : memref<1x128xf32, #tpu.memory_space<vmem>>, vector<1x128xf32>
    %123 = vector.broadcast %122 : vector<1x128xf32> to vector<2x128xf32>
    %124 = arith.addf %121, %123 : vector<2x128xf32>
    %cst_44 = arith.constant 0.000000e+00 : f32
    %125 = vector.broadcast %cst_44 : f32 to vector<2x32xf32>
    %126 = arith.negf %124 : vector<2x128xf32>
    %127 = math.exp %126 : vector<2x128xf32>
    %cst_45 = arith.constant 1.000000e+00 : f32
    %128 = vector.broadcast %cst_45 : f32 to vector<2x128xf32>
    %129 = arith.addf %128, %127 : vector<2x128xf32>
    %130 = arith.divf %128, %129 : vector<2x128xf32>
    %131 = math.tanh %124 : vector<2x128xf32>
    %132 = vector.extract_strided_slice %130 {offsets = [0, 0], sizes = [2, 32], strides = [1, 1]} : vector<2x128xf32> to vector<2x32xf32>
    %133 = vector.extract_strided_slice %130 {offsets = [0, 32], sizes = [2, 32], strides = [1, 1]} : vector<2x128xf32> to vector<2x32xf32>
    %134 = vector.extract_strided_slice %131 {offsets = [0, 64], sizes = [2, 32], strides = [1, 1]} : vector<2x128xf32> to vector<2x32xf32>
    %135 = vector.extract_strided_slice %130 {offsets = [0, 96], sizes = [2, 32], strides = [1, 1]} : vector<2x128xf32> to vector<2x32xf32>
    %136 = arith.mulf %133, %125 : vector<2x32xf32>
    %137 = arith.mulf %132, %134 : vector<2x32xf32>
    %138 = arith.addf %136, %137 : vector<2x32xf32>
    %139 = math.tanh %138 : vector<2x32xf32>
    %140 = arith.mulf %135, %139 : vector<2x32xf32>
    %cst_46 = arith.constant 0.000000e+00 : f32
    %141 = vector.broadcast %cst_46 : f32 to vector<2x32xf32>
    %142 = arith.maximumf %140, %141 : vector<2x32xf32>
    %c0_47 = arith.constant 0 : index
    %c0_48 = arith.constant 0 : index
    %143 = vector.load %arg11[%c0_47, %c0_48] : memref<32x6xf32, #tpu.memory_space<vmem>>, vector<32x6xf32>
    %cst_49 = arith.constant dense<0.000000e+00> : vector<2x6xf32>
    %144 = tpu.matmul %142, %143, %cst_49 {dimension_numbers = #tpu.dot_dimension_numbers<[1], [0], [0], [1], [0, 0, 1, 1], [], []>} : vector<2x32xf32>, vector<32x6xf32>, vector<2x6xf32> -> vector<2x6xf32>
    %c0_50 = arith.constant 0 : index
    %c0_51 = arith.constant 0 : index
    %145 = vector.load %arg12[%c0_50, %c0_51] : memref<1x6xf32, #tpu.memory_space<vmem>>, vector<1x6xf32>
    %146 = vector.broadcast %145 : vector<1x6xf32> to vector<2x6xf32>
    %147 = arith.addf %144, %146 : vector<2x6xf32>
    %c0_52 = arith.constant 0 : index
    %c0_53 = arith.constant 0 : index
    %148 = vector.load %arg13[%c0_52, %c0_53] : memref<2x6xf32, #tpu.memory_space<vmem>>, vector<2x6xf32>
    tpu.vector_store %arg13[%c0_52, %c0_53], %147 {strides = array<i32>} : memref<2x6xf32, #tpu.memory_space<vmem>>, vector<2x6xf32>,
    return
  }
}

</mosaic_0001>

<bundles_post_ra>
// kernel: _forward_impl.3
= control target key start
LH: loop header
LB: loop body
LE: loop exit
PB: predicated region body
PF: predicated region fallthrough
CT: control target
= control target key end

     0   :  { %s1246_s0 = inlined_call_operand.vmem [shape: f32[6,1,16], index: 0, kind: input, shape index: {}]   ;;  %s1247_s1 = inlined_call_operand.vmem [shape: f32[2,4,6], index: 1, kind: input, shape index: {}]   ;;  %s1248_s2 = inlined_call_operand.vmem [shape: f32[4,2,6], index: 2, kind: input, shape index: {}]   ;;  %s1249_s3 = inlined_call_operand.vmem [shape: f32[2,6], index: 3, kind: input, shape index: {}]   ;;  %s1250_s4 = inlined_call_operand.vmem [shape: f32[2,6], index: 4, kind: input, shape index: {}]   ;;  %s1251_s5 = inlined_call_operand.vmem [shape: f32[22,128], index: 5, kind: input, shape index: {}]   ;;  %s1252_s6 = inlined_call_operand.vmem [shape: f32[32,128], index: 6, kind: input, shape index: {}]   ;;  %s1253_s7 = inlined_call_operand.vmem [shape: f32[1,128], index: 7, kind: input, shape index: {}]   ;;  %s1254_s8 = inlined_call_operand.vmem [shape: f32[22,128], index: 8, kind: input, shape index: {}]   ;;  %s1255_s9 = inlined_call_operand.vmem [shape: f32[32,128], index: 9, kind: input, shape index: {}]   ;;  %s1256_s10 = inlined_call_operand.vmem [shape: f32[1,128], index: 10, kind: input, shape index: {}]   ;;  %s1257_s11 = inlined_call_operand.vmem [shape: f32[32,6], index: 11, kind: input, shape index: {}]   ;;  %s1258_s12 = inlined_call_operand.vmem [shape: f32[1,6], index: 12, kind: input, shape index: {}]   ;;  %s1259_s13 = inlined_call_operand.hbm [shape: f32[2,6], index: 13, kind: output, shape index: {}]  }
   0x1   :  { %v990_v0 = vld [vmem:[%s1246_s0] sm:$0x1]  ;;  %v995_v1 = vld [vmem:[%s1246_s0 + $0x1] sm:$0x1]  ;;  %v1000_v2 = vld [vmem:[%s1246_s0 + $0x2] sm:$0x1] }
   0x2   :  { %v1005_v3 = vld [vmem:[%s1246_s0 + $0x3] sm:$0x1]  ;;  %v1010_v4 = vld [vmem:[%s1246_s0 + $0x4] sm:$0x1]  ;;  %v1015_v5 = vld [vmem:[%s1246_s0 + $0x5] sm:$0x1] }
   0x3   :  { %71 = vst [vmem:[#allocation1] ss:$9 sm:$0xff] %v990_v0 }
   0x4   :  { %73 = vst [vmem:[#allocation1 + $0x1] ss:$9 sm:$0xff] %v995_v1 }
   0x5   :  { %75 = vst [vmem:[#allocation1 + $0x2] ss:$9 sm:$0xff] %v1000_v2 }
   0x6   :  { %18 = vsyncpa [#allocation3], 0  ;;  %77 = vst [vmem:[#allocation1 + $0x3] ss:$9 sm:$0xff] %v1005_v3  ;;  %vm87_vm0 = vcmask 1045504   ;;  %vm83_vm1 = vcmask 48128  }
   0x7   :  { %79 = vst [vmem:[#allocation1 + $0x4] ss:$9 sm:$0xff] %v1010_v4  ;;  %v53_v6 = vld [vmem:[%s1248_s2] sm:$0x3]  ;;  %v1037_v8 = vld [vmem:[%s1251_s5 + $0x10] sm:$0x3f] }
   0x8   :  { %81 = vst [vmem:[#allocation1 + $0x5] ss:$9 sm:$0xff] %v1015_v5  ;;  %v1042_v9 = vld [vmem:[%s1251_s5 + $0x8] sm:$0xff]  ;;  %810 = vmatpush.msk.msra.mxu2 %vm87_vm0, %v1037_v8  ;;  %s912_s25 = smov 6   ;;  %v1051_v11 = vld [vmem:[%s1252_s6 + $0x18] sm:$0xff]  ;;  %v57_v12 = vld [vmem:[%s1251_s5] sm:$0xff] }
   0x9   :  { %137 = vmatpush.msra.mxu1 %v1051_v11  ;;  %v1060_v13 = vld [vmem:[%s1252_s6 + $0x10] sm:$0xff]  ;;  %v1065_v14 = vld [vmem:[%s1252_s6 + $0x8] sm:$0xff]  ;;  %v1072_v15 = vld [vmem:[%s1252_s6] sm:$0xff]  ;;  %v913_v16 = vmov 0.0   ;;  %vm113_vm2 = vcmask 1041409   ;;  %vm145_vm3 = vcmask 179200  }
   0xa   :  { %166 = vmatpush.msra.mxu2 %v1042_v9  ;;  %v52_v17 = vld [vmem:[%s1247_s1 + $0x4] sm:$0xf]  ;;  %v1097_v19 = vld [vmem:[%s1247_s1] sm:$0xf]  ;;  %s914_s1 = smov 64   ;;  %vm250_vm8 = vcmask 1042434  }
   0xb   :  { %138 = vmatpush.msra.mxu1 %v1060_v13  ;;  %v1092_v18 = vrot.slane %v52_v17, 7  ;;  %v1106_v24 = vld [vmem:[%s1253_s7] ss:$0 sm:$0xff]  ;;  %v54_v33 = vld [vmem:[%s1248_s2 + $0x2] sm:$0x3]  ;;  %s915_s7 = smov 32  }
   0xc   :  { %167 = vmatpush.msra.mxu2 %v57_v12  ;;  %vm121_vm9 = vcmask 261120   ;;  %vm383_vm14 = vcmask 1043459   ;;  %s916_s30 = smov [#allocation2]  }
   0xd   :  { %139 = vmatpush.msra.mxu1 %v1065_v14  ;;  %v114_v20 = vsel %vm113_vm2, %v1092_v18, %v1097_v19  ;;  %v251_v53 = vsel %vm250_vm8, %v1092_v18, %v1097_v19  ;;  %s797_s14 = sshll.u32 %s916_s30, 4  ;;  %s798_s14 = int_to_ptr.vmem [resolvable:$true] %s797_s14 }
   0xf   :  { %v82_v7 = vld [vmem:[#allocation1] sm:$0xff]  ;;  %140 = vmatpush.msra.mxu1 %v1072_v15 }
  0x10   :  { %808 = vmatpush.msk.msra.mxu0 %vm87_vm0, %v82_v7  ;;  %213 = vst [vmem:[#allocation1] ss:$9 sm:$0xff] %v990_v0  ;;  %141 = vmatmul.f32.vlgmr.msra.gmra.mxu1 %v913_v16 }
  0x11   :  { %215 = vst [vmem:[#allocation1 + $0x1] ss:$9 sm:$0xff] %v995_v1  ;;  %809 = vmatmul.msk.f32.vlgmr.msra.gmra.mxu0 %vm83_vm1, %v53_v6  ;;  %409 = vmatpush.msrb.mxu1 %v1051_v11 }
  0x12   :  { %217 = vst [vmem:[#allocation1 + $0x2] ss:$9 sm:$0xff] %v1000_v2  ;;  %276 = vmatpush.msrb.mxu0 %v1051_v11 }
  0x13   :  { %219 = vst [vmem:[#allocation1 + $0x3] ss:$9 sm:$0xff] %v1005_v3  ;;  %410 = vmatpush.msrb.mxu1 %v1060_v13 }
  0x14   :  { %221 = vst [vmem:[#allocation1 + $0x4] ss:$9 sm:$0xff] %v1010_v4  ;;  %277 = vmatpush.msrb.mxu0 %v1060_v13 }
  0x15   :  { %223 = vst [vmem:[#allocation1 + $0x5] ss:$9 sm:$0xff] %v1015_v5  ;;  %411 = vmatpush.msrb.mxu1 %v1065_v14 }
  0x16   :  { %278 = vmatpush.msrb.mxu0 %v1065_v14 }
  0x17   :  { %412 = vmatpush.msrb.mxu1 %v1072_v15 }
  0x18   :  { %279 = vmatpush.msrb.mxu0 %v1072_v15 }
  0x19   :  { %828 = vmatpush.msk.msra.mxu1 %vm87_vm0, %v1037_v8 }
  0x1a   :  { %822 = vmatpush.msk.msra.mxu0 %vm87_vm0, %v1037_v8 }
  0x1b   :  { %568 = vmatpush.msra.mxu1 %v1042_v9 }
  0x1c   :  { %435 = vmatpush.msra.mxu0 %v1042_v9  ;;  %v224_v32 = vld [vmem:[#allocation1] sm:$0xff] }
  0x1d   :  { %569 = vmatpush.msra.mxu1 %v57_v12  ;;  %813 = vmatpush.msk.msra.mxu3 %vm87_vm0, %v224_v32  ;;  %346 = vst [vmem:[#allocation1] ss:$9 sm:$0xff] %v990_v0 }
  0x1e   :  { %436 = vmatpush.msra.mxu0 %v57_v12  ;;  %348 = vst [vmem:[#allocation1 + $0x1] ss:$9 sm:$0xff] %v995_v1  ;;  %814 = vmatmul.msk.f32.vlgmr.msra.gmra.mxu3 %vm83_vm1, %v54_v33 }
  0x1f   :  { %350 = vst [vmem:[#allocation1 + $0x2] ss:$9 sm:$0xff] %v1000_v2  ;;  %816 = vmatpush.msk.msrb.mxu3 %vm87_vm0, %v1037_v8 }
  0x20   :  { %352 = vst [vmem:[#allocation1 + $0x3] ss:$9 sm:$0xff] %v1005_v3 }
  0x21   :  { %354 = vst [vmem:[#allocation1 + $0x4] ss:$9 sm:$0xff] %v1010_v4  ;;  %302 = vmatpush.msrb.mxu3 %v1042_v9 }
  0x22   :  { %356 = vst [vmem:[#allocation1 + $0x5] ss:$9 sm:$0xff] %v1015_v5 }
  0x23   :  { %303 = vmatpush.msrb.mxu3 %v57_v12 }
  0x29   :  { %v357_v9 = vld [vmem:[#allocation1] sm:$0xff] }
  0x2a   :  { %819 = vmatpush.msk.msrb.mxu2 %vm87_vm0, %v357_v9  ;;  %479 = vst [vmem:[#allocation1] ss:$9 sm:$0xff] %v990_v0 }
  0x2b   :  { %481 = vst [vmem:[#allocation1 + $0x1] ss:$9 sm:$0xff] %v995_v1 }
  0x2c   :  { %483 = vst [vmem:[#allocation1 + $0x2] ss:$9 sm:$0xff] %v1000_v2 }
  0x2d   :  { %485 = vst [vmem:[#allocation1 + $0x3] ss:$9 sm:$0xff] %v1005_v3 }
  0x2e   :  { %487 = vst [vmem:[#allocation1 + $0x4] ss:$9 sm:$0xff] %v1010_v4 }
  0x2f   :  { %489 = vst [vmem:[#allocation1 + $0x5] ss:$9 sm:$0xff] %v1015_v5 }
  0x8d   :  { %v142_v23 = vpop.f32.mrf.mxu1 }
  0x8e   :  { %v107_v10 = vpop.f32.mrf.mxu0 }
  0x8f   :  { %117 = vrot.lane.b32.xlu0 %v107_v10, %s912_s25  ;;  %v55_v10 = vld [vmem:[%s1248_s2 + $0x4] sm:$0x3] }
  0xa1   :  { %v247_v46 = vpop.f32.mrf.mxu3 }
  0xa2   :  { %v254_v47 = vrot.slane %v247_v46, 7 }
  0xa4   :  { %255 = vrot.lane.b32.xlu2 %v254_v47, %s912_s25  ;;  %v490_v47 = vld [vmem:[#allocation1] sm:$0xff] }
  0xa5   :  { %825 = vmatpush.msk.msra.mxu3 %vm87_vm0, %v490_v47  ;;  %613 = vst [vmem:[#allocation1] ss:$9 sm:$0xff] %v990_v0 }
  0xa6   :  { %615 = vst [vmem:[#allocation1 + $0x1] ss:$9 sm:$0xff] %v995_v1 }
  0xa7   :  { %617 = vst [vmem:[#allocation1 + $0x2] ss:$9 sm:$0xff] %v1000_v2 }
  0xa8   :  { %619 = vst [vmem:[#allocation1 + $0x3] ss:$9 sm:$0xff] %v1005_v3 }
  0xa9   :  { %621 = vst [vmem:[#allocation1 + $0x4] ss:$9 sm:$0xff] %v1010_v4 }
  0xaa   :  { %623 = vst [vmem:[#allocation1 + $0x5] ss:$9 sm:$0xff] %v1015_v5 }
  0xfe   :  { %v256_v52 = vpop.permute.xlu2 %255 }
  0xff   :  { %v258_v54 = vsel %vm83_vm1, %v251_v53, %v256_v52 }
 0x100   :  { %v285_v55 = vrot.slane %v258_v54, 1 }
 0x101   :  { %v118_v21 = vpop.permute.xlu0 %117 }
 0x102   :  { %v120_v22 = vsel %vm83_vm1, %v114_v20, %v118_v21  ;;  %817 = vmatmul.msk.f32.vlgmr.msrb.gmra.mxu3 %vm145_vm3, %v285_v55 }
 0x103   :  { %811 = vmatmul.msk.f32.vlgmr.msra.gmra.mxu2 %vm145_vm3, %v120_v22 }
 0x104   :  { %542 = vmatpush.msra.mxu2 %v1051_v11 }
 0x106   :  { %543 = vmatpush.msra.mxu2 %v1060_v13 }
 0x108   :  { %544 = vmatpush.msra.mxu2 %v1065_v14 }
 0x10a   :  { %545 = vmatpush.msra.mxu2 %v1072_v15 }
 0x10b   :  { %820 = vmatmul.msk.f32.vlgmr.msrb.gmra.mxu2 %vm83_vm1, %v55_v10 }
 0x185   :  { %v305_v59 = vpop.f32.mrf.mxu3 }
 0x186   :  { %v169_v25 = vpop.f32.mrf.mxu2 }
 0x187   :  { %v170_v26 = vadd.f32 %v169_v25, %v142_v23 }
 0x189   :  { %v175_v27 = vadd.f32 %v1106_v24, %v170_v26 }
 0x18b   :  { %846 = vtanh.f32 %v175_v27  ;;  %v812_v29 = vmul.f32 -1.442695, %v175_v27 }
 0x18d   :  { %848 = vpow2.f32 %v812_v29 }
 0x18e   :  { %v380_v14 = vpop.f32.mrf.mxu2 }
 0x191   :  { %v847_v28 = vpop.eup %846 }
 0x192   :  { %198 = vrot.lane.b32.xlu0 %v847_v28, %s914_s1  ;;  %v387_v28 = vrot.slane %v380_v14, 6 }
 0x193   :  { %v849_v30 = vpop.eup %848 }
 0x194   :  { %v179_v31 = vadd.f32 1.0, %v849_v30 }
 0x196   :  { %850 = vrcp.f32 %v179_v31  ;;  %v191_v39 = vand.u32 2147483648, %v179_v31  ;;  %vm185_vm5 = vweird.f32 %v179_v31  ;;  %v189_v40 = vand.u32 2147483647, %v179_v31 }
 0x198   :  { %v192_v42 = vor.u32 1.1754944e-38, %v191_v39  ;;  %vm190_vm7 = vcmp.eq.f32.partialorder %v189_v40, 8.507059e+37 }
 0x19c   :  { %v851_v34 = vpop.eup %850 }
 0x19d   :  { %v181_v35 = vmul.f32 %v851_v34, %v179_v31  ;;  %vm186_vm4 = vweird.f32 %v851_v34 }
 0x19e   :  { %vm187_vm6 = vmor %vm185_vm5, %vm186_vm4 }
 0x19f   :  { %v182_v36 = vsub.f32 1.0, %v181_v35 }
 0x1a1   :  { %v183_v37 = vmul.f32 %v851_v34, %v182_v36 }
 0x1a3   :  { %v184_v38 = vadd.f32 %v851_v34, %v183_v37 }
 0x1a5   :  { %v188_v41 = vsel %vm187_vm6, %v851_v34, %v184_v38  ;;  %v384_v34 = vsel %vm383_vm14, %v1092_v18, %v1097_v19  ;;  %vm516_vm6 = vcmask 1044484  }
 0x1a6   :  { %v193_v44 = vsel %vm190_vm7, %v192_v42, %v188_v41 }
 0x1a7   :  { %v196_v48 = vmul.f32 0.0, %v193_v44 }
 0x204   :  { %v199_v43 = vpop.permute.xlu0 %198 }
 0x205   :  { %v201_v45 = vmul.f32 %v199_v43, %v193_v44 }
 0x207   :  { %203 = vrot.lane.b32.xlu1 %v201_v45, %s915_s7 }
 0x279   :  { %v204_v49 = vpop.permute.xlu1 %203 }
 0x27a   :  { %v206_v50 = vadd.f32 %v204_v49, %v196_v48  ;;  %v56_v48 = vld [vmem:[%s1248_s2 + $0x6] sm:$0x3] }
 0x27b   :  { %826 = vmatmul.msk.f32.vlgmr.msra.gmra.mxu3 %vm83_vm1, %v56_v48 }
 0x27c   :  { %852 = vtanh.f32 %v206_v50 }
 0x282   :  { %v853_v51 = vpop.eup %852 }
 0x283   :  { %209 = vrot.lane.b32.xlu1 %v853_v51, %s914_s1 }
 0x2f5   :  { %v210_v56 = vpop.permute.xlu1 %209 }
 0x2f6   :  { %v212_v57 = vmul.f32 %v210_v56, %v193_v44 }
 0x2f8   :  { %260 = vrot.lane.b32.xlu2 %v212_v57, %s915_s7 }
 0x2fe   :  { %v513_v4 = vpop.f32.mrf.mxu3 }
 0x2ff   :  { %v520_v5 = vrot.slane %v513_v4, 5 }
 0x352   :  { %v261_v58 = vpop.permute.xlu2 %260 }
 0x353   :  { %815 = vmatmul.msk.f32.vlgmr.msrb.gmra.mxu0 %vm121_vm9, %v261_v58 }
 0x3d0   :  { %v281_v60 = vpop.f32.mrf.mxu0 }
 0x3d1   :  { %v306_v61 = vadd.f32 %v305_v59, %v281_v60 }
 0x3d3   :  { %v308_v62 = vadd.f32 %v1106_v24, %v306_v61 }
 0x3d5   :  { %854 = vtanh.f32 %v308_v62  ;;  %v818_v6 = vmul.f32 -1.442695, %v308_v62 }
 0x3d7   :  { %856 = vpow2.f32 %v818_v6  ;;  %v517_v6 = vsel %vm516_vm6, %v1092_v18, %v1097_v19 }
 0x3db   :  { %v855_v63 = vpop.eup %854 }
 0x3dc   :  { %331 = vrot.lane.b32.xlu0 %v855_v63, %s914_s1 }
 0x3dd   :  { %v857_v7 = vpop.eup %856 }
 0x3de   :  { %v312_v8 = vadd.f32 1.0, %v857_v7 }
 0x3e0   :  { %858 = vrcp.f32 %v312_v8  ;;  %v324_v22 = vand.u32 2147483648, %v312_v8  ;;  %vm318_vm11 = vweird.f32 %v312_v8  ;;  %v322_v11 = vand.u32 2147483647, %v312_v8 }
 0x3e2   :  { %v325_v25 = vor.u32 1.1754944e-38, %v324_v22  ;;  %vm323_vm13 = vcmp.eq.f32.partialorder %v322_v11, 8.507059e+37  ;;  %v624_v22 = vld [vmem:[#allocation1] sm:$0xff] }
 0x3e3   :  { %v612_v11 = vld [vmem:[%s1249_s3] sm:$0x3]  ;;  %831 = vmatpush.msk.msrb.mxu0 %vm87_vm0, %v624_v22 }
 0x3e4   :  { %388 = vrot.lane.b32.xlu0 %v387_v28, %s912_s25 }
 0x3e6   :  { %v859_v12 = vpop.eup %858 }
 0x3e7   :  { %v314_v16 = vmul.f32 %v859_v12, %v312_v8  ;;  %vm319_vm10 = vweird.f32 %v859_v12 }
 0x3e8   :  { %vm320_vm12 = vmor %vm318_vm11, %vm319_vm10 }
 0x3e9   :  { %v315_v17 = vsub.f32 1.0, %v314_v16 }
 0x3eb   :  { %v316_v20 = vmul.f32 %v859_v12, %v315_v17 }
 0x3ed   :  { %v317_v21 = vadd.f32 %v859_v12, %v316_v20 }
 0x3ef   :  { %v321_v23 = vsel %vm320_vm12, %v859_v12, %v317_v21 }
 0x3f0   :  { %v326_v26 = vsel %vm323_vm13, %v325_v25, %v321_v23  ;;  %vm790_vm13 = vcmask 41984  }
 0x3f1   :  { %v329_v15 = vmul.f32 %v326_v26, %v206_v50 }
 0x44e   :  { %v332_v13 = vpop.permute.xlu0 %331 }
 0x44f   :  { %v334_v27 = vmul.f32 %v332_v13, %v326_v26 }
 0x451   :  { %336 = vrot.lane.b32.xlu1 %v334_v27, %s915_s7 }
 0x456   :  { %v389_v35 = vpop.permute.xlu0 %388 }
 0x457   :  { %v391_v36 = vsel %vm83_vm1, %v384_v34, %v389_v35 }
 0x458   :  { %v418_v37 = vrot.slane %v391_v36, 2 }
 0x45a   :  { %823 = vmatmul.msk.f32.vlgmr.msra.gmra.mxu0 %vm145_vm3, %v418_v37  ;;  %v662_v37 = vld [vmem:[%s1255_s9 + $0x18] sm:$0xff] }
 0x45b   :  { %680 = vmatpush.msrb.mxu3 %v662_v37 }
 0x462   :  { %832 = vmatmul.msk.f32.vlgmr.msrb.gmra.mxu0 %vm83_vm1, %v612_v11  ;;  %v845_v11 = vld [vmem:[%s1258_s12] ss:$0 sm:$0xff] }
 0x4c3   :  { %v337_v29 = vpop.permute.xlu1 %336 }
 0x4c4   :  { %v339_v30 = vadd.f32 %v337_v29, %v329_v15 }
 0x4c6   :  { %860 = vtanh.f32 %v339_v30 }
 0x4cc   :  { %v861_v31 = vpop.eup %860 }
 0x4cd   :  { %342 = vrot.lane.b32.xlu2 %v861_v31, %s914_s1 }
 0x4d7   :  { %v438_v39 = vpop.f32.mrf.mxu0 }
 0x4df   :  { %v647_v35 = vpop.f32.mrf.mxu0 }
 0x527   :  { %v343_v32 = vpop.permute.xlu2 %342 }
 0x528   :  { %v345_v33 = vmul.f32 %v343_v32, %v326_v26 }
 0x52a   :  { %393 = vrot.lane.b32.xlu1 %v345_v33, %s915_s7 }
 0x59c   :  { %v394_v38 = vpop.permute.xlu1 %393 }
 0x59d   :  { %821 = vmatmul.msk.f32.vlgmr.msrb.gmra.mxu1 %vm121_vm9, %v394_v38  ;;  %v658_v38 = vld [vmem:[%s1254_s8 + $0x10] sm:$0x3f] }
 0x59e   :  { %834 = vmatpush.msk.msrb.mxu2 %vm87_vm0, %v658_v38 }
 0x61a   :  { %v414_v40 = vpop.f32.mrf.mxu1 }
 0x61b   :  { %v439_v41 = vadd.f32 %v438_v39, %v414_v40  ;;  %v661_v39 = vld [vmem:[%s1255_s9 + $0x10] sm:$0xff]  ;;  %v657_v40 = vld [vmem:[%s1254_s8 + $0x8] sm:$0xff] }
 0x61c   :  { %681 = vmatpush.msrb.mxu3 %v661_v39  ;;  %708 = vmatpush.msrb.mxu2 %v657_v40 }
 0x61d   :  { %v441_v42 = vadd.f32 %v1106_v24, %v439_v41  ;;  %v660_v41 = vld [vmem:[%s1255_s9 + $0x8] sm:$0xff] }
 0x61e   :  { %682 = vmatpush.msrb.mxu3 %v660_v41 }
 0x61f   :  { %862 = vtanh.f32 %v441_v42  ;;  %v824_v44 = vmul.f32 -1.442695, %v441_v42  ;;  %v656_v42 = vld [vmem:[%s1254_s8] sm:$0xff] }
 0x620   :  { %709 = vmatpush.msrb.mxu2 %v656_v42 }
 0x621   :  { %864 = vpow2.f32 %v824_v44  ;;  %v650_v44 = vld [vmem:[%s1250_s4] sm:$0x3] }
 0x625   :  { %v863_v43 = vpop.eup %862 }
 0x626   :  { %464 = vrot.lane.b32.xlu2 %v863_v43, %s914_s1  ;;  %v659_v43 = vld [vmem:[%s1255_s9] sm:$0xff] }
 0x627   :  { %v865_v45 = vpop.eup %864  ;;  %683 = vmatpush.msrb.mxu3 %v659_v43 }
 0x628   :  { %v445_v46 = vadd.f32 1.0, %v865_v45 }
 0x62a   :  { %866 = vrcp.f32 %v445_v46  ;;  %v457_v54 = vand.u32 2147483648, %v445_v46  ;;  %vm451_vm2 = vweird.f32 %v445_v46  ;;  %v455_v0 = vand.u32 2147483647, %v445_v46 }
 0x62c   :  { %v458_v55 = vor.u32 1.1754944e-38, %v457_v54  ;;  %vm456_vm5 = vcmp.eq.f32.partialorder %v455_v0, 8.507059e+37 }
 0x630   :  { %v867_v49 = vpop.eup %866 }
 0x631   :  { %v447_v50 = vmul.f32 %v867_v49, %v445_v46  ;;  %vm452_vm15 = vweird.f32 %v867_v49 }
 0x632   :  { %vm453_vm4 = vmor %vm451_vm2, %vm452_vm15 }
 0x633   :  { %v448_v51 = vsub.f32 1.0, %v447_v50 }
 0x635   :  { %v449_v52 = vmul.f32 %v867_v49, %v448_v51  ;;  %v844_v51 = vld [vmem:[%s1256_s10] ss:$0 sm:$0xff] }
 0x637   :  { %v450_v53 = vadd.f32 %v867_v49, %v449_v52 }
 0x639   :  { %v454_v1 = vsel %vm453_vm4, %v867_v49, %v450_v53 }
 0x63a   :  { %v459_v56 = vsel %vm456_vm5, %v458_v55, %v454_v1 }
 0x63b   :  { %v462_v57 = vmul.f32 %v459_v56, %v339_v30 }
 0x680   :  { %v465_v2 = vpop.permute.xlu2 %464 }
 0x681   :  { %v467_v3 = vmul.f32 %v465_v2, %v459_v56 }
 0x683   :  { %469 = vrot.lane.b32.xlu0 %v467_v3, %s915_s7 }
 0x68b   :  { %521 = vrot.lane.b32.xlu0 %v520_v5, %s912_s25 }
 0x6f5   :  { %v470_v58 = vpop.permute.xlu0 %469 }
 0x6f6   :  { %v472_v59 = vadd.f32 %v470_v58, %v462_v57 }
 0x6f8   :  { %868 = vtanh.f32 %v472_v59 }
 0x6fd   :  { %v522_v63 = vpop.permute.xlu0 %521 }
 0x6fe   :  { %v869_v60 = vpop.eup %868  ;;  %v524_v7 = vsel %vm83_vm1, %v517_v6, %v522_v63 }
 0x6ff   :  { %475 = vrot.lane.b32.xlu1 %v869_v60, %s914_s1  ;;  %v551_v8 = vrot.slane %v524_v7, 3 }
 0x701   :  { %829 = vmatmul.msk.f32.vlgmr.msra.gmra.mxu1 %vm145_vm3, %v551_v8 }
 0x771   :  { %v476_v61 = vpop.permute.xlu1 %475 }
 0x772   :  { %v478_v62 = vmul.f32 %v476_v61, %v459_v56 }
 0x774   :  { %526 = vrot.lane.b32.xlu2 %v478_v62, %s915_s7 }
 0x77e   :  { %v571_v10 = vpop.f32.mrf.mxu1 }
 0x7ce   :  { %v527_v9 = vpop.permute.xlu2 %526 }
 0x7cf   :  { %827 = vmatmul.msk.f32.vlgmr.msra.gmra.mxu2 %vm121_vm9, %v527_v9 }
 0x852   :  { %v547_v12 = vpop.f32.mrf.mxu2 }
 0x853   :  { %v572_v16 = vadd.f32 %v571_v10, %v547_v12  ;;  %v760_v12 = vld [vmem:[%s1257_s11 + $0x18] sm:$0xff] }
 0x854   :  { %782 = vmatpush.msrb.mxu1 %v760_v12 }
 0x855   :  { %v574_v17 = vadd.f32 %v1106_v24, %v572_v16  ;;  %v759_v16 = vld [vmem:[%s1257_s11 + $0x10] sm:$0xff] }
 0x856   :  { %783 = vmatpush.msrb.mxu1 %v759_v16 }
 0x857   :  { %870 = vtanh.f32 %v574_v17  ;;  %v830_v21 = vmul.f32 -1.442695, %v574_v17  ;;  %v758_v17 = vld [vmem:[%s1257_s11 + $0x8] sm:$0xff] }
 0x858   :  { %784 = vmatpush.msrb.mxu1 %v758_v17 }
 0x859   :  { %872 = vpow2.f32 %v830_v21 }
 0x85d   :  { %v871_v20 = vpop.eup %870 }
 0x85e   :  { %597 = vrot.lane.b32.xlu1 %v871_v20, %s914_s1  ;;  %v757_v20 = vld [vmem:[%s1257_s11] sm:$0xff]  ;;  %s799_s11 = sshll.u32 %s1259_s13, 4  ;;  %s800_s11 = int_to_ptr.hbm [resolvable:$true] %s799_s11 }
 0x85f   :  { %v873_v18 = vpop.eup %872  ;;  %785 = vmatpush.msrb.mxu1 %v757_v20 }
 0x860   :  { %v578_v19 = vadd.f32 1.0, %v873_v18 }
 0x862   :  { %874 = vrcp.f32 %v578_v19  ;;  %v590_v27 = vand.u32 2147483648, %v578_v19  ;;  %vm584_vm8 = vweird.f32 %v578_v19  ;;  %v588_v14 = vand.u32 2147483647, %v578_v19 }
 0x864   :  { %v591_v15 = vor.u32 1.1754944e-38, %v590_v27  ;;  %vm589_vm11 = vcmp.eq.f32.partialorder %v588_v14, 8.507059e+37 }
 0x866   :  { %652 = vrot.lane.b32.xlu1 %v647_v35, %s912_s25 }
 0x868   :  { %v875_v23 = vpop.eup %874 }
 0x869   :  { %v580_v24 = vmul.f32 %v875_v23, %v578_v19  ;;  %vm585_vm7 = vweird.f32 %v875_v23 }
 0x86a   :  { %vm586_vm10 = vmor %vm584_vm8, %vm585_vm7 }
 0x86b   :  { %v581_v25 = vsub.f32 1.0, %v580_v24 }
 0x86d   :  { %v582_v13 = vmul.f32 %v875_v23, %v581_v25 }
 0x86f   :  { %v583_v26 = vadd.f32 %v875_v23, %v582_v13 }
 0x871   :  { %v587_v28 = vsel %vm586_vm10, %v875_v23, %v583_v26 }
 0x872   :  { %v592_v30 = vsel %vm589_vm11, %v591_v15, %v587_v28 }
 0x873   :  { %v595_v32 = vmul.f32 %v592_v30, %v472_v59 }
 0x8d0   :  { %v598_v29 = vpop.permute.xlu1 %597 }
 0x8d1   :  { %v600_v31 = vmul.f32 %v598_v29, %v592_v30 }
 0x8d3   :  { %602 = vrot.lane.b32.xlu2 %v600_v31, %s915_s7 }
 0x8d8   :  { %v653_v45 = vpop.permute.xlu1 %652 }
 0x8d9   :  { %v655_v46 = vsel %vm83_vm1, %v650_v44, %v653_v45 }
 0x8da   :  { %835 = vmatmul.msk.f32.vlgmr.msrb.gmra.mxu2 %vm145_vm3, %v655_v46 }
 0x92d   :  { %v603_v33 = vpop.permute.xlu2 %602 }
 0x92e   :  { %v605_v34 = vadd.f32 %v603_v33, %v595_v32 }
 0x930   :  { %876 = vtanh.f32 %v605_v34 }
 0x936   :  { %v877_v36 = vpop.eup %876 }
 0x937   :  { %608 = vrot.lane.b32.xlu0 %v877_v36, %s914_s1 }
 0x95d   :  { %v711_v50 = vpop.f32.mrf.mxu2 }
 0x9a9   :  { %v609_v47 = vpop.permute.xlu0 %608 }
 0x9aa   :  { %v611_v48 = vmul.f32 %v609_v47, %v592_v30 }
 0x9ac   :  { %664 = vrot.lane.b32.xlu2 %v611_v48, %s915_s7 }
 0xa06   :  { %v665_v49 = vpop.permute.xlu2 %664 }
 0xa07   :  { %833 = vmatmul.msk.f32.vlgmr.msrb.gmra.mxu3 %vm121_vm9, %v665_v49 }
 0xa8a   :  { %v685_v52 = vpop.f32.mrf.mxu3 }
 0xa8b   :  { %v712_v53 = vadd.f32 %v711_v50, %v685_v52 }
 0xa8d   :  { %v718_v54 = vadd.f32 %v844_v51, %v712_v53 }
 0xa8f   :  { %878 = vtanh.f32 %v718_v54  ;;  %v836_v1 = vmul.f32 -1.442695, %v718_v54 }
 0xa91   :  { %880 = vpow2.f32 %v836_v1 }
 0xa95   :  { %v879_v0 = vpop.eup %878 }
 0xa96   :  { %741 = vrot.lane.b32.xlu0 %v879_v0, %s914_s1 }
 0xa97   :  { %v881_v55 = vpop.eup %880 }
 0xa98   :  { %v722_v2 = vadd.f32 1.0, %v881_v55 }
 0xa9a   :  { %882 = vrcp.f32 %v722_v2  ;;  %v734_v58 = vand.u32 2147483648, %v722_v2  ;;  %vm728_vm1 = vweird.f32 %v722_v2  ;;  %v732_v59 = vand.u32 2147483647, %v722_v2 }
 0xa9c   :  { %v735_v61 = vor.u32 1.1754944e-38, %v734_v58  ;;  %vm733_vm12 = vcmp.eq.f32.partialorder %v732_v59, 8.507059e+37 }
 0xaa0   :  { %v883_v56 = vpop.eup %882 }
 0xaa1   :  { %v724_v3 = vmul.f32 %v883_v56, %v722_v2  ;;  %vm729_vm0 = vweird.f32 %v883_v56 }
 0xaa2   :  { %vm730_vm3 = vmor %vm728_vm1, %vm729_vm0 }
 0xaa3   :  { %v725_v4 = vsub.f32 1.0, %v724_v3 }
 0xaa5   :  { %v726_v5 = vmul.f32 %v883_v56, %v725_v4 }
 0xaa7   :  { %v727_v57 = vadd.f32 %v883_v56, %v726_v5 }
 0xaa9   :  { %v731_v60 = vsel %vm730_vm3, %v883_v56, %v727_v57 }
 0xaaa   :  { %v736_v63 = vsel %vm733_vm12, %v735_v61, %v731_v60 }
 0xaab   :  { %v739_v7 = vmul.f32 0.0, %v736_v63 }
 0xb08   :  { %v742_v62 = vpop.permute.xlu0 %741 }
 0xb09   :  { %v744_v6 = vmul.f32 %v742_v62, %v736_v63 }
 0xb0b   :  { %746 = vrot.lane.b32.xlu1 %v744_v6, %s915_s7 }
 0xb7d   :  { %v747_v8 = vpop.permute.xlu1 %746 }
 0xb7e   :  { %v749_v9 = vadd.f32 %v747_v8, %v739_v7 }
 0xb80   :  { %884 = vtanh.f32 %v749_v9 }
 0xb86   :  { %v885_v10 = vpop.eup %884 }
 0xb87   :  { %752 = vrot.lane.b32.xlu2 %v885_v10, %s914_s1 }
 0xbe1   :  { %v753_v21 = vpop.permute.xlu2 %752 }
 0xbe2   :  { %v755_v18 = vmul.f32 %v753_v21, %v736_v63 }
 0xbe4   :  { %v756_v19 = vmax.f32 %v755_v18, 0.0 }
 0xbe6   :  { %766 = vrot.lane.b32.xlu0 %v756_v19, %s915_s7 }
 0xc58   :  { %v767_v22 = vpop.permute.xlu0 %766 }
 0xc59   :  { %837 = vmatmul.msk.f32.vlgmr.msrb.gmra.mxu1 %vm121_vm9, %v767_v22 }
 0xcd6   :  { %v787_v23 = vpop.f32.mrf.mxu1 }
 0xcd7   :  { %v788_v24 = vadd.f32 %v845_v11, %v787_v23 }
 0xcd9   :  { %791 = vst.msk [vmem:[#allocation2] sm:$0x3] %vm790_vm13, %v788_v24 }
 0xcda   :  { %802 = dma.vmem_to_hbm [thread:$0]  %s798_s14, 32, %s800_s11, [#allocation3]  }
 0xcdb   :  { %910 = dma.done.wait [#allocation3], 32  }
 0xcdc   :  { %911 = vsyncadd [#allocation3], 4294967264 }
 0xcdd   :  { %807 = vsyncpa [#allocation3], 1 }

// kernel: _forward_impl.2
= control target key start
LH: loop header
LB: loop body
LE: loop exit
PB: predicated region body
PF: predicated region fallthrough
CT: control target
= control target key end

     0   :  { %s5471_s24 = smov [#allocation3]   ;;  %s7634_s0 = inlined_call_operand.vmem [shape: s32[6], index: 0, kind: input, shape index: {}]   ;;  %s7635_s1 = inlined_call_operand.vmem [shape: bf16[8,8,8,256], index: 1, kind: input, shape index: {}, may-alias: {1,2}]   ;;  %s7636_s2 = inlined_call_operand.vmem [shape: bf16[8,8,8,256], index: 2, kind: input, shape index: {}, may-alias: {1,2}]   ;;  %s7637_s3 = inlined_call_operand.vmem [shape: f32[6,8,8], index: 3, kind: input, shape index: {}]   ;;  %s7638_s4 = inlined_call_operand.vmem [shape: bf16[256,32], index: 4, kind: input, shape index: {}]   ;;  %s7639_s5 = inlined_call_operand.vmem [shape: f32[1,32], index: 5, kind: input, shape index: {}]   ;;  %s7640_s6 = inlined_call_operand.vmem [shape: bf16[432,64], index: 6, kind: input, shape index: {}]   ;;  %s7641_s7 = inlined_call_operand.vmem [shape: f32[1,64], index: 7, kind: input, shape index: {}]   ;;  %s7642_s8 = inlined_call_operand.vmem [shape: bf16[576,64], index: 8, kind: input, shape index: {}]   ;;  %s7643_s9 = inlined_call_operand.vmem [shape: f32[1,64], index: 9, kind: input, shape index: {}]   ;;  %s7644_s10 = inlined_call_operand.vmem [shape: bf16[576,16], index: 10, kind: input, shape index: {}]   ;;  %s7645_s11 = inlined_call_operand.vmem [shape: f32[1,16], index: 11, kind: input, shape index: {}]   ;;  %s7646_s12 = inlined_call_operand.vmem [shape: f32[6,1,16], index: 12, kind: output, shape index: {}]  }
   0x1   :  { %s18_s23 = sshll.u32 %s7634_s0, 4  ;;  %s19_s23 = int_to_ptr.vmem [resolvable:$true] %s18_s23 }
   0x2   :  { %21 = dma.vmem_to_smem %s19_s23, 16, %s5471_s24, [#allocation2] }
   0x3   :  { %5465 = dma.done.wait [#allocation2], 16 }
   0x4   :  { %5466 = vsyncadd [#allocation2], 4294967280 }
   0x5   :  { %24 = sfence }
   0x6   :  { %s5554_s25 = smov 0  }
   0x7 LB: > { %s5560_s26 = sadd.s32 4294967295, %s5469_s25   ;;  %p4749_p0 = scmp.ge.s32.totalorder %s5469_s25, 1  ;;  %s5469_s25 = sphi %s5554_s25, %s30_s25  }
   0x8   : > { %p377_p1 = scmp.lt.s32.totalorder %s5469_s25, 7 }
   0xa   : > { %p378_p2 = pnand %p4749_p0, %p377_p1 }
   0xb   : > { %s427_s0 = sld [smem:[#allocation3 + %s5560_s26]] (!%p378_p2)  ;;  %s5473_s20 = smov (!%p378_p2), 32  }
   0xc   : > { %381 = sbr.rel (%p378_p2) target bundleno = 1627 (0x65b), region = 64  ;;  %s434_s27 = sld [smem:[#allocation3 + %s5560_s26]] (!%p378_p2) }
   0xd   : > { %s5475_s30 = smov (!%p378_p2), 96   ;;  %s5476_s13 = smov (!%p378_p2), 112  }
   0xe   : > { %s5478_s16 = smov (!%p378_p2), 64   ;;  %s5479_s17 = smov (!%p378_p2), 80  }
   0xf   : > { %p443_p5 = scmp.lt.s32.totalorder (!%p378_p2), %s5560_s26, 5  ;;  %s5482_s19 = smov (!%p378_p2), 8  }
  0x10   : > { %s5483_s21 = smov (!%p378_p2), 24   ;;  %s5484_s22 = smov (!%p378_p2), 56  }
  0x11   : > { %vm643_vm0 = vcmask 1040384   ;;  %vm644_vm1 = vsmask.f32 256  ;;  %vm663_vm2 = vcmask 1044480   ;;  %v5472_v0 = vmov 0   ;;  %p428_p3 = scmp.lt.s32.totalorder %s427_s0, 7 }
  0x12   : > { %v510_v1 = vrot.slane %v5472_v0, 7  ;;  %vm5565_vm3 = vmand %vm643_vm0, %vm644_vm1  ;;  %vm664_vm4 = vsmask.f32 4352  ;;  %s435_s28 = sadd.s32 1, %s434_s27  ;;  %vm1004_vm6 = vcmask 1045504   ;;  %vm871_vm7 = vcmask 1046528  }
  0x13   : > { %vm5570_vm5 = vmand %vm663_vm2, %vm664_vm4  ;;  %s7656_s0 = smov (!%p428_p3, %s427_s0), 7  ;;  %p436_p4 = scmp.lt.s32.totalorder %s435_s28, 7  ;;  %vm1593_vm8 = vcmask 7168   ;;  %vm1602_vm9 = vcmask 15360   ;;  %vm1611_vm10 = vcmask 23552   ;;  %vm1620_vm11 = vcmask 31744  }
  0x14   : > { %v646_v4 = vsel %vm5565_vm3, 0, %v510_v1  ;;  %s5287_s29 = sshll.u32 %s7656_s0, 6  ;;  %vm1629_vm12 = vcmask 39936   ;;  %vm1638_vm13 = vcmask 48128   ;;  %vm1647_vm14 = vcmask 56320   ;;  %s7660_s26 = smov (!%p443_p5, %s5560_s26), 5 }
  0x15   : > { %v5578_v5 = vsel %vm5570_vm5, %v646_v4, 0  ;;  %s5587_s14 = scalar_lea.vmem %s7635_s1, %s5287_s29  ;;  %s7658_s28 = smov (!%p436_p4, %s435_s28), 7  ;;  %vm1656_vm15 = vcmask 64512  }
  0x16   : > { %v5581_v6 = vunpack.c.l.bf16 %v5578_v5  ;;  %v826_v7 = vunpack.c.h.bf16 %v5578_v5  ;;  %v451_v9 = vld [vmem:[%s5587_s14] sm:$0xff]  ;;  %v452_v11 = vld [vmem:[%s5587_s14 + $0x8] sm:$0xff]  ;;  %s5288_s15 = sshll.u32 %s7658_s28, 6  ;;  %s5474_s29 = smov 16  }
  0x17   : > { %v683_v14 = vunpack.c.l.bf16 %v451_v9  ;;  %v684_v15 = vunpack.c.h.bf16 %v451_v9  ;;  %v685_v16 = vunpack.c.l.bf16 %v452_v11  ;;  %v686_v17 = vunpack.c.h.bf16 %v452_v11  ;;  %s5596_s18 = scalar_lea.vmem %s7636_s2, %s5288_s15  ;;  %s5477_s15 = smov 48  }
  0x18   : > { %v1005_v8 = vrot.slane %v5581_v6, 2  ;;  %v1006_v10 = vrot.slane %v826_v7, 2  ;;  %v872_v12 = vrot.slane %v5581_v6, 1  ;;  %v873_v13 = vrot.slane %v826_v7, 1  ;;  %v459_v23 = vld [vmem:[%s5596_s18] sm:$0xff]  ;;  %v460_v25 = vld [vmem:[%s5596_s18 + $0x8] sm:$0xff]  ;;  %s449_s24 = scalar_lea.vmem %s7646_s12, %s7660_s26 }
  0x19   : > { %v699_v18 = vmul.f32 0.00390625, %v683_v14  ;;  %v700_v19 = vmul.f32 0.00390625, %v684_v15  ;;  %v701_v20 = vmul.f32 0.00390625, %v685_v16  ;;  %v702_v21 = vmul.f32 0.00390625, %v686_v17  ;;  %v5607_v26 = vld [vmem:[%s5596_s18 + $0x10] sm:$0xff]  ;;  %s4754_s27 = sshll.u32 %s7660_s26, 3 }
  0x1a   : > { %v5599_v22 = vsel %vm1004_vm6, %v1005_v8, %v1006_v10  ;;  %v5603_v24 = vsel %vm871_vm7, %v872_v12, %v873_v13  ;;  %v475_v28 = vunpack.c.l.b16 %v459_v23  ;;  %v476_v29 = vunpack.c.h.b16 %v459_v23 }
  0x1b   : > { %v715_v27 = vpack.c.bf16 %v700_v19, %v699_v18  ;;  %v716_v30 = vpack.c.bf16 %v702_v21, %v701_v20  ;;  %v477_v31 = vunpack.c.l.b16 %v460_v25  ;;  %v478_v32 = vunpack.c.h.b16 %v460_v25 }
  0x1c   : > { %v479_v33 = vunpack.c.l.b16 %v5607_v26  ;;  %v480_v34 = vunpack.c.h.b16 %v5607_v26  ;;  %v491_v37 = vpack.c.b16 %v475_v28, %v475_v28  ;;  %v492_v38 = vpack.c.b16 %v476_v29, %v476_v29 }
  0x1d   : > { %v5611_v35 = vunpack.c.l.bf16 %v715_v27  ;;  %v5613_v36 = vunpack.c.h.bf16 %v715_v27  ;;  %v5615_v39 = vunpack.c.l.bf16 %v716_v30  ;;  %v5617_v40 = vunpack.c.h.bf16 %v716_v30 }
  0x1e   : > { %v493_v41 = vpack.c.b16 %v477_v31, %v477_v31  ;;  %v494_v42 = vpack.c.b16 %v478_v32, %v478_v32  ;;  %v515_v47 = vshrl.u32 %v491_v37, 16  ;;  %v518_v48 = vshll.u32 %v491_v37, 16 }
  0x1f   : > { %v1065_v43 = vmul.f32 %v5599_v22, %v5611_v35  ;;  %v1066_v44 = vmul.f32 %v5599_v22, %v5613_v36  ;;  %v754_v45 = vmul.f32 %v5581_v6, %v5611_v35  ;;  %v755_v46 = vmul.f32 %v5581_v6, %v5613_v36 }
  0x20   : > { %v522_v49 = vshrl.u32 %v492_v38, 16  ;;  %v525_v50 = vshll.u32 %v492_v38, 16  ;;  %v517_v55 = vrot.slane %v515_v47, 7  ;;  %v932_v57 = vmul.f32 %v5603_v24, %v5611_v35 }
  0x21   : > { %v1081_v51 = vpack.c.bf16 %v1065_v43, %v1065_v43  ;;  %v1082_v52 = vpack.c.bf16 %v1066_v44, %v1066_v44  ;;  %v770_v53 = vpack.c.bf16 %v754_v45, %v754_v45  ;;  %v771_v54 = vpack.c.bf16 %v755_v46, %v755_v46 }
  0x22   : > { %v524_v56 = vrot.slane %v522_v49, 7  ;;  %v933_v58 = vmul.f32 %v5603_v24, %v5613_v36  ;;  %v520_v63 = vor.u32 %v518_v48, %v517_v55  ;;  %v948_v1 = vpack.c.bf16 %v932_v57, %v932_v57 }
  0x23   : > { %v1097_v59 = vunpack.c.l.bf16 %v1081_v51  ;;  %v1098_v60 = vunpack.c.l.bf16 %v1082_v52  ;;  %v786_v61 = vunpack.c.l.bf16 %v770_v53  ;;  %v787_v62 = vunpack.c.l.bf16 %v771_v54 }
  0x24   : > { %v527_v0 = vor.u32 %v525_v50, %v524_v56  ;;  %v949_v4 = vpack.c.bf16 %v933_v58, %v933_v58  ;;  %v529_v9 = vshrl.u32 %v493_v41, 16  ;;  %v532_v10 = vshll.u32 %v493_v41, 16 }
  0x25   : > { %v1113_v7 = vadd.f32 %v1098_v60, %v1097_v59  ;;  %v802_v8 = vadd.f32 %v787_v62, %v786_v61  ;;  %v647_v11 = vsel %vm5565_vm3, 0, %v520_v63  ;;  %v964_v13 = vunpack.c.l.bf16 %v948_v1 }
  0x26   : > { %v648_v12 = vsel %vm5565_vm3, 0, %v527_v0  ;;  %v965_v14 = vunpack.c.l.bf16 %v949_v4  ;;  %v667_v15 = vsel %vm5570_vm5, %v647_v11, 0  ;;  %v531_v17 = vrot.slane %v529_v9, 7 }
  0x27   : > { %1114 = vadd.xlane.f32.xlu1 %v1113_v7  ;;  %803 = vadd.xlane.f32.xlu0 %v802_v8  ;;  %v668_v16 = vsel %vm5570_vm5, %v648_v12, 0  ;;  %v536_v18 = vshrl.u32 %v494_v42, 16  ;;  %v740_v19 = vunpack.c.l.bf16 %v667_v15  ;;  %v539_v23 = vshll.u32 %v494_v42, 16 }
  0x28   : > { %v741_v20 = vunpack.c.l.bf16 %v668_v16  ;;  %v980_v21 = vadd.f32 %v965_v14, %v964_v13  ;;  %v534_v25 = vor.u32 %v532_v10, %v531_v17  ;;  %v827_v28 = vunpack.c.h.bf16 %v667_v15 }
  0x29   : > { %v538_v27 = vrot.slane %v536_v18, 7  ;;  %v828_v29 = vunpack.c.h.bf16 %v668_v16  ;;  %v1139_v30 = vmul.f32 %v740_v19, %v5611_v35  ;;  %v756_v32 = vmul.f32 %v740_v19, %v5615_v39 }
  0x2a   : > { %v1140_v31 = vmul.f32 %v741_v20, %v5613_v36  ;;  %v757_v37 = vmul.f32 %v741_v20, %v5617_v40  ;;  %v649_v41 = vsel %vm5565_vm3, 0, %v534_v25  ;;  %v875_v43 = vrot.slane %v740_v19, 1 }
  0x2b   : > { %v541_v38 = vor.u32 %v539_v23, %v538_v27  ;;  %v876_v44 = vrot.slane %v827_v28, 1  ;;  %v1155_v45 = vpack.c.bf16 %v1139_v30, %v1139_v30  ;;  %v772_v46 = vpack.c.bf16 %v756_v32, %v756_v32 }
  0x2c   : > { %v1156_v42 = vpack.c.bf16 %v1140_v31, %v1140_v31  ;;  %v773_v47 = vpack.c.bf16 %v757_v37, %v757_v37  ;;  %v5649_v49 = vsel %vm5570_vm5, %v649_v41, 0  ;;  %v878_v51 = vrot.slane %v741_v20, 1 }
  0x2d   : > { %v650_v48 = vsel %vm5565_vm3, 0, %v541_v38  ;;  %v5652_v50 = vsel %vm871_vm7, %v875_v43, %v876_v44  ;;  %v1171_v52 = vunpack.c.l.bf16 %v1155_v45  ;;  %v788_v54 = vunpack.c.l.bf16 %v772_v46 }
  0x2e   : > { %v1172_v53 = vunpack.c.l.bf16 %v1156_v42  ;;  %v789_v55 = vunpack.c.l.bf16 %v773_v47  ;;  %v5656_v56 = vsel %vm5570_vm5, %v650_v48, 0  ;;  %v5659_v57 = vunpack.c.l.bf16 %v5649_v49 }
  0x2f   : > { %981 = vadd.xlane.f32.xlu0 %v980_v21  ;;  %v879_v58 = vrot.slane %v828_v29, 1  ;;  %v1225_v59 = vmul.f32 %v5652_v50, %v5611_v35  ;;  %v5664_v62 = vunpack.c.l.bf16 %v5656_v56  ;;  %v1008_v63 = vrot.slane %v740_v19, 2 }
  0x30   : > { %v1187_v60 = vadd.f32 %v1172_v53, %v1171_v52  ;;  %v805_v61 = vadd.f32 %v789_v55, %v788_v54  ;;  %v1141_v0 = vmul.f32 %v5659_v57, %v5615_v39  ;;  %v1009_v7 = vrot.slane %v827_v28, 2 }
  0x31   : > { %v5669_v1 = vsel %vm871_vm7, %v878_v51, %v879_v58  ;;  %v1241_v4 = vpack.c.bf16 %v1225_v59, %v1225_v59  ;;  %v1142_v8 = vmul.f32 %v5664_v62, %v5617_v40  ;;  %v1011_v10 = vrot.slane %v741_v20, 2 }
  0x32   : > { %1188 = vadd.xlane.f32.xlu2 %v1187_v60  ;;  %806 = vadd.xlane.f32.xlu1 %v805_v61  ;;  %v1226_v9 = vmul.f32 %v5669_v1, %v5613_v36  ;;  %v1012_v11 = vrot.slane %v828_v29, 2  ;;  %v1157_v12 = vpack.c.bf16 %v1141_v0, %v1141_v0  ;;  %v1010_v14 = vsel %vm1004_vm6, %v1008_v63, %v1009_v7 }
  0x33   : > { %v1257_v13 = vunpack.c.l.bf16 %v1241_v4  ;;  %v1377_v15 = vmul.f32 %v5659_v57, %v5611_v35  ;;  %v1158_v16 = vpack.c.bf16 %v1142_v8, %v1142_v8  ;;  %v1067_v19 = vmul.f32 %v1010_v14, %v5615_v39 }
  0x34   : > { %v1242_v17 = vpack.c.bf16 %v1226_v9, %v1226_v9  ;;  %v1013_v18 = vsel %vm1004_vm6, %v1011_v10, %v1012_v11  ;;  %v1173_v21 = vunpack.c.l.bf16 %v1157_v12  ;;  %v1378_v20 = vmul.f32 %v5664_v62, %v5613_v36 }
  0x35   : > { %v1068_v23 = vmul.f32 %v1013_v18, %v5617_v40  ;;  %v1393_v25 = vpack.c.bf16 %v1377_v15, %v1377_v15  ;;  %v1174_v27 = vunpack.c.l.bf16 %v1158_v16  ;;  %v1083_v29 = vpack.c.bf16 %v1067_v19, %v1067_v19 }
  0x36   : > { %v1258_v28 = vunpack.c.l.bf16 %v1242_v17  ;;  %v829_v30 = vunpack.c.h.bf16 %v5649_v49  ;;  %v1394_v32 = vpack.c.bf16 %v1378_v20, %v1378_v20  ;;  %v830_v38 = vunpack.c.h.bf16 %v5656_v56 }
  0x37   : > { %v1084_v31 = vpack.c.bf16 %v1068_v23, %v1068_v23  ;;  %v1409_v37 = vunpack.c.l.bf16 %v1393_v25  ;;  %v1190_v41 = vadd.f32 %v1174_v27, %v1173_v21  ;;  %v1099_v44 = vunpack.c.l.bf16 %v1083_v29 }
  0x38   : > { %v1273_v43 = vadd.f32 %v1258_v28, %v1257_v13  ;;  %v881_v45 = vrot.slane %v5659_v57, 1  ;;  %v1410_v46 = vunpack.c.l.bf16 %v1394_v32  ;;  %v882_v47 = vrot.slane %v829_v30, 1 }
  0x39   : > { %v1100_v42 = vunpack.c.l.bf16 %v1084_v31  ;;  %v884_v48 = vrot.slane %v5664_v62, 1  ;;  %v885_v51 = vrot.slane %v830_v38, 1  ;;  %v1305_v49 = vmul.f32 %v1010_v14, %v5611_v35 }
  0x3a   : > { %1191 = vadd.xlane.f32.xlu2 %v1190_v41  ;;  %1274 = vadd.xlane.f32.xlu1 %v1273_v43  ;;  %v1306_v52 = vmul.f32 %v1013_v18, %v5613_v36  ;;  %v495_v53 = vpack.c.b16 %v479_v33, %v479_v33  ;;  %v1425_v55 = vadd.f32 %v1410_v46, %v1409_v37  ;;  %v1014_v17 = vrot.slane %v5659_v57, 2 }
  0x3b   : > { %v1116_v54 = vadd.f32 %v1100_v42, %v1099_v44  ;;  %v5693_v56 = vsel %vm871_vm7, %v881_v45, %v882_v47  ;;  %v496_v58 = vpack.c.b16 %v480_v34, %v480_v34  ;;  %v5699_v59 = vsel %vm871_vm7, %v884_v48, %v885_v51 }
  0x3c   : > { %v1227_v60 = vmul.f32 %v5693_v56, %v5615_v39  ;;  %v1321_v61 = vpack.c.bf16 %v1305_v49, %v1305_v49  ;;  %v1322_v63 = vpack.c.bf16 %v1306_v52, %v1306_v52  ;;  %v1228_v33 = vmul.f32 %v5699_v59, %v5617_v40 }
  0x3d   : > { %1117 = vadd.xlane.f32.xlu0 %v1116_v54  ;;  %v543_v0 = vshrl.u32 %v495_v53, 16  ;;  %v546_v4 = vshll.u32 %v495_v53, 16  ;;  %v550_v7 = vshrl.u32 %v496_v58, 16  ;;  %v553_v10 = vshll.u32 %v496_v58, 16 }
  0x3e   : > { %v1243_v8 = vpack.c.bf16 %v1227_v60, %v1227_v60  ;;  %v1337_v9 = vunpack.c.l.bf16 %v1321_v61  ;;  %v1338_v26 = vunpack.c.l.bf16 %v1322_v63  ;;  %v1244_v34 = vpack.c.bf16 %v1228_v33, %v1228_v33 }
  0x3f   : > { %v545_v11 = vrot.slane %v543_v0, 7  ;;  %v552_v12 = vrot.slane %v550_v7, 7  ;;  %v1449_v13 = vmul.f32 %v5693_v56, %v5611_v35  ;;  %v1450_v16 = vmul.f32 %v5699_v59, %v5613_v36 }
  0x40   : > { %v1259_v14 = vunpack.c.l.bf16 %v1243_v8  ;;  %v1353_v15 = vadd.f32 %v1338_v26, %v1337_v9  ;;  %v1260_v18 = vunpack.c.l.bf16 %v1244_v34  ;;  %v1015_v25 = vrot.slane %v829_v30, 2 }
  0x41   : > { %v548_v19 = vor.u32 %v546_v4, %v545_v11  ;;  %v555_v21 = vor.u32 %v553_v10, %v552_v12  ;;  %v1465_v23 = vpack.c.bf16 %v1449_v13, %v1449_v13  ;;  %v1466_v20 = vpack.c.bf16 %v1450_v16, %v1450_v16 }
  0x42   : > { %1426 = vadd.xlane.f32.xlu2 %v1425_v55  ;;  %v1017_v27 = vrot.slane %v5664_v62, 2  ;;  %v1018_v28 = vrot.slane %v830_v38, 2  ;;  %v1276_v29 = vadd.f32 %v1260_v18, %v1259_v14  ;;  %v5720_v30 = vsel %vm1004_vm6, %v1014_v17, %v1015_v25 }
  0x43   : > { %v651_v31 = vsel %vm5565_vm3, 0, %v548_v19  ;;  %v652_v32 = vsel %vm5565_vm3, 0, %v555_v21  ;;  %v1481_v37 = vunpack.c.l.bf16 %v1465_v23  ;;  %v1482_v44 = vunpack.c.l.bf16 %v1466_v20  ;;  %v453_v21 = vld [vmem:[%s5587_s14 + $0x10] sm:$0xff] }
  0x44   : > { %v671_v41 = vsel %vm5570_vm5, %v651_v31, 0  ;;  %v672_v43 = vsel %vm5570_vm5, %v652_v32, 0  ;;  %1277 = vadd.xlane.f32.xlu1 %v1276_v29  ;;  %v5727_v42 = vsel %vm1004_vm6, %v1017_v27, %v1018_v28  ;;  %v1307_v46 = vmul.f32 %v5720_v30, %v5615_v39 }
  0x45   : > { %1354 = vadd.xlane.f32.xlu0 %v1353_v15  ;;  %v5722_v38 = vunpack.c.l.bf16 %v671_v41  ;;  %v5724_v45 = vunpack.c.l.bf16 %v672_v43  ;;  %v1497_v47 = vadd.f32 %v1482_v44, %v1481_v37  ;;  %v1308_v48 = vmul.f32 %v5727_v42, %v5617_v40 }
  0x46   : > { %v934_v51 = vmul.f32 %v5652_v50, %v5615_v39  ;;  %v935_v49 = vmul.f32 %v5669_v1, %v5617_v40  ;;  %v1323_v54 = vpack.c.bf16 %v1307_v46, %v1307_v46  ;;  %v831_v55 = vunpack.c.h.bf16 %v671_v41 }
  0x47   : > { %v1379_v52 = vmul.f32 %v5722_v38, %v5615_v39  ;;  %v1380_v53 = vmul.f32 %v5724_v45, %v5617_v40  ;;  %v1324_v58 = vpack.c.bf16 %v1308_v48, %v1308_v48  ;;  %v832_v63 = vunpack.c.h.bf16 %v672_v43  ;;  %v462_v43 = vld [vmem:[%s5596_s18 + $0x18] sm:$0xff] }
  0x48   : > { %v950_v60 = vpack.c.bf16 %v934_v51, %v934_v51  ;;  %v951_v61 = vpack.c.bf16 %v935_v49, %v935_v49  ;;  %v1339_v4 = vunpack.c.l.bf16 %v1323_v54  ;;  %v887_v50 = vrot.slane %v5722_v38, 1  ;;  %v454_v51 = vld [vmem:[%s5587_s14 + $0x18] sm:$0xff] }
  0x49   : > { %v1395_v33 = vpack.c.bf16 %v1379_v52, %v1379_v52  ;;  %v1396_v0 = vpack.c.bf16 %v1380_v53, %v1380_v53  ;;  %v1340_v7 = vunpack.c.l.bf16 %v1324_v58  ;;  %v888_v9 = vrot.slane %v831_v55, 1 }
  0x4a   : > { %v966_v8 = vunpack.c.l.bf16 %v950_v60  ;;  %v967_v1 = vunpack.c.l.bf16 %v951_v61  ;;  %v890_v34 = vrot.slane %v5724_v45, 1  ;;  %v891_v11 = vrot.slane %v832_v63, 1 }
  0x4b   : > { %v1411_v26 = vunpack.c.l.bf16 %v1395_v33  ;;  %v1412_v10 = vunpack.c.l.bf16 %v1396_v0  ;;  %v1356_v12 = vadd.f32 %v1340_v7, %v1339_v4  ;;  %v5744_v14 = vsel %vm871_vm7, %v887_v50, %v888_v9 }
  0x4c   : > { %v983_v13 = vadd.f32 %v967_v1, %v966_v8  ;;  %v1521_v15 = vmul.f32 %v5720_v30, %v5611_v35  ;;  %1498 = vadd.xlane.f32.xlu1 %v1497_v47  ;;  %v5749_v17 = vsel %vm871_vm7, %v890_v34, %v891_v11  ;;  %v1451_v18 = vmul.f32 %v5744_v14, %v5615_v39 }
  0x4d   : > { %v1428_v16 = vadd.f32 %v1412_v10, %v1411_v26  ;;  %v1522_v19 = vmul.f32 %v5727_v42, %v5613_v36  ;;  %1357 = vadd.xlane.f32.xlu0 %v1356_v12  ;;  %v1452_v23 = vmul.f32 %v5749_v17, %v5617_v40  ;;  %v1020_v35 = vrot.slane %v5722_v38, 2 }
  0x4e   : > { %v1537_v20 = vpack.c.bf16 %v1521_v15, %v1521_v15  ;;  %v1021_v25 = vrot.slane %v831_v55, 2  ;;  %v1467_v27 = vpack.c.bf16 %v1451_v18, %v1451_v18  ;;  %v1023_v29 = vrot.slane %v5724_v45, 2 }
  0x4f   : > { %1429 = vadd.xlane.f32.xlu2 %v1428_v16  ;;  %v1538_v28 = vpack.c.bf16 %v1522_v19, %v1522_v19  ;;  %v1024_v31 = vrot.slane %v832_v63, 2  ;;  %v1468_v32 = vpack.c.bf16 %v1452_v23, %v1452_v23  ;;  %v687_v41 = vunpack.c.l.bf16 %v453_v21  ;;  %v5773_v63 = vld [vmem:[%s5596_s18 + $0x20] sm:$0xff] }
  0x50   : > { %v1553_v37 = vunpack.c.l.bf16 %v1537_v20  ;;  %v5761_v36 = vsel %vm1004_vm6, %v1020_v35, %v1021_v25  ;;  %v1483_v44 = vunpack.c.l.bf16 %v1467_v27  ;;  %v688_v53 = vunpack.c.h.bf16 %v453_v21 }
  0x51   : > { %v1554_v46 = vunpack.c.l.bf16 %v1538_v28  ;;  %v5765_v47 = vsel %vm1004_vm6, %v1023_v29, %v1024_v31  ;;  %v1523_v48 = vmul.f32 %v5761_v36, %v5615_v39  ;;  %v1484_v49 = vunpack.c.l.bf16 %v1468_v32 }
  0x52   : > { %v1524_v52 = vmul.f32 %v5765_v47, %v5617_v40  ;;  %v703_v54 = vmul.f32 0.00390625, %v687_v41  ;;  %v481_v60 = vunpack.c.l.b16 %v462_v43  ;;  %v482_v61 = vunpack.c.h.b16 %v462_v43 }
  0x53   : > { %v1569_v55 = vadd.f32 %v1554_v46, %v1553_v37  ;;  %v1539_v58 = vpack.c.bf16 %v1523_v48, %v1523_v48  ;;  %v1500_v33 = vadd.f32 %v1484_v49, %v1483_v44  ;;  %v704_v4 = vmul.f32 0.00390625, %v688_v53 }
  0x54   : > { %v1540_v0 = vpack.c.bf16 %v1524_v52, %v1524_v52  ;;  %v689_v50 = vunpack.c.l.bf16 %v454_v51  ;;  %v497_v8 = vpack.c.b16 %v481_v60, %v481_v60  ;;  %v498_v39 = vpack.c.b16 %v482_v61, %v482_v61 }
  0x55   : > { %v1555_v7 = vunpack.c.l.bf16 %v1539_v58  ;;  %v690_v1 = vunpack.c.h.bf16 %v454_v51  ;;  %1501 = vadd.xlane.f32.xlu1 %v1500_v33  ;;  %1570 = vadd.xlane.f32.xlu0 %v1569_v55  ;;  %v717_v40 = vpack.c.bf16 %v704_v4, %v703_v54  ;;  %v483_v26 = vunpack.c.l.b16 %v5773_v63 }
  0x56   : > { %v1556_v9 = vunpack.c.l.bf16 %v1540_v0  ;;  %v557_v10 = vshrl.u32 %v497_v8, 16  ;;  %v560_v34 = vshll.u32 %v497_v8, 16  ;;  %v564_v11 = vshrl.u32 %v498_v39, 16 }
  0x57   : > { %984 = vadd.xlane.f32.xlu2 %v983_v13  ;;  %v705_v12 = vmul.f32 0.00390625, %v689_v50  ;;  %v5776_v16 = vunpack.c.l.bf16 %v717_v40  ;;  %v5778_v18 = vunpack.c.h.bf16 %v717_v40  ;;  %v567_v19 = vshll.u32 %v498_v39, 16 }
  0x58   : > { %v1572_v15 = vadd.f32 %v1556_v9, %v1555_v7  ;;  %v559_v21 = vrot.slane %v557_v10, 7  ;;  %v566_v23 = vrot.slane %v564_v11, 7  ;;  %v706_v20 = vmul.f32 0.00390625, %v690_v1 }
  0x59   : > { %v5780_v35 = vpack.c.b16 %v483_v26, %v483_v26  ;;  %v936_v25 = vmul.f32 %v5693_v56, %v5776_v16  ;;  %v937_v13 = vmul.f32 %v5699_v59, %v5778_v18  ;;  %v758_v27 = vmul.f32 %v5659_v57, %v5776_v16 }
  0x5a   : > { %v759_v28 = vmul.f32 %v5664_v62, %v5778_v18  ;;  %v1069_v29 = vmul.f32 %v5720_v30, %v5776_v16  ;;  %v1070_v31 = vmul.f32 %v5727_v42, %v5778_v18  ;;  %v1229_v32 = vmul.f32 %v5744_v14, %v5776_v16 }
  0x5b   : > { %v1230_v56 = vmul.f32 %v5749_v17, %v5778_v18  ;;  %v952_v37 = vpack.c.bf16 %v936_v25, %v936_v25  ;;  %v953_v59 = vpack.c.bf16 %v937_v13, %v937_v13  ;;  %v774_v41 = vpack.c.bf16 %v758_v27, %v758_v27 }
  0x5c   : > { %v775_v43 = vpack.c.bf16 %v759_v28, %v759_v28  ;;  %v1085_v57 = vpack.c.bf16 %v1069_v29, %v1069_v29  ;;  %v1086_v44 = vpack.c.bf16 %v1070_v31, %v1070_v31  ;;  %v1245_v46 = vpack.c.bf16 %v1229_v32, %v1229_v32 }
  0x5d   : > { %v1246_v62 = vpack.c.bf16 %v1230_v56, %v1230_v56  ;;  %v968_v48 = vunpack.c.l.bf16 %v952_v37  ;;  %v969_v51 = vunpack.c.l.bf16 %v953_v59  ;;  %v790_v30 = vunpack.c.l.bf16 %v774_v41 }
  0x5e   : > { %v791_v49 = vunpack.c.l.bf16 %v775_v43  ;;  %v1101_v42 = vunpack.c.l.bf16 %v1085_v57  ;;  %v1102_v52 = vunpack.c.l.bf16 %v1086_v44  ;;  %v1261_v53 = vunpack.c.l.bf16 %v1245_v46 }
  0x5f   : > { %1573 = vadd.xlane.f32.xlu2 %v1572_v15  ;;  %v1262_v54 = vunpack.c.l.bf16 %v1246_v62  ;;  %v986_v55 = vadd.f32 %v969_v51, %v968_v48  ;;  %v1143_v60 = vmul.f32 %v5722_v38, %v5776_v16  ;;  %v1144_v61 = vmul.f32 %v5724_v45, %v5778_v18 }
  0x60   : > { %v808_v58 = vadd.f32 %v791_v49, %v790_v30  ;;  %v1119_v33 = vadd.f32 %v1102_v52, %v1101_v42  ;;  %v1309_v4 = vmul.f32 %v5761_v36, %v5776_v16  ;;  %v1310_v50 = vmul.f32 %v5765_v47, %v5778_v18 }
  0x61   : > { %v1279_v0 = vadd.f32 %v1262_v54, %v1261_v53  ;;  %987 = vadd.xlane.f32.xlu1 %v986_v55  ;;  %v1159_v7 = vpack.c.bf16 %v1143_v60, %v1143_v60  ;;  %v1160_v8 = vpack.c.bf16 %v1144_v61, %v1144_v61  ;;  %v562_v39 = vor.u32 %v560_v34, %v559_v21 }
  0x62   : > { %809 = vadd.xlane.f32.xlu0 %v808_v58  ;;  %v484_v1 = vunpack.c.h.b16 %v5773_v63  ;;  %v1325_v9 = vpack.c.bf16 %v1309_v4, %v1309_v4  ;;  %v1326_v40 = vpack.c.bf16 %v1310_v50, %v1310_v50  ;;  %v569_v26 = vor.u32 %v567_v19, %v566_v23 }
  0x63   : > { %v718_v10 = vpack.c.bf16 %v706_v20, %v705_v12  ;;  %v1175_v11 = vunpack.c.l.bf16 %v1159_v7  ;;  %v1176_v15 = vunpack.c.l.bf16 %v1160_v8  ;;  %v653_v25 = vsel %vm5565_vm3, 0, %v562_v39 }
  0x64   : > { %v571_v13 = vshrl.u32 %v5780_v35, 16  ;;  %v1341_v27 = vunpack.c.l.bf16 %v1325_v9  ;;  %v1342_v28 = vunpack.c.l.bf16 %v1326_v40  ;;  %v654_v29 = vsel %vm5565_vm3, 0, %v569_v26 }
  0x65   : > { %v673_v34 = vsel %vm5570_vm5, %v653_v25, 0  ;;  %v1193_v21 = vadd.f32 %v1176_v15, %v1175_v11  ;;  %v674_v19 = vsel %vm5570_vm5, %v654_v29, 0  ;;  %v5820_v56 = vunpack.c.l.bf16 %v718_v10 }
  0x66   : > { %v5816_v12 = vunpack.c.l.bf16 %v673_v34  ;;  %v833_v23 = vunpack.c.h.bf16 %v673_v34  ;;  %v1359_v20 = vadd.f32 %v1342_v28, %v1341_v27  ;;  %v5818_v31 = vunpack.c.l.bf16 %v674_v19 }
  0x67   : > { %1120 = vadd.xlane.f32.xlu2 %v1119_v33  ;;  %v834_v32 = vunpack.c.h.bf16 %v674_v19  ;;  %v5825_v43 = vunpack.c.h.bf16 %v718_v10  ;;  %v760_v62 = vmul.f32 %v5722_v38, %v5820_v56  ;;  %v938_v26 = vmul.f32 %v5744_v14, %v5820_v56 }
  0x68   : > { %v893_v37 = vrot.slane %v5816_v12, 1  ;;  %v894_v59 = vrot.slane %v833_v23, 1  ;;  %v1381_v41 = vmul.f32 %v5816_v12, %v5776_v16  ;;  %v896_v57 = vrot.slane %v5818_v31, 1 }
  0x69   : > { %v897_v44 = vrot.slane %v834_v32, 1  ;;  %v1382_v46 = vmul.f32 %v5818_v31, %v5778_v18  ;;  %1280 = vadd.xlane.f32.xlu1 %v1279_v0  ;;  %v761_v30 = vmul.f32 %v5724_v45, %v5825_v43  ;;  %v1026_v49 = vrot.slane %v5816_v12, 2 }
  0x6a   : > { %1194 = vadd.xlane.f32.xlu0 %v1193_v21  ;;  %v5833_v48 = vsel %vm871_vm7, %v893_v37, %v894_v59  ;;  %v1397_v51 = vpack.c.bf16 %v1381_v41, %v1381_v41  ;;  %v776_v54 = vpack.c.bf16 %v760_v62, %v760_v62  ;;  %v1027_v60 = vrot.slane %v833_v23, 2 }
  0x6b   : > { %v5839_v42 = vsel %vm871_vm7, %v896_v57, %v897_v44  ;;  %v1453_v52 = vmul.f32 %v5833_v48, %v5776_v16  ;;  %v1398_v53 = vpack.c.bf16 %v1382_v46, %v1382_v46  ;;  %v777_v58 = vpack.c.bf16 %v761_v30, %v761_v30 }
  0x6c   : > { %v1454_v38 = vmul.f32 %v5839_v42, %v5778_v18  ;;  %v1413_v55 = vunpack.c.l.bf16 %v1397_v51  ;;  %v792_v0 = vunpack.c.l.bf16 %v776_v54  ;;  %v1029_v45 = vrot.slane %v5818_v31, 2 }
  0x6d   : > { %v1469_v61 = vpack.c.bf16 %v1453_v52, %v1453_v52  ;;  %v1414_v33 = vunpack.c.l.bf16 %v1398_v53  ;;  %v793_v50 = vunpack.c.l.bf16 %v777_v58  ;;  %v5847_v7 = vsel %vm1004_vm6, %v1026_v49, %v1027_v60  ;;  %v455_v60 = vld [vmem:[%s5587_s14 + $0x20] sm:$0xff] }
  0x6e   : > { %v1470_v4 = vpack.c.bf16 %v1454_v38, %v1454_v38  ;;  %v1030_v8 = vrot.slane %v834_v32, 2  ;;  %v1525_v40 = vmul.f32 %v5847_v7, %v5776_v16  ;;  %v939_v25 = vmul.f32 %v5749_v17, %v5825_v43 }
  0x6f   : > { %1360 = vadd.xlane.f32.xlu2 %v1359_v20  ;;  %v1485_v39 = vunpack.c.l.bf16 %v1469_v61  ;;  %v1431_v9 = vadd.f32 %v1414_v33, %v1413_v55  ;;  %v811_v11 = vadd.f32 %v793_v50, %v792_v0  ;;  %v954_v29 = vpack.c.bf16 %v938_v26, %v938_v26  ;;  %v5884_v0 = vld [vmem:[%s5596_s18 + $0x28] sm:$0xff] }
  0x70   : > { %v1486_v10 = vunpack.c.l.bf16 %v1470_v4  ;;  %v5854_v15 = vsel %vm1004_vm6, %v1029_v45, %v1030_v8  ;;  %v1541_v28 = vpack.c.bf16 %v1525_v40, %v1525_v40  ;;  %v1071_v34 = vmul.f32 %v5761_v36, %v5820_v56 }
  0x71   : > { %v1526_v27 = vmul.f32 %v5854_v15, %v5778_v18  ;;  %v955_v21 = vpack.c.bf16 %v939_v25, %v939_v25  ;;  %v1072_v14 = vmul.f32 %v5765_v47, %v5825_v43  ;;  %v1231_v19 = vmul.f32 %v5833_v48, %v5820_v56 }
  0x72   : > { %v1503_v16 = vadd.f32 %v1486_v10, %v1485_v39  ;;  %1432 = vadd.xlane.f32.xlu0 %v1431_v9  ;;  %v1557_v20 = vunpack.c.l.bf16 %v1541_v28  ;;  %v970_v17 = vunpack.c.l.bf16 %v954_v29  ;;  %v1087_v32 = vpack.c.bf16 %v1071_v34, %v1071_v34 }
  0x73   : > { %v1542_v23 = vpack.c.bf16 %v1526_v27, %v1526_v27  ;;  %v971_v18 = vunpack.c.l.bf16 %v955_v21  ;;  %v1088_v37 = vpack.c.bf16 %v1072_v14, %v1072_v14  ;;  %v1232_v59 = vmul.f32 %v5839_v42, %v5825_v43 }
  0x74   : > { %1504 = vadd.xlane.f32.xlu1 %v1503_v16  ;;  %v1247_v36 = vpack.c.bf16 %v1231_v19, %v1231_v19  ;;  %v1103_v57 = vunpack.c.l.bf16 %v1087_v32  ;;  %v1145_v47 = vmul.f32 %v5816_v12, %v5820_v56  ;;  %v1146_v44 = vmul.f32 %v5818_v31, %v5825_v43 }
  0x75   : > { %v1558_v41 = vunpack.c.l.bf16 %v1542_v23  ;;  %v989_v46 = vadd.f32 %v971_v18, %v970_v17  ;;  %v1104_v62 = vunpack.c.l.bf16 %v1088_v37  ;;  %v500_v51 = vpack.c.b16 %v484_v1, %v484_v1 }
  0x76   : > { %v1248_v30 = vpack.c.bf16 %v1232_v59, %v1232_v59  ;;  %v1161_v49 = vpack.c.bf16 %v1145_v47, %v1145_v47  ;;  %v1162_v52 = vpack.c.bf16 %v1146_v44, %v1146_v44  ;;  %v1311_v53 = vmul.f32 %v5847_v7, %v5820_v56 }
  0x77   : > { %812 = vadd.xlane.f32.xlu2 %v811_v11  ;;  %v1575_v54 = vadd.f32 %v1558_v41, %v1557_v20  ;;  %v1263_v38 = vunpack.c.l.bf16 %v1247_v36  ;;  %v1312_v55 = vmul.f32 %v5854_v15, %v5825_v43  ;;  %v573_v58 = vrot.slane %v571_v13, 7 }
  0x78   : > { %v1122_v63 = vadd.f32 %v1104_v62, %v1103_v57  ;;  %v1177_v61 = vunpack.c.l.bf16 %v1161_v49  ;;  %v1327_v33 = vpack.c.bf16 %v1311_v53, %v1311_v53  ;;  %v574_v1 = vshll.u32 %v5780_v35, 16 }
  0x79   : > { %v1178_v45 = vunpack.c.l.bf16 %v1162_v52  ;;  %v1328_v4 = vpack.c.bf16 %v1312_v55, %v1312_v55  ;;  %v578_v50 = vshrl.u32 %v500_v51, 16  ;;  %v581_v8 = vshll.u32 %v500_v51, 16 }
  0x7a   : > { %990 = vadd.xlane.f32.xlu0 %v989_v46  ;;  %v1264_v39 = vunpack.c.l.bf16 %v1248_v30  ;;  %v1343_v9 = vunpack.c.l.bf16 %v1327_v33  ;;  %v576_v40 = vor.u32 %v574_v1, %v573_v58  ;;  %v691_v26 = vunpack.c.l.bf16 %v455_v60 }
  0x7b   : > { %v1344_v10 = vunpack.c.l.bf16 %v1328_v4  ;;  %v580_v13 = vrot.slane %v578_v50, 7  ;;  %v692_v11 = vunpack.c.h.bf16 %v455_v60  ;;  %v485_v25 = vunpack.c.l.b16 %v5884_v0 }
  0x7c   : > { %1576 = vadd.xlane.f32.xlu1 %v1575_v54  ;;  %v655_v35 = vsel %vm5565_vm3, 0, %v576_v40  ;;  %v707_v27 = vmul.f32 0.00390625, %v691_v26  ;;  %v1196_v28 = vadd.f32 %v1178_v45, %v1177_v61  ;;  %v1282_v21 = vadd.f32 %v1264_v39, %v1263_v38 }
  0x7d   : > { %v583_v29 = vor.u32 %v581_v8, %v580_v13  ;;  %v675_v34 = vsel %vm5570_vm5, %v655_v35, 0  ;;  %v708_v16 = vmul.f32 0.00390625, %v692_v11  ;;  %v486_v23 = vunpack.c.h.b16 %v5884_v0 }
  0x7e   : > { %v5891_v14 = vunpack.c.l.bf16 %v675_v34  ;;  %v835_v19 = vunpack.c.h.bf16 %v675_v34  ;;  %v1362_v20 = vadd.f32 %v1344_v10, %v1343_v9  ;;  %v5896_v18 = vpack.c.b16 %v485_v25, %v485_v25 }
  0x7f   : > { %1123 = vadd.xlane.f32.xlu2 %v1122_v63  ;;  %v656_v17 = vsel %vm5565_vm3, 0, %v583_v29  ;;  %v719_v32 = vpack.c.bf16 %v708_v16, %v707_v27  ;;  %v502_v34 = vpack.c.b16 %v486_v23, %v486_v23 }
  0x80   : > { %v676_v37 = vsel %vm5570_vm5, %v656_v17, 0  ;;  %v899_v59 = vrot.slane %v5891_v14, 1  ;;  %v900_v36 = vrot.slane %v835_v19, 1  ;;  %v1383_v41 = vmul.f32 %v5891_v14, %v5820_v56 }
  0x81   : > { %v5903_v57 = vunpack.c.l.bf16 %v676_v37  ;;  %v836_v47 = vunpack.c.h.bf16 %v676_v37  ;;  %v1032_v44 = vrot.slane %v5891_v14, 2  ;;  %v1033_v46 = vrot.slane %v835_v19, 2 }
  0x82   : > { %1197 = vadd.xlane.f32.xlu0 %v1196_v28  ;;  %v5907_v62 = vsel %vm871_vm7, %v899_v59, %v900_v36  ;;  %v1399_v51 = vpack.c.bf16 %v1383_v41, %v1383_v41  ;;  %v5909_v30 = vunpack.c.l.bf16 %v719_v32  ;;  %v5911_v49 = vunpack.c.h.bf16 %v719_v32 }
  0x83   : > { %v902_v52 = vrot.slane %v5903_v57, 1  ;;  %v903_v53 = vrot.slane %v836_v47, 1  ;;  %v1455_v54 = vmul.f32 %v5907_v62, %v5820_v56  ;;  %v1384_v38 = vmul.f32 %v5903_v57, %v5825_v43 }
  0x84   : > { %1283 = vadd.xlane.f32.xlu1 %v1282_v21  ;;  %v1415_v55 = vunpack.c.l.bf16 %v1399_v51  ;;  %v5919_v58 = vsel %vm1004_vm6, %v1032_v44, %v1033_v46  ;;  %v1035_v60 = vrot.slane %v5903_v57, 2  ;;  %v1036_v63 = vrot.slane %v836_v47, 2 }
  0x85   : > { %v5923_v61 = vsel %vm871_vm7, %v902_v52, %v903_v53  ;;  %v1471_v33 = vpack.c.bf16 %v1455_v54, %v1455_v54  ;;  %v1400_v1 = vpack.c.bf16 %v1384_v38, %v1384_v38  ;;  %v1527_v0 = vmul.f32 %v5919_v58, %v5820_v56 }
  0x86   : > { %v1456_v45 = vmul.f32 %v5923_v61, %v5825_v43  ;;  %v5930_v4 = vsel %vm1004_vm6, %v1035_v60, %v1036_v63  ;;  %v940_v50 = vmul.f32 %v5833_v48, %v5909_v30  ;;  %v941_v8 = vmul.f32 %v5839_v42, %v5911_v49 }
  0x87   : > { %1363 = vadd.xlane.f32.xlu2 %v1362_v20  ;;  %v1487_v39 = vunpack.c.l.bf16 %v1471_v33  ;;  %v1416_v9 = vunpack.c.l.bf16 %v1400_v1  ;;  %v1528_v40 = vmul.f32 %v5930_v4, %v5825_v43  ;;  %v1543_v26 = vpack.c.bf16 %v1527_v0, %v1527_v0 }
  0x88   : > { %v1472_v56 = vpack.c.bf16 %v1456_v45, %v1456_v45  ;;  %v956_v10 = vpack.c.bf16 %v940_v50, %v940_v50  ;;  %v957_v13 = vpack.c.bf16 %v941_v8, %v941_v8  ;;  %v762_v11 = vmul.f32 %v5816_v12, %v5909_v30  ;;  %v456_v12 = vld [vmem:[%s5587_s14 + $0x28] sm:$0xff] }
  0x89   : > { %v1434_v25 = vadd.f32 %v1416_v9, %v1415_v55  ;;  %v1544_v35 = vpack.c.bf16 %v1528_v40, %v1528_v40  ;;  %v1559_v27 = vunpack.c.l.bf16 %v1543_v26  ;;  %v763_v48 = vmul.f32 %v5818_v31, %v5911_v49 }
  0x8a   : > { %v1488_v42 = vunpack.c.l.bf16 %v1472_v56  ;;  %v972_v28 = vunpack.c.l.bf16 %v956_v10  ;;  %v778_v29 = vpack.c.bf16 %v762_v11, %v762_v11  ;;  %v1073_v21 = vmul.f32 %v5847_v7, %v5909_v30  ;;  %v5962_v56 = vld [vmem:[%s5596_s18 + $0x30] sm:$0xff] }
  0x8b   : > { %1435 = vadd.xlane.f32.xlu0 %v1434_v25  ;;  %v1560_v43 = vunpack.c.l.bf16 %v1544_v35  ;;  %v779_v16 = vpack.c.bf16 %v763_v48, %v763_v48  ;;  %v1074_v19 = vmul.f32 %v5854_v15, %v5911_v49  ;;  %v973_v17 = vunpack.c.l.bf16 %v957_v13 }
  0x8c   : > { %v1506_v20 = vadd.f32 %v1488_v42, %v1487_v39  ;;  %v794_v32 = vunpack.c.l.bf16 %v778_v29  ;;  %v1233_v31 = vmul.f32 %v5907_v62, %v5909_v30  ;;  %v1089_v36 = vpack.c.bf16 %v1073_v21, %v1073_v21 }
  0x8d   : > { %v1578_v37 = vadd.f32 %v1560_v43, %v1559_v27  ;;  %v795_v59 = vunpack.c.l.bf16 %v779_v16  ;;  %v1090_v23 = vpack.c.bf16 %v1074_v19, %v1074_v19  ;;  %v1234_v41 = vmul.f32 %v5923_v61, %v5911_v49 }
  0x8e   : > { %1507 = vadd.xlane.f32.xlu1 %v1506_v20  ;;  %v1147_v7 = vmul.f32 %v5891_v14, %v5909_v30  ;;  %v1148_v15 = vmul.f32 %v5903_v57, %v5911_v49  ;;  %v693_v47 = vunpack.c.l.bf16 %v456_v12  ;;  %v1105_v46 = vunpack.c.l.bf16 %v1089_v36  ;;  %v5312_v20 = vld [vmem:[%s7638_s4 + $0x78] sm:$0xff] }
  0x8f   : > { %1579 = vadd.xlane.f32.xlu2 %v1578_v37  ;;  %v814_v44 = vadd.f32 %v795_v59, %v794_v32  ;;  %v1106_v51 = vunpack.c.l.bf16 %v1090_v23  ;;  %v1313_v52 = vmul.f32 %v5919_v58, %v5909_v30  ;;  %v1249_v53 = vpack.c.bf16 %v1233_v31, %v1233_v31  ;;  %1890 = vmatpush.bf16.msra.mxu1 %v5312_v20 }
  0x90   : > { %v1250_v54 = vpack.c.bf16 %v1234_v41, %v1234_v41  ;;  %v1163_v38 = vpack.c.bf16 %v1147_v7, %v1147_v7  ;;  %v1164_v55 = vpack.c.bf16 %v1148_v15, %v1148_v15  ;;  %v992_v60 = vadd.f32 %v973_v17, %v972_v28 }
  0x91   : > { %v1314_v63 = vmul.f32 %v5930_v4, %v5911_v49  ;;  %v585_v33 = vshrl.u32 %v5896_v18, 16  ;;  %v694_v1 = vunpack.c.h.bf16 %v456_v12  ;;  %v1125_v0 = vadd.f32 %v1106_v51, %v1105_v46  ;;  %v5304_v12 = vld [vmem:[%s7638_s4 + $0x38] sm:$0xff] }
  0x92   : > { %v1179_v45 = vunpack.c.l.bf16 %v1163_v38  ;;  %v1329_v50 = vpack.c.bf16 %v1313_v52, %v1313_v52  ;;  %v588_v8 = vshll.u32 %v5896_v18, 16  ;;  %v1180_v39 = vunpack.c.l.bf16 %v1164_v55  ;;  %1861 = vmatpush.bf16.msra.mxu0 %v5304_v12  ;;  %v5303_v52 = vld [vmem:[%s7638_s4 + $0x30] sm:$0xff] }
  0x93   : > { %815 = vadd.xlane.f32.xlu0 %v814_v44  ;;  %v1330_v9 = vpack.c.bf16 %v1314_v63, %v1314_v63  ;;  %v587_v40 = vrot.slane %v585_v33, 7  ;;  %v592_v26 = vshrl.u32 %v502_v34, 16  ;;  %v1265_v10 = vunpack.c.l.bf16 %v1249_v53 }
  0x94   : > { %v1266_v13 = vunpack.c.l.bf16 %v1250_v54  ;;  %v595_v11 = vshll.u32 %v502_v34, 16  ;;  %v709_v25 = vmul.f32 0.00390625, %v693_v47  ;;  %v710_v48 = vmul.f32 0.00390625, %v694_v1 }
  0x95   : > { %v590_v35 = vor.u32 %v588_v8, %v587_v40  ;;  %v594_v27 = vrot.slane %v592_v26, 7  ;;  %v1345_v42 = vunpack.c.l.bf16 %v1329_v50  ;;  %v1346_v28 = vunpack.c.l.bf16 %v1330_v9 }
  0x96   : > { %993 = vadd.xlane.f32.xlu1 %v992_v60  ;;  %v487_v29 = vunpack.c.l.b16 %v5962_v56  ;;  %v1199_v18 = vadd.f32 %v1180_v39, %v1179_v45  ;;  %v720_v21 = vpack.c.bf16 %v710_v48, %v709_v25  ;;  %v1285_v19 = vadd.f32 %v1266_v13, %v1265_v10  ;;  %1862 = vmatpush.bf16.msra.mxu0 %v5303_v52 }
  0x97   : > { %1126 = vadd.xlane.f32.xlu2 %v1125_v0  ;;  %v597_v43 = vor.u32 %v595_v11, %v594_v27  ;;  %v657_v16 = vsel %vm5565_vm3, 0, %v590_v35  ;;  %v1365_v59 = vadd.f32 %v1346_v28, %v1345_v42 }
  0x98   : > { %v677_v34 = vsel %vm5570_vm5, %v657_v16, 0  ;;  %v5979_v37 = vunpack.c.l.bf16 %v720_v21  ;;  %v5985_v41 = vunpack.c.h.bf16 %v720_v21  ;;  %v5987_v7 = vpack.c.b16 %v487_v29, %v487_v29 }
  0x99   : > { %v658_v17 = vsel %vm5565_vm3, 0, %v597_v43  ;;  %v5977_v32 = vunpack.c.l.bf16 %v677_v34  ;;  %v837_v31 = vunpack.c.h.bf16 %v677_v34  ;;  %v5302_v34 = vld [vmem:[%s7638_s4 + $0x28] sm:$0xff] }
  0x9a   : > { %v678_v36 = vsel %vm5570_vm5, %v658_v17, 0  ;;  %v5983_v23 = vpop.xlane.xlu1 %1114  ;;  %v5992_v51 = vpop.xlane.xlu0 %803  ;;  %v764_v54 = vmul.f32 %v5891_v14, %v5979_v37  ;;  %v765_v38 = vmul.f32 %v5903_v57, %v5985_v41  ;;  %v942_v29 = vmul.f32 %v5907_v62, %v5979_v37  ;;  %1863 = vmatpush.bf16.msra.mxu0 %v5302_v34 }
  0x9b   : > { %1200 = vadd.xlane.f32.xlu0 %v1199_v18  ;;  %v5989_v15 = vunpack.c.l.bf16 %v678_v36  ;;  %v838_v47 = vunpack.c.h.bf16 %v678_v36  ;;  %v905_v44 = vrot.slane %v5977_v32, 1  ;;  %v906_v46 = vrot.slane %v837_v31, 1  ;;  %v5311_v18 = vld [vmem:[%s7638_s4 + $0x70] sm:$0xff] }
  0x9c   : > { %v1385_v53 = vmul.f32 %v5977_v32, %v5909_v30  ;;  %v1038_v55 = vrot.slane %v5977_v32, 2  ;;  %v780_v14 = vpack.c.bf16 %v764_v54, %v764_v54  ;;  %v781_v50 = vpack.c.bf16 %v765_v38, %v765_v38  ;;  %1891 = vmatpush.bf16.msra.mxu1 %v5311_v18  ;;  %v5301_v38 = vld [vmem:[%s7638_s4 + $0x20] sm:$0xff] }
  0x9d   : > { %v6005_v60 = vsel %vm871_vm7, %v905_v44, %v906_v46  ;;  %v908_v63 = vrot.slane %v5989_v15, 1  ;;  %v909_v33 = vrot.slane %v838_v47, 1  ;;  %v1386_v1 = vmul.f32 %v5989_v15, %v5911_v49 }
  0x9e   : > { %1286 = vadd.xlane.f32.xlu1 %v1285_v19  ;;  %v1457_v0 = vmul.f32 %v6005_v60, %v5909_v30  ;;  %v1401_v45 = vpack.c.bf16 %v1385_v53, %v1385_v53  ;;  %v1039_v39 = vrot.slane %v837_v31, 2  ;;  %v1041_v9 = vrot.slane %v5989_v15, 2  ;;  %1864 = vmatpush.bf16.msra.mxu0 %v5301_v38 }
  0x9f   : > { %1366 = vadd.xlane.f32.xlu2 %v1365_v59  ;;  %v6013_v57 = vsel %vm871_vm7, %v908_v63, %v909_v33  ;;  %v1402_v8 = vpack.c.bf16 %v1386_v1, %v1386_v1  ;;  %v796_v13 = vunpack.c.l.bf16 %v780_v14  ;;  %v797_v25 = vunpack.c.l.bf16 %v781_v50  ;;  %v5310_v59 = vld [vmem:[%s7638_s4 + $0x68] sm:$0xff] }
  0xa0   : > { %v1458_v40 = vmul.f32 %v6013_v57, %v5911_v49  ;;  %v1473_v26 = vpack.c.bf16 %v1457_v0, %v1457_v0  ;;  %v1417_v10 = vunpack.c.l.bf16 %v1401_v45  ;;  %v6019_v35 = vsel %vm1004_vm6, %v1038_v55, %v1039_v39  ;;  %1892 = vmatpush.bf16.msra.mxu1 %v5310_v59  ;;  %v5299_v59 = vld [vmem:[%s7638_s4 + $0x10] sm:$0xff] }
  0xa1   : > { %v1418_v11 = vunpack.c.l.bf16 %v1402_v8  ;;  %v1042_v27 = vrot.slane %v838_v47, 2  ;;  %v1529_v28 = vmul.f32 %v6019_v35, %v5909_v30  ;;  %v817_v16 = vadd.f32 %v797_v25, %v796_v13 }
  0xa2   : > { %v1474_v48 = vpack.c.bf16 %v1458_v40, %v1458_v40  ;;  %v1489_v42 = vunpack.c.l.bf16 %v1473_v26  ;;  %v943_v19 = vmul.f32 %v5923_v61, %v5985_v41  ;;  %v958_v20 = vpack.c.bf16 %v942_v29, %v942_v29  ;;  %v6045_v36 = vpop.xlane.xlu0 %981  ;;  %v5309_v26 = vld [vmem:[%s7638_s4 + $0x60] sm:$0xff]  ;;  %v5308_v29 = vld [vmem:[%s7638_s4 + $0x58] sm:$0xff] }
  0xa3   : > { %v1437_v43 = vadd.f32 %v1418_v11, %v1417_v10  ;;  %v6029_v21 = vsel %vm1004_vm6, %v1041_v9, %v1042_v27  ;;  %v1545_v12 = vpack.c.bf16 %v1529_v28, %v1529_v28  ;;  %v1075_v47 = vmul.f32 %v5919_v58, %v5979_v37  ;;  %v5300_v27 = vld [vmem:[%s7638_s4 + $0x18] sm:$0xff] }
  0xa4   : > { %v1490_v30 = vunpack.c.l.bf16 %v1474_v48  ;;  %v1530_v62 = vmul.f32 %v6029_v21, %v5911_v49  ;;  %v959_v61 = vpack.c.bf16 %v943_v19, %v943_v19  ;;  %v1076_v49 = vmul.f32 %v5930_v4, %v5985_v41  ;;  %1893 = vmatpush.bf16.msra.mxu1 %v5309_v26  ;;  %1865 = vmatpush.bf16.msra.mxu0 %v5300_v27 }
  0xa5   : > { %v6038_v17 = vpop.xlane.xlu2 %1188  ;;  %v6040_v31 = vpop.xlane.xlu1 %806  ;;  %1438 = vadd.xlane.f32.xlu0 %v1437_v43  ;;  %v488_v44 = vunpack.c.h.b16 %v5962_v56  ;;  %v974_v53 = vunpack.c.l.bf16 %v958_v20  ;;  %v599_v54 = vshrl.u32 %v5987_v7, 16  ;;  %v1561_v55 = vunpack.c.l.bf16 %v1545_v12 }
  0xa6   : > { %v1509_v46 = vadd.f32 %v1490_v30, %v1489_v42  ;;  %v1546_v52 = vpack.c.bf16 %v1530_v62, %v1530_v62  ;;  %v975_v63 = vunpack.c.l.bf16 %v959_v61  ;;  %v1091_v33 = vpack.c.bf16 %v1075_v47, %v1075_v47  ;;  %v457_v30 = vld [vmem:[%s5587_s14 + $0x30] sm:$0xff] }
  0xa7   : > { %818 = vadd.xlane.f32.xlu2 %v817_v16  ;;  %v1092_v58 = vpack.c.bf16 %v1076_v49, %v1076_v49  ;;  %v1235_v4 = vmul.f32 %v6005_v60, %v5979_v37  ;;  %v1236_v56 = vmul.f32 %v6013_v57, %v5985_v41  ;;  %v1149_v0 = vmul.f32 %v5977_v32, %v5979_v37 }
  0xa8   : > { %1510 = vadd.xlane.f32.xlu1 %v1509_v46  ;;  %v1562_v1 = vunpack.c.l.bf16 %v1546_v52  ;;  %v995_v45 = vadd.f32 %v975_v63, %v974_v53  ;;  %v1107_v14 = vunpack.c.l.bf16 %v1091_v33  ;;  %v1150_v8 = vmul.f32 %v5989_v15, %v5985_v41  ;;  %1894 = vmatpush.bf16.msra.mxu1 %v5308_v29 }
  0xa9   : > { %v1108_v50 = vunpack.c.l.bf16 %v1092_v58  ;;  %v1251_v39 = vpack.c.bf16 %v1235_v4, %v1235_v4  ;;  %v1165_v9 = vpack.c.bf16 %v1149_v0, %v1149_v0  ;;  %v504_v40 = vpack.c.b16 %v488_v44, %v488_v44  ;;  %1866 = vmatpush.bf16.msra.mxu0 %v5299_v59 }
  0xaa   : > { %v1252_v13 = vpack.c.bf16 %v1236_v56, %v1236_v56  ;;  %v1166_v11 = vpack.c.bf16 %v1150_v8, %v1150_v8  ;;  %v1315_v25 = vmul.f32 %v6019_v35, %v5979_v37  ;;  %v1581_v48 = vadd.f32 %v1562_v1, %v1561_v55  ;;  %v5307_v1 = vld [vmem:[%s7638_s4 + $0x50] sm:$0xff] }
  0xab   : > { %v1128_v10 = vadd.f32 %v1108_v50, %v1107_v14  ;;  %v1316_v28 = vmul.f32 %v6029_v21, %v5985_v41  ;;  %v1181_v18 = vunpack.c.l.bf16 %v1165_v9  ;;  %v601_v34 = vrot.slane %v599_v54, 7  ;;  %v5306_v9 = vld [vmem:[%s7638_s4 + $0x48] sm:$0xff] }
  0xac   : > { %v1182_v43 = vunpack.c.l.bf16 %v1166_v11  ;;  %v1331_v19 = vpack.c.bf16 %v1315_v25, %v1315_v25  ;;  %v602_v12 = vshll.u32 %v5987_v7, 16  ;;  %v606_v20 = vshrl.u32 %v504_v40, 16  ;;  %1895 = vmatpush.bf16.msra.mxu1 %v5307_v1 }
  0xad   : > { %v6072_v42 = vpop.xlane.xlu2 %1191  ;;  %996 = vadd.xlane.f32.xlu0 %v995_v45  ;;  %v6079_v16 = vpop.xlane.xlu1 %1274  ;;  %v1332_v62 = vpack.c.bf16 %v1316_v28, %v1316_v28  ;;  %v1267_v61 = vunpack.c.l.bf16 %v1251_v39  ;;  %v1268_v47 = vunpack.c.l.bf16 %v1252_v13  ;;  %v609_v46 = vshll.u32 %v504_v40, 16  ;;  %v5298_v45 = vld [vmem:[%s7638_s4 + $0x8] sm:$0xff] }
  0xae   : > { %v1347_v44 = vunpack.c.l.bf16 %v1331_v19  ;;  %v604_v53 = vor.u32 %v602_v12, %v601_v34  ;;  %v608_v54 = vrot.slane %v606_v20, 7  ;;  %v695_v38 = vunpack.c.l.bf16 %v457_v30  ;;  %1867 = vmatpush.bf16.msra.mxu0 %v5298_v45 }
  0xaf   : > { %1129 = vadd.xlane.f32.xlu2 %v1128_v10  ;;  %v1348_v52 = vunpack.c.l.bf16 %v1332_v62  ;;  %v1202_v7 = vadd.f32 %v1182_v43, %v1181_v18  ;;  %v696_v55 = vunpack.c.h.bf16 %v457_v30  ;;  %v1288_v14 = vadd.f32 %v1268_v47, %v1267_v61 }
  0xb0   : > { %v6086_v49 = vpop.xlane.xlu0 %1117  ;;  %1582 = vadd.xlane.f32.xlu1 %v1581_v48  ;;  %v611_v63 = vor.u32 %v609_v46, %v608_v54  ;;  %v659_v33 = vsel %vm5565_vm3, 0, %v604_v53  ;;  %v711_v58 = vmul.f32 0.00390625, %v695_v38  ;;  %v5297_v48 = vld [vmem:[%s7638_s4] sm:$0xff]  ;;  %1896 = vmatpush.bf16.msra.mxu1 %v5306_v9 }
  0xb1   : > { %v1368_v4 = vadd.f32 %v1348_v52, %v1347_v44  ;;  %v679_v56 = vsel %vm5570_vm5, %v659_v33, 0  ;;  %v712_v0 = vmul.f32 0.00390625, %v696_v55 }
  0xb2   : > { %v660_v50 = vsel %vm5565_vm3, 0, %v611_v63  ;;  %v6100_v8 = vunpack.c.l.bf16 %v679_v56  ;;  %v839_v39 = vunpack.c.h.bf16 %v679_v56  ;;  %1868 = vmatpush.bf16.msra.mxu0 %v5297_v48 }
  0xb3   : > { %v680_v40 = vsel %vm5570_vm5, %v660_v50, 0  ;;  %v721_v26 = vpack.c.bf16 %v712_v0, %v711_v58 }
  0xb4   : > { %v6107_v10 = vunpack.c.l.bf16 %v680_v40  ;;  %v840_v13 = vunpack.c.h.bf16 %v680_v40  ;;  %v911_v11 = vrot.slane %v6100_v8, 1  ;;  %v912_v25 = vrot.slane %v839_v39, 1 }
  0xb5   : > { %1203 = vadd.xlane.f32.xlu0 %v1202_v7  ;;  %v6110_v27 = vpop.xlane.xlu2 %1426  ;;  %v1387_v28 = vmul.f32 %v6100_v8, %v5979_v37  ;;  %v1044_v43 = vrot.slane %v6100_v8, 2  ;;  %v1045_v19 = vrot.slane %v839_v39, 2  ;;  %v6122_v34 = vunpack.c.l.bf16 %v721_v26 }
  0xb6   : > { %v6125_v30 = vsel %vm871_vm7, %v911_v11, %v912_v25  ;;  %v914_v62 = vrot.slane %v6107_v10, 1  ;;  %v915_v12 = vrot.slane %v840_v13, 1  ;;  %v1388_v20 = vmul.f32 %v6107_v10, %v5985_v41 }
  0xb7   : > { %1369 = vadd.xlane.f32.xlu2 %v1368_v4  ;;  %v6117_v29 = vpop.xlane.xlu1 %1277  ;;  %v1459_v59 = vmul.f32 %v6125_v30, %v5979_v37  ;;  %v1403_v61 = vpack.c.bf16 %v1387_v28, %v1387_v28  ;;  %v6133_v47 = vsel %vm1004_vm6, %v1044_v43, %v1045_v19  ;;  %v1047_v52 = vrot.slane %v6107_v10, 2 }
  0xb8   : > { %v6119_v18 = vpop.xlane.xlu0 %1354  ;;  %1289 = vadd.xlane.f32.xlu1 %v1288_v14  ;;  %v6136_v44 = vsel %vm871_vm7, %v914_v62, %v915_v12  ;;  %v1404_v46 = vpack.c.bf16 %v1388_v20, %v1388_v20  ;;  %v1048_v53 = vrot.slane %v840_v13, 2  ;;  %v1531_v55 = vmul.f32 %v6133_v47, %v5979_v37  ;;  %v466_v14 = vld [vmem:[%s5596_s18 + $0x38] sm:$0xff]  ;;  %s446_s18 = scalar_lea.vmem %s7637_s3, %s4754_s27 }
  0xb9   : > { %v1460_v54 = vmul.f32 %v6136_v44, %v5985_v41  ;;  %v1475_v38 = vpack.c.bf16 %v1459_v59, %v1459_v59  ;;  %v1419_v7 = vunpack.c.l.bf16 %v1403_v61  ;;  %v6146_v58 = vunpack.c.h.bf16 %v721_v26 }
  0xba   : > { %v1420_v63 = vunpack.c.l.bf16 %v1404_v46  ;;  %v6144_v33 = vsel %vm1004_vm6, %v1047_v52, %v1048_v53  ;;  %v944_v1 = vmul.f32 %v6005_v60, %v6122_v34  ;;  %v1547_v45 = vpack.c.bf16 %v1531_v55, %v1531_v55 }
  0xbb   : > { %v1476_v4 = vpack.c.bf16 %v1460_v54, %v1460_v54  ;;  %v1491_v56 = vunpack.c.l.bf16 %v1475_v38  ;;  %v1532_v0 = vmul.f32 %v6144_v33, %v5985_v41  ;;  %v945_v37 = vmul.f32 %v6013_v57, %v6146_v58  ;;  %v5305_v57 = vld [vmem:[%s7638_s4 + $0x40] sm:$0xff] }
  0xbc   : > { %v1440_v50 = vadd.f32 %v1420_v63, %v1419_v7  ;;  %v960_v39 = vpack.c.bf16 %v944_v1, %v944_v1  ;;  %v766_v9 = vmul.f32 %v5977_v32, %v6122_v34  ;;  %v1563_v13 = vunpack.c.l.bf16 %v1547_v45  ;;  %1897 = vmatpush.bf16.msra.mxu1 %v5305_v57 }
  0xbd   : > { %v1492_v40 = vunpack.c.l.bf16 %v1476_v4  ;;  %v1548_v26 = vpack.c.bf16 %v1532_v0, %v1532_v0  ;;  %v767_v60 = vmul.f32 %v5989_v15, %v6146_v58  ;;  %v961_v11 = vpack.c.bf16 %v945_v37, %v945_v37 }
  0xbe   : > { %1441 = vadd.xlane.f32.xlu0 %v1440_v50  ;;  %v782_v25 = vpack.c.bf16 %v766_v9, %v766_v9  ;;  %v489_v28 = vunpack.c.l.b16 %v466_v14  ;;  %v490_v43 = vunpack.c.h.b16 %v466_v14  ;;  %v976_v62 = vunpack.c.l.bf16 %v960_v39 }
  0xbf   : > { %v6159_v41 = vpop.xlane.xlu1 %1498  ;;  %v1512_v32 = vadd.f32 %v1492_v40, %v1491_v56  ;;  %v1564_v19 = vunpack.c.l.bf16 %v1548_v26  ;;  %v783_v12 = vpack.c.bf16 %v767_v60, %v767_v60  ;;  %v977_v15 = vunpack.c.l.bf16 %v961_v11 }
  0xc0   : > { %v6161_v48 = vpop.xlane.xlu0 %1357  ;;  %v798_v59 = vunpack.c.l.bf16 %v782_v25  ;;  %v1077_v61 = vmul.f32 %v6019_v35, %v6122_v34  ;;  %v1078_v46 = vmul.f32 %v6029_v21, %v6146_v58  ;;  %v1237_v54 = vmul.f32 %v6125_v30, %v6122_v34 }
  0xc1   : > { %1513 = vadd.xlane.f32.xlu1 %v1512_v32  ;;  %v1584_v52 = vadd.f32 %v1564_v19, %v1563_v13  ;;  %v799_v53 = vunpack.c.l.bf16 %v783_v12  ;;  %v1238_v38 = vmul.f32 %v6136_v44, %v6146_v58  ;;  %v1151_v63 = vmul.f32 %v6100_v8, %v6122_v34  ;;  %v5290_v12 = vld [vmem:[%s5587_s14 + $0x4] sm:$0xf0] }
  0xc2   : > { %v6166_v20 = vpop.xlane.xlu2 %1429  ;;  %v1093_v7 = vpack.c.bf16 %v1077_v61, %v1077_v61  ;;  %v1094_v55 = vpack.c.bf16 %v1078_v46, %v1078_v46  ;;  %v505_v1 = vpack.c.b16 %v489_v28, %v489_v28  ;;  %v998_v35 = vadd.f32 %v977_v15, %v976_v62  ;;  %v4757_v62 = vld [vmem:[%s5587_s14] sm:$0xf]  ;;  %v5289_v61 = vld [vmem:[%s5587_s14 + $0x4] sm:$0xf]  ;;  %v4759_v46 = vld [vmem:[%s5587_s14 + $0x8] sm:$0xf0] }
  0xc3   : > { %1585 = vadd.xlane.f32.xlu2 %v1584_v52  ;;  %v820_v4 = vadd.f32 %v799_v53, %v798_v59  ;;  %v1152_v21 = vmul.f32 %v6107_v10, %v6146_v58  ;;  %v1167_v45 = vpack.c.bf16 %v1151_v63, %v1151_v63  ;;  %v1317_v14 = vmul.f32 %v6133_v47, %v6122_v34 }
  0xc4   : > { %v1109_v56 = vunpack.c.l.bf16 %v1093_v7  ;;  %v1110_v0 = vunpack.c.l.bf16 %v1094_v55  ;;  %v1253_v50 = vpack.c.bf16 %v1237_v54, %v1237_v54  ;;  %v1254_v37 = vpack.c.bf16 %v1238_v38, %v1238_v38  ;;  %v458_v7 = vld [vmem:[%s5587_s14 + $0x38] sm:$0xff] }
  0xc5   : > { %v1168_v39 = vpack.c.bf16 %v1152_v21, %v1152_v21  ;;  %v1318_v9 = vmul.f32 %v6144_v33, %v6146_v58  ;;  %v1183_v40 = vunpack.c.l.bf16 %v1167_v45  ;;  %v506_v26 = vpack.c.b16 %v490_v43, %v490_v43 }
  0xc6   : > { %821 = vadd.xlane.f32.xlu0 %v820_v4  ;;  %v613_v13 = vshrl.u32 %v505_v1, 16  ;;  %v1131_v60 = vadd.f32 %v1110_v0, %v1109_v56  ;;  %v1333_v28 = vpack.c.bf16 %v1317_v14, %v1317_v14  ;;  %v1269_v15 = vunpack.c.l.bf16 %v1253_v50 }
  0xc7   : > { %v1184_v11 = vunpack.c.l.bf16 %v1168_v39  ;;  %v1334_v57 = vpack.c.bf16 %v1318_v9, %v1318_v9  ;;  %v1270_v59 = vunpack.c.l.bf16 %v1254_v37  ;;  %v616_v54 = vshll.u32 %v505_v1, 16 }
  0xc8   : > { %v6184_v32 = vpop.xlane.xlu1 %1501  ;;  %v6186_v19 = vpop.xlane.xlu0 %1570  ;;  %v615_v43 = vrot.slane %v613_v13, 7  ;;  %v620_v38 = vshrl.u32 %v506_v26, 16  ;;  %v1349_v55 = vunpack.c.l.bf16 %v1333_v28  ;;  %v623_v4 = vshll.u32 %v506_v26, 16  ;;  %v5292_v28 = vld [vmem:[%s5587_s14 + $0x14] sm:$0xf0] }
  0xc9   : > { %999 = vadd.xlane.f32.xlu1 %v998_v35  ;;  %v1205_v52 = vadd.f32 %v1184_v11, %v1183_v40  ;;  %v1350_v63 = vunpack.c.l.bf16 %v1334_v57  ;;  %v4758_v21 = vor.u32 %v5290_v12, %v4757_v62  ;;  %v4762_v0 = vor.u32 %v5289_v61, %v4759_v46 }
  0xca   : > { %v985_v25 = vpop.xlane.xlu2 %984  ;;  %v618_v56 = vor.u32 %v616_v54, %v615_v43  ;;  %v622_v35 = vrot.slane %v620_v38, 7  ;;  %v1291_v45 = vadd.f32 %v1270_v59, %v1269_v15  ;;  %v697_v50 = vunpack.c.l.bf16 %v458_v7 }
  0xcb   : > { %v1595_v53 = vsel %vm1593_vm8, %v6040_v31, %v985_v25  ;;  %1132 = vadd.xlane.f32.xlu2 %v1131_v60  ;;  %1869 = vmatmul.bf16.vlgmr.msra.gmra.mxu0 %v4758_v21  ;;  %v698_v37 = vunpack.c.h.bf16 %v458_v7  ;;  %v1594_v31 = vsel %vm1593_vm8, %v5992_v51, %v6045_v36  ;;  %v1371_v9 = vadd.f32 %v1350_v63, %v1349_v55  ;;  %v4765_v25 = vld [vmem:[%s5587_s14 + $0x10] sm:$0xf] }
  0xcc   : > { %v1604_v14 = vsel %vm1602_vm9, %v1595_v53, %v6086_v49  ;;  %v625_v1 = vor.u32 %v623_v4, %v622_v35  ;;  %v661_v39 = vsel %vm5565_vm3, 0, %v618_v56  ;;  %1898 = vmatmul.bf16.vlgmr.msra.gmra.mxu1 %v4762_v0  ;;  %v713_v26 = vmul.f32 0.00390625, %v697_v50 }
  0xcd   : > { %v681_v49 = vsel %vm5570_vm5, %v661_v39, 0  ;;  %v714_v13 = vmul.f32 0.00390625, %v698_v37  ;;  %v1613_v60 = vsel %vm1611_vm10, %v1604_v14, %v6072_v42  ;;  %v6216_v57 = vsel %vm1602_vm9, %v1594_v31, %v5983_v23 }
  0xce   : > { %1206 = vadd.xlane.f32.xlu0 %v1205_v52  ;;  %v662_v51 = vsel %vm5565_vm3, 0, %v625_v1  ;;  %v6210_v36 = vunpack.c.l.bf16 %v681_v49  ;;  %v1211_v11 = vunpack.c.h.bf16 %v681_v49  ;;  %v1622_v23 = vsel %vm1620_vm11, %v1613_v60, %v6117_v29 }
  0xcf   : > { %v682_v62 = vsel %vm5570_vm5, %v662_v51, 0  ;;  %v722_v12 = vpack.c.bf16 %v714_v13, %v713_v26  ;;  %v4766_v54 = vor.u32 %v5292_v28, %v4765_v25 }
  0xd0   : > { %v6220_v15 = vunpack.c.l.bf16 %v682_v62  ;;  %v1212_v42 = vunpack.c.h.bf16 %v682_v62  ;;  %v1217_v59 = vrot.slane %v6210_v36, 1  ;;  %v1218_v43 = vrot.slane %v1211_v11, 1 }
  0xd1   : > { %1292 = vadd.xlane.f32.xlu1 %v1291_v45  ;;  %v1389_v52 = vmul.f32 %v6210_v36, %v6122_v34  ;;  %v6231_v53 = vunpack.c.l.bf16 %v722_v12  ;;  %v6241_v21 = vunpack.c.h.bf16 %v722_v12  ;;  %v1297_v45 = vrot.slane %v6210_v36, 2 }
  0xd2   : > { %v6204_v40 = vpop.xlane.xlu2 %1573  ;;  %v6234_v38 = vsel %vm871_vm7, %v1217_v59, %v1218_v43  ;;  %v1220_v7 = vrot.slane %v6220_v15, 1  ;;  %v1221_v55 = vrot.slane %v1212_v42, 1  ;;  %v1390_v63 = vmul.f32 %v6220_v15, %v6146_v58 }
  0xd3   : > { %1372 = vadd.xlane.f32.xlu2 %v1371_v9  ;;  %v1461_v4 = vmul.f32 %v6234_v38, %v6122_v34  ;;  %v1405_v29 = vpack.c.bf16 %v1389_v52, %v1389_v52  ;;  %v768_v56 = vmul.f32 %v6100_v8, %v6231_v53  ;;  %v1298_v14 = vrot.slane %v1211_v11, 2 }
  0xd4   : > { %v6223_v61 = vpop.xlane.xlu1 %987  ;;  %v6246_v35 = vsel %vm871_vm7, %v1220_v7, %v1221_v55  ;;  %v1406_v0 = vpack.c.bf16 %v1390_v63, %v1390_v63  ;;  %v769_v1 = vmul.f32 %v6107_v10, %v6241_v21  ;;  %v1300_v26 = vrot.slane %v6220_v15, 2 }
  0xd5   : > { %v6225_v46 = vpop.xlane.xlu0 %809  ;;  %v1462_v50 = vmul.f32 %v6246_v35, %v6146_v58  ;;  %v1477_v37 = vpack.c.bf16 %v1461_v4, %v1461_v4  ;;  %v1421_v31 = vunpack.c.l.bf16 %v1405_v29  ;;  %v784_v49 = vpack.c.bf16 %v768_v56, %v768_v56 }
  0xd6   : > { %v1422_v9 = vunpack.c.l.bf16 %v1406_v0  ;;  %v6256_v8 = vsel %vm1004_vm6, %v1297_v45, %v1298_v14  ;;  %v785_v51 = vpack.c.bf16 %v769_v1, %v769_v1  ;;  %v1301_v11 = vrot.slane %v1212_v42, 2  ;;  %v5291_v0 = vld [vmem:[%s5587_s14 + $0x14] sm:$0xf]  ;;  %v4767_v45 = vld [vmem:[%s5587_s14 + $0x18] sm:$0xf0] }
  0xd7   : > { %v1478_v13 = vpack.c.bf16 %v1462_v50, %v1462_v50  ;;  %v1493_v60 = vunpack.c.l.bf16 %v1477_v37  ;;  %v800_v28 = vunpack.c.l.bf16 %v784_v49  ;;  %v1533_v62 = vmul.f32 %v6256_v8, %v6122_v34 }
  0xd8   : > { %v1443_v25 = vadd.f32 %v1422_v9, %v1421_v31  ;;  %v946_v10 = vmul.f32 %v6125_v30, %v6231_v53  ;;  %v801_v52 = vunpack.c.l.bf16 %v785_v51  ;;  %v1302_v7 = vsel %vm1004_vm6, %v1300_v26, %v1301_v11 }
  0xd9   : > { %v1494_v43 = vunpack.c.l.bf16 %v1478_v13  ;;  %v947_v42 = vmul.f32 %v6136_v44, %v6241_v21  ;;  %v1534_v34 = vmul.f32 %v1302_v7, %v6146_v58  ;;  %v1549_v55 = vpack.c.bf16 %v1533_v62, %v1533_v62 }
  0xda   : > { %v6253_v39 = vpop.xlane.xlu2 %1120  ;;  %1444 = vadd.xlane.f32.xlu0 %v1443_v25  ;;  %v962_v63 = vpack.c.bf16 %v946_v10, %v946_v10  ;;  %v1631_v30 = vsel %vm1629_vm12, %v1622_v23, %v6161_v48  ;;  %v823_v29 = vadd.f32 %v801_v52, %v800_v28  ;;  %v1079_v44 = vmul.f32 %v6133_v47, %v6231_v53 }
  0xdb   : > { %v1515_v4 = vadd.f32 %v1494_v43, %v1493_v60  ;;  %v963_v56 = vpack.c.bf16 %v947_v42, %v947_v42  ;;  %1874 = vmatmul.bf16.gmra.mxu0 %v4766_v54  ;;  %v1550_v14 = vpack.c.bf16 %v1534_v34, %v1534_v34  ;;  %v1565_v50 = vunpack.c.l.bf16 %v1549_v55  ;;  %v4773_v55 = vld [vmem:[%s5587_s14 + $0x20] sm:$0xf] }
  0xdc   : > { %v6263_v12 = vpop.xlane.xlu1 %1280  ;;  %v978_v37 = vunpack.c.l.bf16 %v962_v63  ;;  %824 = vadd.xlane.f32.xlu2 %v823_v29  ;;  %v1080_v31 = vmul.f32 %v6144_v33, %v6241_v21  ;;  %v1153_v48 = vmul.f32 %v6210_v36, %v6231_v53  ;;  %v1154_v23 = vmul.f32 %v6220_v15, %v6241_v21 }
  0xdd   : > { %v6265_v59 = vpop.xlane.xlu0 %1194  ;;  %1516 = vadd.xlane.f32.xlu1 %v1515_v4  ;;  %v979_v58 = vunpack.c.l.bf16 %v963_v56  ;;  %v1566_v1 = vunpack.c.l.bf16 %v1550_v14  ;;  %v1095_v9 = vpack.c.bf16 %v1079_v44, %v1079_v44  ;;  %v4770_v49 = vor.u32 %v5291_v0, %v4767_v45 }
  0xde   : > { %v1640_v47 = vsel %vm1638_vm13, %v1631_v30, %v6166_v20  ;;  %v1096_v13 = vpack.c.bf16 %v1080_v31, %v1080_v31  ;;  %v1596_v33 = vsel %vm1593_vm8, %v6225_v46, %v6223_v61  ;;  %v1169_v36 = vpack.c.bf16 %v1153_v48, %v1153_v48  ;;  %v4775_v31 = vld [vmem:[%s5587_s14 + $0x28] sm:$0xf0] }
  0xdf   : > { %v1001_v26 = vadd.f32 %v979_v58, %v978_v37  ;;  %v1111_v60 = vunpack.c.l.bf16 %v1095_v9  ;;  %1903 = vmatmul.bf16.gmra.mxu1 %v4770_v49  ;;  %v1239_v15 = vmul.f32 %v6234_v38, %v6231_v53  ;;  %v1612_v11 = vsel %vm1611_vm10, %v6216_v57, %v6038_v17 }
  0xe0   : > { %v1587_v25 = vadd.f32 %v1566_v1, %v1565_v50  ;;  %v1112_v20 = vunpack.c.l.bf16 %v1096_v13  ;;  %v1170_v28 = vpack.c.bf16 %v1154_v23, %v1154_v23  ;;  %v1621_v61 = vsel %vm1620_vm11, %v1612_v11, %v6079_v16 }
  0xe1   : > { %v1240_v62 = vmul.f32 %v6246_v35, %v6241_v21  ;;  %v1255_v38 = vpack.c.bf16 %v1239_v15, %v1239_v15  ;;  %v1630_v10 = vsel %vm1629_vm12, %v1621_v61, %v6119_v18  ;;  %v1649_v17 = vsel %vm1647_vm14, %v1640_v47, %v6184_v32  ;;  %v5294_v35 = vld [vmem:[%s5587_s14 + $0x24] sm:$0xf0] }
  0xe2   : > { %v6283_v54 = vpop.xlane.xlu2 %1360  ;;  %1002 = vadd.xlane.f32.xlu0 %v1001_v26  ;;  %v1605_v57 = vsel %vm1602_vm9, %v1596_v33, %v6253_v39  ;;  %v1134_v43 = vadd.f32 %v1112_v20, %v1111_v60  ;;  %v1185_v52 = vunpack.c.l.bf16 %v1169_v36  ;;  %v1319_v42 = vmul.f32 %v6256_v8, %v6231_v53 }
  0xe3   : > { %v1256_v16 = vpack.c.bf16 %v1240_v62, %v1240_v62  ;;  %v1320_v34 = vmul.f32 %v1302_v7, %v6241_v21  ;;  %v1186_v63 = vunpack.c.l.bf16 %v1170_v28  ;;  %v1271_v18 = vunpack.c.l.bf16 %v1255_v38 }
  0xe4   : > { %1135 = vadd.xlane.f32.xlu2 %v1134_v43  ;;  %v1391_v32 = vmul.f32 %v5581_v6, %v6231_v53  ;;  %v1392_v39 = vmul.f32 %v5581_v6, %v6241_v21  ;;  %v1639_v8 = vsel %vm1638_vm13, %v1630_v10, %v6110_v27  ;;  %v1614_v7 = vsel %vm1611_vm10, %v1605_v57, %v6265_v59  ;;  %v5293_v27 = vld [vmem:[%s5587_s14 + $0x24] sm:$0xf] }
  0xe5   : > { %v6290_v51 = vpop.xlane.xlu0 %1432  ;;  %1588 = vadd.xlane.f32.xlu1 %v1587_v25  ;;  %v1272_v4 = vunpack.c.l.bf16 %v1256_v16  ;;  %v4774_v29 = vor.u32 %v5294_v35, %v4773_v55  ;;  %v1648_v56 = vsel %vm1647_vm14, %v1639_v8, %v6159_v41  ;;  %v1658_v0 = vsel %vm1656_vm15, %v1649_v17, %v6204_v40 }
  0xe6   : > { %v1335_v45 = vpack.c.bf16 %v1319_v42, %v1319_v42  ;;  %v1336_v14 = vpack.c.bf16 %v1320_v34, %v1320_v34  ;;  %v1208_v6 = vadd.f32 %v1186_v63, %v1185_v52  ;;  %v1407_v44 = vpack.c.bf16 %v1391_v32, %v1391_v32 }
  0xe7   : > { %v6299_v46 = vpop.xlane.xlu1 %1504  ;;  %v1294_v37 = vadd.f32 %v1272_v4, %v1271_v18  ;;  %v1408_v58 = vpack.c.bf16 %v1392_v39, %v1392_v39  ;;  %v1657_v59 = vsel %vm1656_vm15, %v1648_v56, %v6186_v19  ;;  %v1623_v48 = vsel %vm1620_vm11, %v1614_v7, %v6263_v12 }
  0xe8   : > { %vm1666_vm0 = vcmp.gt.f32.partialorder %v1658_v0, 0.0  ;;  %v1674_v23 = vmul.f32 0.1, %v1658_v0  ;;  %v1632_v40 = vsel %vm1629_vm12, %v1623_v48, %v6283_v54  ;;  %v1463_v1 = vmul.f32 %v5603_v24, %v6231_v53 }
  0xe9   : > { %v1351_v9 = vunpack.c.l.bf16 %v1335_v45  ;;  %v1352_v49 = vunpack.c.l.bf16 %v1336_v14  ;;  %v1464_v47 = vmul.f32 %v5603_v24, %v6241_v21  ;;  %v4778_v26 = vor.u32 %v5293_v27, %v4775_v31 }
  0xea   : > { %v6314_v30 = vpop.xlane.xlu2 %812  ;;  %v1423_v19 = vunpack.c.l.bf16 %v1407_v44  ;;  %v1424_v12 = vunpack.c.l.bf16 %v1408_v58  ;;  %v1535_v33 = vmul.f32 %v5599_v22, %v6231_v53  ;;  %v1536_v54 = vmul.f32 %v5599_v22, %v6241_v21 }
  0xeb   : > { %1879 = vmatmul.bf16.gmra.mxu0 %v4774_v29  ;;  %vm1665_vm1 = vcmp.gt.f32.partialorder %v1657_v59, 0.0  ;;  %v1673_v60 = vmul.f32 0.1, %v1657_v59  ;;  %v1682_v36 = vsel %vm1666_vm0, %v1658_v0, %v1674_v23  ;;  %v1641_v15 = vsel %vm1638_vm13, %v1632_v40, %v6290_v51 }
  0xec   : > { %1295 = vadd.xlane.f32.xlu2 %v1294_v37  ;;  %v1374_v24 = vadd.f32 %v1352_v49, %v1351_v9  ;;  %v1479_v11 = vpack.c.bf16 %v1463_v1, %v1463_v1  ;;  %v1446_v20 = vadd.f32 %v1424_v12, %v1423_v19  ;;  %v1480_v28 = vpack.c.bf16 %v1464_v47, %v1464_v47 }
  0xed   : > { %v6328_v50 = vpop.xlane.xlu0 %990  ;;  %1209 = vadd.xlane.f32.xlu1 %v1208_v6  ;;  %v1551_v61 = vpack.c.bf16 %v1535_v33, %v1535_v33  ;;  %v1552_v62 = vpack.c.bf16 %v1536_v54, %v1536_v54  ;;  %v1681_v38 = vsel %vm1665_vm1, %v1657_v59, %v1673_v60  ;;  %v1650_v22 = vsel %vm1647_vm14, %v1641_v15, %v6299_v46 }
  0xee   : > { %v5435_v21 = vpack.i.bf16 %v1682_v36, %v1681_v38  ;;  %v1495_v10 = vunpack.c.l.bf16 %v1479_v11  ;;  %v1496_v17 = vunpack.c.l.bf16 %v1480_v28  ;;  %v1597_v18 = vsel %vm1593_vm8, %v6314_v30, %v6328_v50 }
  0xef   : > { %v1577_v41 = vpop.xlane.xlu1 %1576  ;;  %1908 = vmatmul.bf16.gmra.mxu1 %v4778_v26  ;;  %v1567_v57 = vunpack.c.l.bf16 %v1551_v61  ;;  %v1568_v51 = vunpack.c.l.bf16 %v1552_v62 }
  0xf0   : > { %v1659_v52 = vsel %vm1656_vm15, %v1650_v22, %v1577_v41  ;;  %v1518_v42 = vadd.f32 %v1496_v17, %v1495_v10 }
  0xf1   : > { %v1675_v16 = vmul.f32 0.1, %v1659_v52  ;;  %v1590_v34 = vadd.f32 %v1568_v51, %v1567_v57  ;;  %vm1667_vm2 = vcmp.gt.f32.partialorder %v1659_v52, 0.0  ;;  %v4781_v51 = vld [vmem:[%s5587_s14 + $0x30] sm:$0xf] }
  0xf2   : > { %v1124_v13 = vpop.xlane.xlu2 %1123 }
  0xf3   : > { %v1683_v46 = vsel %vm1667_vm2, %v1659_v52, %v1675_v16  ;;  %v1606_v32 = vsel %vm1602_vm9, %v1597_v18, %v1124_v13  ;;  %v5295_v52 = vld [vmem:[%s5587_s14 + $0x34] sm:$0xf]  ;;  %vm1984_vm2 = vcmask 334848  }
  0xf4   : > { %1447 = vadd.xlane.f32.xlu2 %v1446_v20 }
  0xf5   : > { %v1198_v25 = vpop.xlane.xlu0 %1197  ;;  %1375 = vadd.xlane.f32.xlu1 %v1374_v24 }
  0xf6   : > { %5436 = vrot.lane.b32.xlu0 %v5435_v21, %s5473_s20  ;;  %v1615_v4 = vsel %vm1611_vm10, %v1606_v32, %v1198_v25 }
  0xf7   : > { %v1284_v53 = vpop.xlane.xlu1 %1283 }
  0xf8   : > { %v1624_v7 = vsel %vm1620_vm11, %v1615_v4, %v1284_v53 }
  0xfa   : > { %v1364_v43 = vpop.xlane.xlu2 %1363 }
  0xfb   : > { %v1633_v56 = vsel %vm1629_vm12, %v1624_v7, %v1364_v43  ;;  %v5296_v43 = vld [vmem:[%s5587_s14 + $0x34] sm:$0xf0] }
  0xfc   : > { %1591 = vadd.xlane.f32.xlu2 %v1590_v34  ;;  %v4782_v16 = vor.u32 %v5296_v43, %v4781_v51 }
  0xfd   : > { %1519 = vadd.xlane.f32.xlu1 %v1518_v42  ;;  %v4783_v42 = vld [vmem:[%s5587_s14 + $0x38] sm:$0xf0] }
  0xfe   : > { %v1436_v55 = vpop.xlane.xlu0 %1435  ;;  %1955 = vrot.lane.b32.xlu0 %v1683_v46, %s5473_s20  ;;  %v4786_v34 = vor.u32 %v5295_v52, %v4783_v42  ;;  %1884 = vmatmul.bf16.gmra.mxu0 %v4782_v16 }
  0xff   : > { %v1642_v0 = vsel %vm1638_vm13, %v1633_v56, %v1436_v55  ;;  %v6390_v56 = vld [vmem:[%s7639_s5] ss:$0 sm:$0xff] }
 0x100   : > { %1913 = vmatmul.bf16.gmra.mxu1 %v4786_v34 }
 0x101   : > { %v1508_v35 = vpop.xlane.xlu1 %1507 }
 0x102   : > { %v1580_v63 = vpop.xlane.xlu2 %1579  ;;  %v1651_v14 = vsel %vm1647_vm14, %v1642_v0, %v1508_v35 }
 0x103   : > { %v1660_v37 = vsel %vm1656_vm15, %v1651_v14, %v1580_v63 }
 0x104   : > { %v1676_v44 = vmul.f32 0.1, %v1660_v37  ;;  %vm1668_vm4 = vcmp.gt.f32.partialorder %v1660_v37, 0.0 }
 0x106   : > { %v816_v39 = vpop.xlane.xlu0 %815  ;;  %v1684_v31 = vsel %vm1668_vm4, %v1660_v37, %v1676_v44 }
 0x109   : > { %v994_v8 = vpop.xlane.xlu1 %993 }
 0x10a   : > { %v1127_v29 = vpop.xlane.xlu2 %1126  ;;  %v1598_v50 = vsel %vm1593_vm8, %v816_v39, %v994_v8 }
 0x10b   : > { %v1607_v58 = vsel %vm1602_vm9, %v1598_v50, %v1127_v29  ;;  %v5339_v50 = vld [vmem:[%s7640_s6 + $0xd0] sm:$0xff] }
 0x10c   : > { %2797 = vmatpush.bf16.msrb.mxu1 %v5339_v50 }
 0x10e   : > { %v1201_v45 = vpop.xlane.xlu0 %1200 }
 0x10f   : > { %v1616_v59 = vsel %vm1611_vm10, %v1607_v58, %v1201_v45  ;;  %v5338_v58 = vld [vmem:[%s7640_s6 + $0xc8] sm:$0xff] }
 0x110   : > { %2798 = vmatpush.bf16.msrb.mxu1 %v5338_v58 }
 0x111   : > { %v1287_v6 = vpop.xlane.xlu1 %1286 }
 0x112   : > { %v1367_v30 = vpop.xlane.xlu2 %1366  ;;  %v1625_v23 = vsel %vm1620_vm11, %v1616_v59, %v1287_v6 }
 0x113   : > { %v1634_v40 = vsel %vm1629_vm12, %v1625_v23, %v1367_v30 }
 0x116   : > { %1957 = vrot.lane.b32.xlu1 %v1684_v31, %s5473_s20 }
 0x118   : > { %v1439_v27 = vpop.xlane.xlu0 %1438 }
 0x119   : > { %v1643_v1 = vsel %vm1638_vm13, %v1634_v40, %v1439_v27 }
 0x11a   : > { %v819_v48 = vpop.xlane.xlu2 %818 }
 0x11b   : > { %v1511_v41 = vpop.xlane.xlu1 %1510 }
 0x11c   : > { %v1652_v47 = vsel %vm1647_vm14, %v1643_v1, %v1511_v41 }
 0x120   : > { %v997_v9 = vpop.xlane.xlu0 %996 }
 0x121   : > { %v1599_v54 = vsel %vm1593_vm8, %v819_v48, %v997_v9 }
 0x122   : > { %v1130_v19 = vpop.xlane.xlu2 %1129 }
 0x123   : > { %v1583_v49 = vpop.xlane.xlu1 %1582  ;;  %v1608_v60 = vsel %vm1602_vm9, %v1599_v54, %v1130_v19 }
 0x124   : > { %v1661_v26 = vsel %vm1656_vm15, %v1652_v47, %v1583_v49 }
 0x125   : > { %v1677_v12 = vmul.f32 0.1, %v1661_v26  ;;  %vm1669_vm6 = vcmp.gt.f32.partialorder %v1661_v26, 0.0 }
 0x127   : > { %v1685_v13 = vsel %vm1669_vm6, %v1661_v26, %v1677_v12  ;;  %vm2121_vm6 = vsmask.f32 3328 }
 0x128   : > { %1959 = vrot.lane.b32.xlu2 %v1685_v13, %s5473_s20  ;;  %v1204_v33 = vpop.xlane.xlu0 %1203 }
 0x129   : > { %v1617_v15 = vsel %vm1611_vm10, %v1608_v60, %v1204_v33  ;;  %v5337_v60 = vld [vmem:[%s7640_s6 + $0xc0] sm:$0xff] }
 0x12a   : > { %v1370_v24 = vpop.xlane.xlu2 %1369  ;;  %2799 = vmatpush.bf16.msrb.mxu1 %v5337_v60 }
 0x12b   : > { %v1290_v36 = vpop.xlane.xlu1 %1289 }
 0x12c   : > { %v1626_v11 = vsel %vm1620_vm11, %v1617_v15, %v1290_v36  ;;  %v6417_v36 = vunpack.c.l.b16 %v5578_v5  ;;  %v2090_v15 = vunpack.c.h.b16 %v5578_v5 }
 0x12d   : > { %v1635_v25 = vsel %vm1629_vm12, %v1626_v11, %v1370_v24 }
 0x12e   : > { %v6433_v42 = vpack.c.b16 %v6417_v36, %v6417_v36 }
 0x131   : > { %v1442_v20 = vpop.xlane.xlu0 %1441 }
 0x132   : > { %v1644_v28 = vsel %vm1638_vm13, %v1635_v25, %v1442_v20 }
 0x134   : > { %v1514_v61 = vpop.xlane.xlu1 %1513 }
 0x135   : > { %v1653_v38 = vsel %vm1647_vm14, %v1644_v28, %v1514_v61 }
 0x136   : > { %v1586_v62 = vpop.xlane.xlu2 %1585 }
 0x137   : > { %v1662_v53 = vsel %vm1656_vm15, %v1653_v38, %v1586_v62 }
 0x138   : > { %v1678_v22 = vmul.f32 0.1, %v1662_v53  ;;  %vm1670_vm7 = vcmp.gt.f32.partialorder %v1662_v53, 0.0 }
 0x139   : > { %v822_v57 = vpop.xlane.xlu0 %821 }
 0x13a   : > { %v1686_v21 = vsel %vm1670_vm7, %v1662_v53, %v1678_v22  ;;  %vm2122_vm7 = vsmask.f32 7440 }
 0x13b   : > { %1961 = vrot.lane.b32.xlu0 %v1686_v21, %s5473_s20 }
 0x13c   : > { %v1000_v10 = vpop.xlane.xlu1 %999 }
 0x13d   : > { %v1600_v45 = vsel %vm1593_vm8, %v822_v57, %v1000_v10 }
 0x13e   : > { %v1133_v17 = vpop.xlane.xlu2 %1132 }
 0x13f   : > { %v1609_v6 = vsel %vm1602_vm9, %v1600_v45, %v1133_v17  ;;  %v6424_v17 = vpack.c.b16 %v2090_v15, %v2090_v15 }
 0x141   : > { %v1207_v18 = vpop.xlane.xlu0 %1206 }
 0x142   : > { %v1618_v27 = vsel %vm1611_vm10, %v1609_v6, %v1207_v18  ;;  %v4851_v6 = vrot.slane %v6433_v42, 9 }
 0x144   : > { %v1293_v55 = vpop.xlane.xlu1 %1292 }
 0x145   : > { %v1627_v1 = vsel %vm1620_vm11, %v1618_v27, %v1293_v55  ;;  %v5389_v27 = vld [vmem:[%s7644_s10 + $0x68] sm:$0xff] }
 0x146   : > { %v1373_v46 = vpop.xlane.xlu2 %1372 }
 0x147   : > { %v1636_v49 = vsel %vm1629_vm12, %v1627_v1, %v1373_v46 }
 0x148   : > { %v1870_v35 = vpop.f32.mrf.mxu0 }
 0x149   : > { %v1899_v63 = vpop.f32.mrf.mxu1  ;;  %v1871_v37 = vadd.f32 %v6390_v56, %v1870_v35 }
 0x14b   : > { %v1900_v59 = vadd.f32 %v1899_v63, %v1871_v37 }
 0x14d   : > { %v1445_v7 = vpop.xlane.xlu0 %1444  ;;  %v1927_v47 = vmul.f32 0.1, %v1900_v59  ;;  %vm1919_vm0 = vcmp.gt.f32.partialorder %v1900_v59, 0.0 }
 0x14e   : > { %v1645_v13 = vsel %vm1638_vm13, %v1636_v49, %v1445_v7 }
 0x14f   : > { %v825_v39 = vpop.xlane.xlu2 %824  ;;  %v1935_v24 = vsel %vm1919_vm0, %v1900_v59, %v1927_v47 }
 0x150   : > { %v1517_v32 = vpop.xlane.xlu1 %1516  ;;  %v1872_v4 = vpop.f32.mrf.mxu0 }
 0x151   : > { %v1901_v8 = vpop.f32.mrf.mxu1  ;;  %v1873_v30 = vadd.f32 %v6390_v56, %v1872_v4  ;;  %v1654_v28 = vsel %vm1647_vm14, %v1645_v13, %v1517_v32 }
 0x153   : > { %v1902_v41 = vadd.f32 %v1901_v8, %v1873_v30 }
 0x155   : > { %v1003_v31 = vpop.xlane.xlu0 %1002  ;;  %v1928_v26 = vmul.f32 0.1, %v1902_v41  ;;  %vm1920_vm1 = vcmp.gt.f32.partialorder %v1902_v41, 0.0 }
 0x156   : > { %v1601_v19 = vsel %vm1593_vm8, %v825_v39, %v1003_v31  ;;  %vm1975_vm8 = vcmask 261120   ;;  %v2241_v39 = vrot.slane %v6424_v17, 5 }
 0x157   : > { %v1136_v0 = vpop.xlane.xlu2 %1135  ;;  %v1936_v11 = vsel %vm1920_vm1, %v1902_v41, %v1928_v26  ;;  %v2125_v26 = vshrl.u32 %v6433_v42, 16  ;;  %vm2395_vm1 = vcmask 392192  }
 0x158   : > { %v1589_v29 = vpop.xlane.xlu1 %1588  ;;  %v1875_v14 = vpop.f32.mrf.mxu0  ;;  %v1610_v33 = vsel %vm1602_vm9, %v1601_v19, %v1136_v0 }
 0x159   : > { %v1876_v9 = vadd.f32 %v6390_v56, %v1875_v14  ;;  %v1663_v21 = vsel %vm1656_vm15, %v1654_v28, %v1589_v29 }
 0x15a   : > { %v1679_v34 = vmul.f32 0.1, %v1663_v21  ;;  %vm1671_vm4 = vcmp.gt.f32.partialorder %v1663_v21, 0.0 }
 0x15c   : > { %v1904_v44 = vpop.f32.mrf.mxu1  ;;  %v1687_v31 = vsel %vm1671_vm4, %v1663_v21, %v1679_v34 }
 0x15d   : > { %v1905_v54 = vadd.f32 %v1904_v44, %v1876_v9 }
 0x15f   : > { %v1296_v23 = vpop.xlane.xlu2 %1295  ;;  %v1929_v5 = vmul.f32 0.1, %v1905_v54  ;;  %vm1921_vm9 = vcmp.gt.f32.partialorder %v1905_v54, 0.0 }
 0x160   : > { %v1210_v48 = vpop.xlane.xlu1 %1209  ;;  %v6403_v40 = vpop.f32.mrf.mxu0 }
 0x161   : > { %v1619_v61 = vsel %vm1611_vm10, %v1610_v33, %v1210_v48  ;;  %v1937_v32 = vsel %vm1921_vm9, %v1905_v54, %v1929_v5  ;;  %vm2236_vm10 = vcmask 1042432   ;;  %v1878_v49 = vadd.f32 %v6390_v56, %v6403_v40  ;;  %vm6520_vm9 = vmor %vm2121_vm6, %vm2122_vm7 }
 0x162   : > { %v1628_v10 = vsel %vm1620_vm11, %v1619_v61, %v1296_v23  ;;  %vm2237_vm11 = vcmask 1046532   ;;  %vm2439_vm6 = vcmask 916480   ;;  %vm2460_vm7 = vcmask 654336  }
 0x164   : > { %v6409_v12 = vpop.f32.mrf.mxu1 }
 0x165   : > { %v1907_v5 = vadd.f32 %v6409_v12, %v1878_v49 }
 0x167   : > { %v1448_v53 = vpop.xlane.xlu2 %1447  ;;  %vm1922_vm0 = vcmp.gt.f32.partialorder %v1907_v5, 0.0 }
 0x168   : > { %v1376_v25 = vpop.xlane.xlu1 %1375  ;;  %v5437_v20 = vpop.permute.xlu0 %5436 }
 0x169   : > { %v5439_v62 = vunpack.i.h.bf16 %v5437_v20  ;;  %v5438_v38 = vunpack.i.l.bf16 %v5437_v20  ;;  %v1880_v22 = vpop.f32.mrf.mxu0  ;;  %v1637_v55 = vsel %vm1629_vm12, %v1628_v10, %v1376_v25  ;;  %vm6443_vm12 = vmor %vm2236_vm10, %vm2237_vm11 }
 0x16a   : > { %v1881_v16 = vadd.f32 %v6390_v56, %v1880_v22  ;;  %v1646_v18 = vsel %vm1638_vm13, %v1637_v55, %v1448_v53  ;;  %v2242_v47 = vsel %vm6443_vm12, %v4851_v6, %v2241_v39 }
 0x16b   : > { %v1977_v57 = vsel %vm1975_vm8, %v1936_v11, %v5439_v62  ;;  %v1976_v51 = vsel %vm1975_vm8, %v1935_v24, %v5438_v38  ;;  %v2128_v38 = vshll.u32 %v6433_v42, 16  ;;  %v6473_v10 = vunpack.c.l.b16 %v2242_v47 }
 0x16c   : > { %v1986_v43 = vsel %vm1984_vm2, %v1977_v57, 0.0  ;;  %v1985_v52 = vsel %vm1984_vm2, %v1976_v51, 0.0  ;;  %v1909_v63 = vpop.f32.mrf.mxu1 }
 0x16d   : > { %v1994_v46 = vpack.c.bf16 %v1986_v43, %v1986_v43  ;;  %v1993_v35 = vpack.c.bf16 %v1985_v52, %v1985_v52  ;;  %v1910_v14 = vadd.f32 %v1909_v63, %v1881_v16 }
 0x16f   : > { %v2009_v4 = vshrl.u32 %v1994_v46, 16  ;;  %v2002_v8 = vshrl.u32 %v1993_v35, 16  ;;  %v2012_v7 = vshll.u32 %v1994_v46, 16  ;;  %v2005_v29 = vshll.u32 %v1993_v35, 16  ;;  %v1592_v58 = vpop.xlane.xlu2 %1591 }
 0x170   : > { %v1520_v0 = vpop.xlane.xlu1 %1519  ;;  %v1956_v45 = vpop.permute.xlu0 %1955  ;;  %v1931_v54 = vmul.f32 0.1, %v1910_v14 }
 0x171   : > { %v2011_v37 = vrot.slane %v2009_v4, 7  ;;  %v2004_v30 = vrot.slane %v2002_v8, 7  ;;  %v1655_v50 = vsel %vm1647_vm14, %v1646_v18, %v1520_v0  ;;  %v1978_v44 = vsel %vm1975_vm8, %v1937_v32, %v1956_v45 }
 0x172   : > { %v1987_v59 = vsel %vm1984_vm2, %v1978_v44, 0.0  ;;  %v1664_v48 = vsel %vm1656_vm15, %v1655_v50, %v1592_v58  ;;  %vm1923_vm14 = vcmp.gt.f32.partialorder %v1910_v14, 0.0  ;;  %v1930_v8 = vmul.f32 0.1, %v1907_v5 }
 0x173   : > { %v2014_v41 = vor.u32 %v2012_v7, %v2011_v37  ;;  %v2007_v23 = vor.u32 %v2005_v29, %v2004_v30  ;;  %v1995_v1 = vpack.c.bf16 %v1987_v59, %v1987_v59  ;;  %vm1672_vm13 = vcmp.gt.f32.partialorder %v1664_v48, 0.0 }
 0x174   : > { %v1680_v9 = vmul.f32 0.1, %v1664_v48  ;;  %v1939_v55 = vsel %vm1923_vm14, %v1910_v14, %v1931_v54  ;;  %vm2430_vm14 = vcmask 523264  }
 0x175   : > { %v2016_v19 = vshrl.u32 %v1995_v1, 16  ;;  %v2065_v13 = vsel %vm5565_vm3, 0, %v2007_v23  ;;  %v2066_v33 = vsel %vm5565_vm3, 0, %v2014_v41  ;;  %v2019_v60 = vshll.u32 %v1995_v1, 16 }
 0x176   : > { %v1688_v15 = vsel %vm1672_vm13, %v1664_v48, %v1680_v9  ;;  %v2073_v24 = vsel %vm5570_vm5, %v2065_v13, 0  ;;  %v2074_v40 = vsel %vm5570_vm5, %v2066_v33, 0  ;;  %vm2421_vm13 = vcmask 130048  }
 0x177   : > { %v2018_v11 = vrot.slane %v2016_v19, 7  ;;  %v5440_v25 = vpack.i.bf16 %v1688_v15, %v1687_v31  ;;  %v6463_v20 = vunpack.c.l.b16 %v2073_v24  ;;  %v2092_v28 = vunpack.c.h.b16 %v2073_v24 }
 0x178   : > { %v2093_v61 = vunpack.c.l.b16 %v2074_v40  ;;  %v2094_v62 = vunpack.c.h.b16 %v2074_v40 }
 0x179   : > { %v2021_v53 = vor.u32 %v2019_v60, %v2018_v11  ;;  %5441 = vrot.lane.b32.xlu0 %v5440_v25, %s5473_s20  ;;  %v6467_v22 = vpack.c.b16 %v2092_v28, %v2092_v28  ;;  %v6471_v21 = vpack.c.b16 %v6463_v20, %v6463_v20  ;;  %v1938_v11 = vsel %vm1922_vm0, %v1907_v5, %v1930_v8 }
 0x17a   : > { %v2109_v57 = vpack.c.b16 %v2093_v61, %v2093_v61  ;;  %v6476_v51 = vpack.c.b16 %v2094_v62, %v2094_v62  ;;  %v2338_v43 = vpack.c.b16 %v2093_v61, %v6463_v20 }
 0x17b   : > { %v2067_v52 = vsel %vm5565_vm3, 0, %v2021_v53  ;;  %v4852_v16 = vrot.slane %v6471_v21, 9  ;;  %v2245_v34 = vrot.slane %v6467_v22, 5  ;;  %v2139_v40 = vshrl.u32 %v6471_v21, 16 }
 0x17c   : > { %v2249_v46 = vrot.slane %v6476_v51, 5  ;;  %2342 = vrot.lane.b32.xlu1 %v2338_v43, %s5474_s29  ;;  %v2075_v12 = vsel %vm5570_vm5, %v2067_v52, 0  ;;  %v4853_v35 = vrot.slane %v2109_v57, 9  ;;  %v2153_v63 = vshrl.u32 %v2109_v57, 16 }
 0x17d   : > { %v2246_v18 = vsel %vm6443_vm12, %v4852_v16, %v2245_v34  ;;  %v6489_v32 = vunpack.c.l.b16 %v2075_v12  ;;  %v2096_v39 = vunpack.c.h.b16 %v2075_v12  ;;  %v2156_v4 = vshll.u32 %v2109_v57, 16 }
 0x17e   : > { %v2319_v7 = vunpack.c.l.b16 %v2246_v18  ;;  %v2155_v6 = vrot.slane %v2153_v63, 4  ;;  %v2250_v50 = vsel %vm6443_vm12, %v4853_v35, %v2249_v46  ;;  %v2162_v24 = vshll.u32 %v6476_v51, 16 }
 0x17f   : > { %v2111_v0 = vpack.c.b16 %v6489_v32, %v6489_v32  ;;  %v2112_v45 = vpack.c.b16 %v2096_v39, %v2096_v39  ;;  %v2158_v44 = vrot.slane %v2156_v4, 5  ;;  %v6500_v48 = vpack.c.b16 %v6489_v32, %v2093_v61 }
 0x180   : > { %v2326_v37 = vpack.c.b16 %v2319_v7, %v6473_v10  ;;  %v2320_v49 = vunpack.c.l.b16 %v2250_v50  ;;  %v2142_v61 = vshll.u32 %v6471_v21, 16  ;;  %v2127_v57 = vrot.slane %v2125_v26, 4 }
 0x181   : > { %v2253_v58 = vrot.slane %v2112_v45, 5  ;;  %v4854_v59 = vrot.slane %v2111_v0, 9  ;;  %v2167_v41 = vshrl.u32 %v2111_v0, 16  ;;  %v2170_v23 = vshll.u32 %v2111_v0, 16 }
 0x182   : > { %v1960_v29 = vpop.permute.xlu2 %1959  ;;  %2330 = vrot.lane.b32.xlu2 %v2326_v37, %s5475_s30  ;;  %v2159_v47 = vor.u32 %v2158_v44, %v2155_v6  ;;  %v2176_v54 = vshll.u32 %v2112_v45, 16  ;;  %v2364_v52 = vpack.c.b16 %v2320_v49, %v2319_v7  ;;  %v2130_v21 = vrot.slane %v2128_v38, 5 }
 0x183   : > { %v1980_v14 = vsel %vm1975_vm8, %v1939_v55, %v1960_v29  ;;  %v6504_v9 = vsel %vm6443_vm12, %v4854_v59, %v2253_v58  ;;  %v2169_v13 = vrot.slane %v2167_v41, 4  ;;  %v2172_v33 = vrot.slane %v2170_v23, 5 }
 0x184   : > { %v1989_v30 = vsel %vm1984_vm2, %v1980_v14, 0.0  ;;  %2377 = vrot.lane.b32.xlu1 %v6500_v48, %s5473_s20  ;;  %v2321_v19 = vunpack.c.l.b16 %v6504_v9  ;;  %v2160_v53 = vrot.slane %v2159_v47, 4  ;;  %v2178_v16 = vrot.slane %v2176_v54, 5 }
 0x185   : > { %v1997_v31 = vpack.c.bf16 %v1989_v30, %v1989_v30  ;;  %v2173_v28 = vor.u32 %v2172_v33, %v2169_v13  ;;  %v2164_v55 = vrot.slane %v2162_v24, 5  ;;  %v2141_v46 = vrot.slane %v2139_v40, 4 }
 0x186   : > { %v2327_v25 = vpack.c.b16 %v2321_v19, %v2320_v49  ;;  %v2144_v42 = vrot.slane %v2142_v61, 5  ;;  %v2134_v7 = vshll.u32 %v6424_v17, 16  ;;  %v2131_v14 = vor.u32 %v2130_v21, %v2127_v57 }
 0x187   : > { %v2030_v1 = vshrl.u32 %v1997_v31, 16  ;;  %v2033_v15 = vshll.u32 %v1997_v31, 16  ;;  %v2174_v5 = vrot.slane %v2173_v28, 4  ;;  %v2165_v4 = vsel %vm6520_vm9, %v2160_v53, %v2164_v55 }
 0x188   : > { %v1958_v43 = vpop.permute.xlu1 %1957  ;;  %4968 = vmatmul.msk.bf16.vlgmr.msrb.gmra.mxu1 %vm2395_vm1, %v2327_v25  ;;  %v6543_v0 = vunpack.c.l.b16 %v2165_v4  ;;  %v2145_v6 = vor.u32 %v2144_v42, %v2141_v46  ;;  %v2148_v58 = vshll.u32 %v6467_v22, 16  ;;  %v2136_v17 = vrot.slane %v2134_v7, 5  ;;  %v1882_v46 = vpop.f32.mrf.mxu0 }
 0x189   : > { %v2032_v60 = vrot.slane %v2030_v1, 7  ;;  %v1979_v26 = vsel %vm1975_vm8, %v1938_v11, %v1958_v43  ;;  %v2179_v63 = vsel %vm6520_vm9, %v2174_v5, %v2178_v16  ;;  %v2132_v23 = vrot.slane %v2131_v14, 4 }
 0x18a   : > { %v1988_v35 = vsel %vm1984_vm2, %v1979_v26, 0.0  ;;  %2368 = vrot.lane.b32.xlu2 %v2364_v52, %s5476_s13  ;;  %v6540_v8 = vunpack.c.l.b16 %v2179_v63  ;;  %v2146_v1 = vrot.slane %v2145_v6, 4  ;;  %v1883_v4 = vadd.f32 %v6390_v56, %v1882_v46 }
 0x18b   : > { %v2035_v62 = vor.u32 %v2033_v15, %v2032_v60  ;;  %v1996_v39 = vpack.c.bf16 %v1988_v35, %v1988_v35  ;;  %v2150_v60 = vrot.slane %v2148_v58, 5  ;;  %v2137_v40 = vsel %vm6520_vm9, %v2132_v23, %v2136_v17 }
 0x18c   : > { %2332 = vrot.lane.b32.xlu1 %v2327_v25, %s5475_s30  ;;  %v6549_v44 = vpack.c.b16 %v6540_v8, %v6543_v0 }
 0x18d   : > { %v2069_v34 = vsel %vm5565_vm3, 0, %v2035_v62  ;;  %v2023_v29 = vshrl.u32 %v1996_v39, 16  ;;  %v2026_v50 = vshll.u32 %v1996_v39, 16  ;;  %v2151_v11 = vsel %vm6520_vm9, %v2146_v1, %v2150_v60 }
 0x18e   : > { %v2077_v12 = vsel %vm5570_vm5, %v2069_v34, 0  ;;  %v6574_v34 = vunpack.c.l.b16 %v2137_v40  ;;  %v2299_v26 = vunpack.c.l.b16 %v2151_v11 }
 0x18f   : > { %v6535_v38 = vunpack.c.l.b16 %v2077_v12  ;;  %v2100_v18 = vunpack.c.h.b16 %v2077_v12  ;;  %v2025_v30 = vrot.slane %v2023_v29, 7 }
 0x190   : > { %v2306_v14 = vpack.c.b16 %v2299_v26, %v6574_v34 }
 0x191   : > { %v2115_v45 = vpack.c.b16 %v6535_v38, %v6535_v38  ;;  %v2116_v37 = vpack.c.b16 %v2100_v18, %v2100_v18  ;;  %v2028_v41 = vor.u32 %v2026_v50, %v2025_v30 }
 0x192   : > { %2312 = vrot.lane.b32.xlu2 %v6549_v44, %s5477_s15 }
 0x193   : > { %v2195_v31 = vshrl.u32 %v2115_v45, 16  ;;  %v2198_v59 = vshll.u32 %v2115_v45, 16  ;;  %v2068_v13 = vsel %vm5565_vm3, 0, %v2028_v41  ;;  %v4856_v33 = vrot.slane %v2115_v45, 9  ;;  %v1911_v45 = vpop.f32.mrf.mxu1 }
 0x194   : > { %v2261_v54 = vrot.slane %v2116_v37, 5  ;;  %v2076_v22 = vsel %vm5570_vm5, %v2068_v13, 0  ;;  %v2204_v57 = vshll.u32 %v2116_v37, 16  ;;  %v1912_v58 = vadd.f32 %v1911_v45, %v1883_v4  ;;  %v5336_v45 = vld [vmem:[%s7640_s6 + $0xb8] sm:$0xff] }
 0x195   : > { %v2197_v49 = vrot.slane %v2195_v31, 4  ;;  %v2200_v47 = vrot.slane %v2198_v59, 5  ;;  %v6558_v15 = vunpack.c.l.b16 %v2076_v22  ;;  %v2098_v24 = vunpack.c.h.b16 %v2076_v22  ;;  %2763 = vmatpush.bf16.msrb.mxu0 %v5336_v45  ;;  %v5321_v45 = vld [vmem:[%s7640_s6 + $0x40] sm:$0xff] }
 0x196   : > { %v6570_v53 = vsel %vm6443_vm12, %v4856_v33, %v2261_v54  ;;  %v2206_v39 = vrot.slane %v2204_v57, 5  ;;  %v1932_v59 = vmul.f32 0.1, %v1912_v58  ;;  %vm1924_vm10 = vcmp.gt.f32.partialorder %v1912_v58, 0.0 }
 0x197   : > { %v2201_v25 = vor.u32 %v2200_v47, %v2197_v49  ;;  %v2113_v28 = vpack.c.b16 %v6558_v15, %v6558_v15  ;;  %v2114_v61 = vpack.c.b16 %v2098_v24, %v2098_v24  ;;  %v2339_v62 = vpack.c.b16 %v6558_v15, %v6489_v32 }
 0x198   : > { %v2323_v21 = vunpack.c.l.b16 %v6570_v53  ;;  %v2351_v41 = vpack.c.b16 %v6543_v0, %v2299_v26  ;;  %v1940_v23 = vsel %vm1924_vm10, %v1912_v58, %v1932_v59  ;;  %v6604_v60 = vpack.c.b16 %v6535_v38, %v6558_v15  ;;  %v5328_v53 = vld [vmem:[%s7640_s6 + $0x78] sm:$0xff] }
 0x199   : > { %2344 = vrot.lane.b32.xlu0 %v2339_v62, %s5474_s29  ;;  %v4855_v43 = vrot.slane %v2113_v28, 9  ;;  %v2257_v52 = vrot.slane %v2114_v61, 5  ;;  %v2181_v5 = vshrl.u32 %v2113_v28, 16  ;;  %v2184_v16 = vshll.u32 %v2113_v28, 16  ;;  %2734 = vmatpush.bf16.msra.mxu3 %v5328_v53 }
 0x19a   : > { %v2202_v55 = vrot.slane %v2201_v25, 4  ;;  %v2190_v63 = vshll.u32 %v2114_v61, 16 }
 0x19b   : > { %v2258_v32 = vsel %vm6443_vm12, %v4855_v43, %v2257_v52  ;;  %v2183_v12 = vrot.slane %v2181_v5, 4  ;;  %v2186_v35 = vrot.slane %v2184_v16, 5 }
 0x19c   : > { %v2322_v42 = vunpack.c.l.b16 %v2258_v32  ;;  %v2192_v37 = vrot.slane %v2190_v63, 5  ;;  %v2207_v30 = vsel %vm6520_vm9, %v2202_v55, %v2206_v39  ;;  %v5320_v39 = vld [vmem:[%s7640_s6 + $0x38] sm:$0xff] }
 0x19d   : > { %v2187_v18 = vor.u32 %v2186_v35, %v2183_v12  ;;  %2705 = vmatpush.bf16.msra.mxu2 %v5320_v39 }
 0x19e   : > { %v2328_v7 = vpack.c.b16 %v2323_v21, %v2322_v42  ;;  %v2365_v29 = vpack.c.b16 %v2322_v42, %v2321_v19  ;;  %v2303_v19 = vunpack.c.l.b16 %v2207_v30  ;;  %v1885_v42 = vpop.f32.mrf.mxu0  ;;  %v5317_v30 = vld [vmem:[%s7640_s6 + $0x20] sm:$0xff] }
 0x19f   : > { %v2188_v6 = vrot.slane %v2187_v18, 4  ;;  %v1914_v18 = vpop.f32.mrf.mxu1 }
 0x1a0   : > { %4969 = vmatmul.msk.bf16.gmra.mxu1 %vm2395_vm1, %v2328_v7  ;;  %2370 = vrot.lane.b32.xlu1 %v2365_v29, %s5476_s13  ;;  %v5327_v29 = vld [vmem:[%s7640_s6 + $0x70] sm:$0xff] }
 0x1a1   : > { %2310 = vrot.lane.b32.xlu0 %v2306_v14, %s5477_s15  ;;  %v2193_v50 = vsel %vm6520_vm9, %v2188_v6, %v2192_v37  ;;  %v1886_v14 = vadd.f32 %v6390_v56, %v1885_v42  ;;  %2735 = vmatpush.bf16.msra.mxu3 %v5327_v29 }
 0x1a2   : > { %v2302_v9 = vunpack.c.l.b16 %v2193_v50  ;;  %v5326_v50 = vld [vmem:[%s7640_s6 + $0x68] sm:$0xff] }
 0x1a3   : > { %v1915_v58 = vadd.f32 %v1914_v18, %v1886_v14  ;;  %v5331_v18 = vld [vmem:[%s7640_s6 + $0x90] sm:$0xff] }
 0x1a4   : > { %v2352_v31 = vpack.c.b16 %v2302_v9, %v6540_v8  ;;  %v2308_v17 = vpack.c.b16 %v2303_v19, %v2302_v9 }
 0x1a5   : > { %2736 = vmatpush.bf16.msra.mxu3 %v5326_v50  ;;  %v1933_v59 = vmul.f32 0.1, %v1915_v58  ;;  %vm1925_vm11 = vcmp.gt.f32.partialorder %v1915_v58, 0.0 }
 0x1a6   : > { %2357 = vrot.lane.b32.xlu2 %v2352_v31, %s5478_s16  ;;  %v1887_v4 = vpop.f32.mrf.mxu0  ;;  %v5325_v31 = vld [vmem:[%s7640_s6 + $0x60] sm:$0xff] }
 0x1a7   : > { %v1888_v6 = vadd.f32 %v6390_v56, %v1887_v4  ;;  %v1916_v37 = vpop.f32.mrf.mxu1  ;;  %v5316_v56 = vld [vmem:[%s7640_s6 + $0x18] sm:$0xff] }
 0x1a8   : > { %2314 = vrot.lane.b32.xlu1 %v2308_v17, %s5477_s15 }
 0x1a9   : > { %2355 = vrot.lane.b32.xlu0 %v2351_v41, %s5478_s16  ;;  %v1917_v9 = vadd.f32 %v1916_v37, %v1888_v6  ;;  %v5315_v41 = vld [vmem:[%s7640_s6 + $0x10] sm:$0xff]  ;;  %2737 = vmatpush.bf16.msra.mxu3 %v5325_v31  ;;  %v5330_v31 = vld [vmem:[%s7640_s6 + $0x88] sm:$0xff] }
 0x1ab   : > { %vm1926_vm4 = vcmp.gt.f32.partialorder %v1917_v9, 0.0 }
 0x1ad   : > { %v1962_v1 = vpop.permute.xlu0 %1961 }
 0x1ae   : > { %v1981_v49 = vsel %vm1975_vm8, %v1940_v23, %v1962_v1 }
 0x1af   : > { %v1990_v47 = vsel %vm1984_vm2, %v1981_v49, 0.0 }
 0x1b0   : > { %v1998_v13 = vpack.c.bf16 %v1990_v47, %v1990_v47  ;;  %v5334_v47 = vld [vmem:[%s7640_s6 + $0xa8] sm:$0xff] }
 0x1b1   : > { %2386 = vrot.lane.b32.xlu0 %v6549_v44, %s5479_s17 }
 0x1b2   : > { %v2037_v8 = vshrl.u32 %v1998_v13, 16  ;;  %v2040_v54 = vshll.u32 %v1998_v13, 16  ;;  %v5324_v13 = vld [vmem:[%s7640_s6 + $0x58] sm:$0xff] }
 0x1b3   : > { %2738 = vmatpush.bf16.msra.mxu3 %v5324_v13 }
 0x1b4   : > { %v2039_v33 = vrot.slane %v2037_v8, 7  ;;  %v1941_v8 = vsel %vm1925_vm11, %v1915_v58, %v1933_v59 }
 0x1b6   : > { %v2042_v22 = vor.u32 %v2040_v54, %v2039_v33 }
 0x1b8   : > { %v2070_v0 = vsel %vm5565_vm3, 0, %v2042_v22 }
 0x1b9   : > { %v2078_v24 = vsel %vm5570_vm5, %v2070_v0, 0  ;;  %2379 = vrot.lane.b32.xlu0 %v6604_v60, %s5473_s20  ;;  %v5314_v0 = vld [vmem:[%s7640_s6 + $0x8] sm:$0xff] }
 0x1ba   : > { %v6608_v40 = vunpack.c.l.b16 %v2078_v24  ;;  %v2102_v11 = vunpack.c.h.b16 %v2078_v24  ;;  %v5333_v24 = vld [vmem:[%s7640_s6 + $0xa0] sm:$0xff] }
 0x1bc   : > { %v2117_v44 = vpack.c.b16 %v6608_v40, %v6608_v40  ;;  %v2118_v25 = vpack.c.b16 %v2102_v11, %v2102_v11  ;;  %v2340_v28 = vpack.c.b16 %v6608_v40, %v6535_v38 }
 0x1be   : > { %2346 = vrot.lane.b32.xlu2 %v2340_v28, %s5474_s29  ;;  %v4857_v15 = vrot.slane %v2117_v44, 9  ;;  %v2265_v61 = vrot.slane %v2118_v25, 5  ;;  %v2209_v62 = vshrl.u32 %v2117_v44, 16  ;;  %v2212_v57 = vshll.u32 %v2117_v44, 16 }
 0x1bf   : > { %v2218_v16 = vshll.u32 %v2118_v25, 16 }
 0x1c0   : > { %v6619_v43 = vsel %vm6443_vm12, %v4857_v15, %v2265_v61  ;;  %v2211_v52 = vrot.slane %v2209_v62, 4  ;;  %v2214_v5 = vrot.slane %v2212_v57, 5  ;;  %v5313_v62 = vld [vmem:[%s7640_s6] sm:$0xff]  ;;  %v5323_v57 = vld [vmem:[%s7640_s6 + $0x50] sm:$0xff] }
 0x1c1   : > { %2334 = vrot.lane.b32.xlu0 %v2328_v7, %s5475_s30  ;;  %v2324_v55 = vunpack.c.l.b16 %v6619_v43  ;;  %v2220_v38 = vrot.slane %v2218_v16, 5  ;;  %v5318_v7 = vld [vmem:[%s7640_s6 + $0x28] sm:$0xff]  ;;  %2739 = vmatpush.bf16.msra.mxu3 %v5323_v57 }
 0x1c2   : > { %v2215_v26 = vor.u32 %v2214_v5, %v2211_v52 }
 0x1c3   : > { %v2366_v12 = vpack.c.b16 %v2324_v55, %v2323_v21  ;;  %v5319_v21 = vld [vmem:[%s7640_s6 + $0x30] sm:$0xff] }
 0x1c4   : > { %v2216_v46 = vrot.slane %v2215_v26, 4  ;;  %2706 = vmatpush.bf16.msra.mxu2 %v5319_v21 }
 0x1c6   : > { %2388 = vrot.lane.b32.xlu2 %v2308_v17, %s5479_s17  ;;  %v2221_v32 = vsel %vm6520_vm9, %v2216_v46, %v2220_v38  ;;  %v1934_v17 = vmul.f32 0.1, %v1917_v9 }
 0x1c7   : > { %v6630_v35 = vunpack.c.l.b16 %v2221_v32  ;;  %v5332_v32 = vld [vmem:[%s7640_s6 + $0x98] sm:$0xff] }
 0x1c8   : > { %2707 = vmatpush.bf16.msra.mxu2 %v5318_v7  ;;  %v1942_v33 = vsel %vm1926_vm4, %v1917_v9, %v1934_v17 }
 0x1c9   : > { %v2353_v63 = vpack.c.b16 %v6630_v35, %v2303_v19  ;;  %2372 = vrot.lane.b32.xlu0 %v2366_v12, %s5476_s13  ;;  %v5335_v19 = vld [vmem:[%s7640_s6 + $0xb0] sm:$0xff]  ;;  %v5322_v12 = vld [vmem:[%s7640_s6 + $0x48] sm:$0xff] }
 0x1ca   : > { %2764 = vmatpush.bf16.msrb.mxu0 %v5335_v19  ;;  %2740 = vmatpush.bf16.msra.mxu3 %v5322_v12 }
 0x1cb   : > { %2359 = vrot.lane.b32.xlu1 %v2353_v63, %s5478_s16 }
 0x1cc   : > { %2708 = vmatpush.bf16.msra.mxu2 %v5317_v30 }
 0x1ce   : > { %2765 = vmatpush.bf16.msrb.mxu0 %v5334_v47  ;;  %2741 = vmatpush.bf16.msra.mxu3 %v5321_v45 }
 0x1d0   : > { %2709 = vmatpush.bf16.msra.mxu2 %v5316_v56 }
 0x1d2   : > { %2766 = vmatpush.bf16.msrb.mxu0 %v5333_v24 }
 0x1d4   : > { %2710 = vmatpush.bf16.msra.mxu2 %v5315_v41 }
 0x1d6   : > { %2767 = vmatpush.bf16.msrb.mxu0 %v5332_v32 }
 0x1d8   : > { %2711 = vmatpush.bf16.msra.mxu2 %v5314_v0 }
 0x1da   : > { %2768 = vmatpush.bf16.msrb.mxu0 %v5331_v18 }
 0x1dc   : > { %2712 = vmatpush.bf16.msra.mxu2 %v5313_v62 }
 0x1de   : > { %2769 = vmatpush.bf16.msrb.mxu0 %v5330_v31 }
 0x1eb   : > { %v5442_v23 = vpop.permute.xlu0 %5441 }
 0x1ec   : > { %v5444_v1 = vunpack.i.h.bf16 %v5442_v23  ;;  %v5443_v49 = vunpack.i.l.bf16 %v5442_v23 }
 0x1ee   : > { %v1983_v54 = vsel %vm1975_vm8, %v1942_v33, %v5444_v1  ;;  %v1982_v22 = vsel %vm1975_vm8, %v1941_v8, %v5443_v49  ;;  %v5329_v49 = vld [vmem:[%s7640_s6 + $0x80] sm:$0xff] }
 0x1ef   : > { %v1992_v11 = vsel %vm1984_vm2, %v1983_v54, 0.0  ;;  %v1991_v44 = vsel %vm1984_vm2, %v1982_v22, 0.0  ;;  %2770 = vmatpush.bf16.msrb.mxu0 %v5329_v49  ;;  %vm2408_vm2 = vcmask 785408  }
 0x1f0   : > { %v2000_v25 = vpack.c.bf16 %v1992_v11, %v1992_v11  ;;  %v1999_v28 = vpack.c.bf16 %v1991_v44, %v1991_v44 }
 0x1f2   : > { %v2051_v15 = vshrl.u32 %v2000_v25, 16  ;;  %v2044_v61 = vshrl.u32 %v1999_v28, 16  ;;  %v2054_v5 = vshll.u32 %v2000_v25, 16  ;;  %v2047_v26 = vshll.u32 %v1999_v28, 16  ;;  %v2331_v28 = vpop.permute.xlu2 %2330 }
 0x1f4   : > { %v2053_v52 = vrot.slane %v2051_v15, 7  ;;  %v2046_v16 = vrot.slane %v2044_v61, 7 }
 0x1f6   : > { %v2056_v46 = vor.u32 %v2054_v5, %v2053_v52  ;;  %v2049_v38 = vor.u32 %v2047_v26, %v2046_v16  ;;  %v2343_v5 = vpop.permute.xlu1 %2342 }
 0x1f7   : > { %v2423_v45 = vsel %vm2421_vm13, %v2331_v28, %v2343_v5 }
 0x1f8   : > { %v2072_v63 = vsel %vm5565_vm3, 0, %v2056_v46  ;;  %v2071_v42 = vsel %vm5565_vm3, 0, %v2049_v38 }
 0x1f9   : > { %v2079_v39 = vsel %vm5570_vm5, %v2071_v42, 0  ;;  %v2080_v53 = vsel %vm5570_vm5, %v2072_v63, 0 }
 0x1fa   : > { %v2103_v21 = vunpack.c.l.b16 %v2079_v39  ;;  %v2104_v4 = vunpack.c.h.b16 %v2079_v39  ;;  %v6712_v7 = vunpack.c.l.b16 %v2080_v53  ;;  %v2273_v29 = vunpack.c.h.b16 %v2080_v53  ;;  %v2369_v32 = vpop.permute.xlu2 %2368 }
 0x1fc   : > { %v2119_v14 = vpack.c.b16 %v2103_v21, %v2103_v21  ;;  %v2120_v6 = vpack.c.b16 %v2104_v4, %v2104_v4  ;;  %v6718_v37 = vpack.c.b16 %v2103_v21, %v6608_v40  ;;  %v2274_v30 = vpack.c.b16 %v6712_v7, %v6712_v7 }
 0x1fd   : > { %v2275_v50 = vpack.c.b16 %v2273_v29, %v2273_v29  ;;  %v2341_v12 = vpack.c.b16 %v6712_v7, %v2103_v21 }
 0x1fe   : > { %2381 = vrot.lane.b32.xlu2 %v6718_v37, %s5473_s20  ;;  %v4858_v58 = vrot.slane %v2119_v14, 9  ;;  %v2269_v9 = vrot.slane %v2120_v6, 5  ;;  %v2223_v19 = vshrl.u32 %v2119_v14, 16  ;;  %v2226_v56 = vshll.u32 %v2119_v14, 16  ;;  %v2378_v39 = vpop.permute.xlu1 %2377 }
 0x1ff   : > { %v2232_v59 = vshll.u32 %v2120_v6, 16  ;;  %v2277_v40 = vshrl.u32 %v2274_v30, 16  ;;  %v2280_v1 = vshll.u32 %v2274_v30, 16  ;;  %v4859_v13 = vrot.slane %v2274_v30, 9 }
 0x200   : > { %v2270_v17 = vsel %vm6443_vm12, %v4858_v58, %v2269_v9  ;;  %v2225_v41 = vrot.slane %v2223_v19, 4  ;;  %v2228_v23 = vrot.slane %v2226_v56, 5  ;;  %v2292_v8 = vrot.slane %v2275_v50, 5 }
 0x201   : > { %v2325_v47 = vunpack.c.l.b16 %v2270_v17  ;;  %v2279_v33 = vrot.slane %v2277_v40, 4  ;;  %v2282_v22 = vrot.slane %v2280_v1, 5  ;;  %v2234_v11 = vrot.slane %v2232_v59, 5 }
 0x202   : > { %v2229_v54 = vor.u32 %v2228_v23, %v2225_v41  ;;  %v2286_v25 = vshll.u32 %v2275_v50, 16  ;;  %v2293_v15 = vsel %vm6443_vm12, %v4859_v13, %v2292_v8  ;;  %v2313_v21 = vpop.permute.xlu2 %2312 }
 0x203   : > { %v2329_v0 = vpack.c.b16 %v2325_v47, %v2324_v55  ;;  %v2283_v44 = vor.u32 %v2282_v22, %v2279_v33  ;;  %v2363_v43 = vunpack.c.l.b16 %v2293_v15  ;;  %v2401_v19 = vsel %vm2395_vm1, %v6500_v48, %v2313_v21 }
 0x204   : > { %v2230_v24 = vrot.slane %v2229_v54, 4  ;;  %v2288_v55 = vrot.slane %v2286_v25, 5 }
 0x205   : > { %4970 = vmatmul.msk.bf16.gmra.mxu1 %vm2395_vm1, %v2329_v0  ;;  %v2284_v62 = vrot.slane %v2283_v44, 4  ;;  %v2367_v46 = vpack.c.b16 %v2363_v43, %v2325_v47  ;;  %v2394_v18 = vpack.c.b16 %v6473_v10, %v2363_v43 }
 0x206   : > { %2336 = vrot.lane.b32.xlu2 %v2329_v0, %s5475_s30  ;;  %v2235_v61 = vsel %vm6520_vm9, %v2230_v24, %v2234_v11  ;;  %v2333_v50 = vpop.permute.xlu1 %2332 }
 0x207   : > { %v2305_v57 = vunpack.c.l.b16 %v2235_v61  ;;  %v2289_v16 = vsel %vm6520_vm9, %v2284_v62, %v2288_v55  ;;  %v2413_v31 = vsel %vm2408_vm2, %v2401_v19, %v2333_v50 }
 0x208   : > { %v2350_v38 = vunpack.c.l.b16 %v2289_v16 }
 0x209   : > { %v2309_v52 = vpack.c.b16 %v2305_v57, %v6630_v35  ;;  %v2294_v35 = vpack.c.b16 %v6463_v20, %v6417_v36  ;;  %v2376_v20 = vpack.c.b16 %v6417_v36, %v6712_v7  ;;  %v2453_v7 = vsel %vm1975_vm8, %v2369_v32, %v2378_v39 }
 0x20a   : > { %v2354_v63 = vpack.c.b16 %v2350_v38, %v2305_v57  ;;  %v2385_v29 = vpack.c.b16 %v6574_v34, %v2350_v38  ;;  %v2358_v58 = vpop.permute.xlu2 %2357 }
 0x20b   : > { %v2345_v26 = vpop.permute.xlu0 %2344  ;;  %2390 = vrot.lane.b32.xlu1 %v2309_v52, %s5479_s17  ;;  %2316 = vrot.lane.b32.xlu0 %v2309_v52, %s5477_s15 }
 0x20c   : > { %v2425_v40 = vsel %vm2421_vm13, %v2333_v50, %v2345_v26 }
 0x20d   : > { %v2434_v23 = vsel %vm2430_vm14, %v2425_v40, %v2358_v58 }
 0x20e   : > { %2374 = vrot.lane.b32.xlu2 %v2367_v46, %s5476_s13 }
 0x212   : > { %v2371_v59 = vpop.permute.xlu1 %2370 }
 0x213   : > { %v2311_v42 = vpop.permute.xlu0 %2310  ;;  %2348 = vrot.lane.b32.xlu1 %v2341_v12, %s5474_s29  ;;  %2361 = vrot.lane.b32.xlu0 %v2354_v63, %s5478_s16  ;;  %v2444_v1 = vsel %vm2439_vm6, %v2434_v23, %v2371_v59 }
 0x214   : > { %v2398_v53 = vsel %vm2395_vm1, %v2294_v35, %v2311_v42  ;;  %v6792_v35 = vld [vmem:[%s7641_s7] ss:$0 sm:$0xff]  ;;  %v2801_v42 = vpop.f32.mrf.mxu1 }
 0x215   : > { %v2410_v4 = vsel %vm2408_vm2, %v2398_v53, %v2331_v28  ;;  %4971 = vmatmul.msk.bf16.gmra.mxu1 %vm2395_vm1, %v2394_v18 }
 0x216   : > { %2713 = vmatmul.bf16.vlgmr.msra.gmra.mxu2 %v2410_v4 }
 0x218   : > { %v2347_v17 = vpop.permute.xlu2 %2346 }
 0x21a   : > { %v2315_v49 = vpop.permute.xlu1 %2314 }
 0x21b   : > { %v2356_v14 = vpop.permute.xlu0 %2355  ;;  %2383 = vrot.lane.b32.xlu1 %v2376_v20, %s5473_s20  ;;  %2392 = vrot.lane.b32.xlu0 %v2385_v29, %s5479_s17  ;;  %v2404_v48 = vsel %vm2395_vm1, %v6604_v60, %v2315_v49 }
 0x21c   : > { %v2432_v6 = vsel %vm2430_vm14, %v2423_v45, %v2356_v14 }
 0x21d   : > { %v2441_v30 = vsel %vm2439_vm6, %v2432_v6, %v2369_v32 }
 0x21e   : > { %2742 = vmatmul.bf16.vlgmr.msra.gmra.mxu3 %v2441_v30 }
 0x220   : > { %v2389_v13 = vpop.permute.xlu2 %2388 }
 0x223   : > { %v2387_v9 = vpop.permute.xlu0 %2386 }
 0x224   : > { %v2462_v56 = vsel %vm2460_vm7, %v2453_v7, %v2387_v9  ;;  %v2803_v7 = vpop.f32.mrf.mxu1 }
 0x225   : > { %2771 = vmatmul.bf16.vlgmr.msrb.gmra.mxu0 %v2462_v56 }
 0x226   : > { %2718 = vmatmul.bf16.gmra.mxu2 %v2413_v31 }
 0x22b   : > { %v2380_v41 = vpop.permute.xlu0 %2379 }
 0x22c   : > { %v2455_v47 = vsel %vm1975_vm8, %v2371_v59, %v2380_v41 }
 0x22d   : > { %v2465_v33 = vsel %vm2460_vm7, %v2455_v47, %v2389_v13 }
 0x22e   : > { %2747 = vmatmul.bf16.gmra.mxu3 %v2444_v1 }
 0x233   : > { %v2335_v8 = vpop.permute.xlu0 %2334 }
 0x234   : > { %v2416_v54 = vsel %vm2408_vm2, %v2404_v48, %v2335_v8  ;;  %v2427_v22 = vsel %vm2421_vm13, %v2335_v8, %v2347_v17  ;;  %v2806_v8 = vpop.f32.mrf.mxu1 }
 0x235   : > { %2776 = vmatmul.bf16.gmra.mxu0 %v2465_v33 }
 0x236   : > { %2723 = vmatmul.bf16.gmra.mxu2 %v2416_v54 }
 0x23b   : > { %v2373_v24 = vpop.permute.xlu0 %2372 }
 0x23d   : > { %v2360_v0 = vpop.permute.xlu1 %2359 }
 0x23e   : > { %v2436_v11 = vsel %vm2430_vm14, %v2427_v22, %v2360_v0 }
 0x23f   : > { %v2447_v44 = vsel %vm2439_vm6, %v2436_v11, %v2373_v24 }
 0x240   : > { %2752 = vmatmul.bf16.gmra.mxu3 %v2447_v44 }
 0x258   : > { %v2382_v25 = vpop.permute.xlu2 %2381 }
 0x259   : > { %v2457_v60 = vsel %vm1975_vm8, %v2373_v24, %v2382_v25 }
 0x260   : > { %v2337_v28 = vpop.permute.xlu2 %2336 }
 0x268   : > { %v2375_v16 = vpop.permute.xlu2 %2374 }
 0x27d   : > { %v2391_v15 = vpop.permute.xlu1 %2390  ;;  %v2317_v61 = vpop.permute.xlu0 %2316 }
 0x27e   : > { %v2407_v62 = vsel %vm2395_vm1, %v6718_v37, %v2317_v61  ;;  %v2468_v57 = vsel %vm2460_vm7, %v2457_v60, %v2391_v15 }
 0x27f   : > { %2781 = vmatmul.bf16.gmra.mxu0 %v2468_v57  ;;  %v2419_v43 = vsel %vm2408_vm2, %v2407_v62, %v2337_v28 }
 0x280   : > { %2728 = vmatmul.bf16.gmra.mxu2 %v2419_v43 }
 0x285   : > { %v2349_v55 = vpop.permute.xlu1 %2348  ;;  %v2362_v52 = vpop.permute.xlu0 %2361 }
 0x286   : > { %v2429_v5 = vsel %vm2421_vm13, %v2337_v28, %v2349_v55 }
 0x287   : > { %v2438_v26 = vsel %vm2430_vm14, %v2429_v5, %v2362_v52 }
 0x288   : > { %v2450_v46 = vsel %vm2439_vm6, %v2438_v26, %v2375_v16 }
 0x289   : > { %2757 = vmatmul.bf16.gmra.mxu3 %v2450_v46 }
 0x28d   : > { %v2384_v38 = vpop.permute.xlu1 %2383  ;;  %v2393_v32 = vpop.permute.xlu0 %2392 }
 0x28e   : > { %v2459_v37 = vsel %vm1975_vm8, %v2375_v16, %v2384_v38 }
 0x28f   : > { %v2471_v12 = vsel %vm2460_vm7, %v2459_v37, %v2393_v32 }
 0x290   : > { %2786 = vmatmul.bf16.gmra.mxu0 %v2471_v12 }
 0x299   : > { %v2714_v63 = vpop.f32.mrf.mxu2 }
 0x29a   : > { %v2715_v18 = vadd.f32 %v6792_v35, %v2714_v63 }
 0x2a1   : > { %v2716_v39 = vpop.f32.mrf.mxu2  ;;  %v2743_v53 = vpop.f32.mrf.mxu3 }
 0x2a2   : > { %v2744_v4 = vadd.f32 %v2743_v53, %v2715_v18  ;;  %v2772_v21 = vpop.f32.mrf.mxu0  ;;  %v2717_v45 = vadd.f32 %v6792_v35, %v2716_v39 }
 0x2a4   : > { %v2773_v20 = vadd.f32 %v2772_v21, %v2744_v4  ;;  %v2808_v21 = vpop.f32.mrf.mxu1 }
 0x2a6   : > { %v2802_v29 = vadd.f32 %v2801_v42, %v2773_v20 }
 0x2a8   : > { %vm2821_vm0 = vcmp.gt.f32.partialorder %v2802_v29, 0.0  ;;  %v2829_v14 = vmul.f32 0.1, %v2802_v29 }
 0x2a9   : > { %v2745_v6 = vpop.f32.mrf.mxu3  ;;  %v2719_v19 = vpop.f32.mrf.mxu2 }
 0x2aa   : > { %v2837_v30 = vsel %vm2821_vm0, %v2802_v29, %v2829_v14  ;;  %v2746_v50 = vadd.f32 %v2745_v6, %v2717_v45  ;;  %v2774_v58 = vpop.f32.mrf.mxu0  ;;  %v2720_v41 = vadd.f32 %v6792_v35, %v2719_v19 }
 0x2ab   : > { %v2845_v9 = vpack.c.bf16 %v2837_v30, %v2837_v30 }
 0x2ac   : > { %v2775_v56 = vadd.f32 %v2774_v58, %v2746_v50 }
 0x2ad   : > { %v2854_v31 = vshrl.u32 %v2845_v9, 16  ;;  %v2857_v17 = vshll.u32 %v2845_v9, 16 }
 0x2ae   : > { %v2804_v59 = vadd.f32 %v2803_v7, %v2775_v56 }
 0x2af   : > { %v2856_v40 = vrot.slane %v2854_v31, 7 }
 0x2b0   : > { %vm2822_vm10 = vcmp.gt.f32.partialorder %v2804_v59, 0.0  ;;  %v2830_v23 = vmul.f32 0.1, %v2804_v59 }
 0x2b1   : > { %v2859_v1 = vor.u32 %v2857_v17, %v2856_v40  ;;  %v2748_v49 = vpop.f32.mrf.mxu3  ;;  %v2721_v11 = vpop.f32.mrf.mxu2 }
 0x2b2   : > { %v2838_v47 = vsel %vm2822_vm10, %v2804_v59, %v2830_v23  ;;  %v2749_v48 = vadd.f32 %v2748_v49, %v2720_v41  ;;  %v2777_v13 = vpop.f32.mrf.mxu0  ;;  %v2722_v57 = vadd.f32 %v6792_v35, %v2721_v11 }
 0x2b3   : > { %v2917_v33 = vsel %vm5565_vm3, 0, %v2859_v1  ;;  %v2846_v54 = vpack.c.bf16 %v2838_v47, %v2838_v47 }
 0x2b4   : > { %v2778_v22 = vadd.f32 %v2777_v13, %v2749_v48  ;;  %v2925_v0 = vsel %vm5570_vm5, %v2917_v33, 0 }
 0x2b5   : > { %v2861_v24 = vshrl.u32 %v2846_v54, 16  ;;  %v6801_v44 = vunpack.c.l.b16 %v2925_v0  ;;  %v2941_v25 = vunpack.c.h.b16 %v2925_v0  ;;  %v2864_v15 = vshll.u32 %v2846_v54, 16 }
 0x2b6   : > { %v2807_v28 = vadd.f32 %v2806_v8, %v2778_v22 }
 0x2b7   : > { %v2863_v60 = vrot.slane %v2861_v24, 7  ;;  %v2954_v61 = vpack.c.b16 %v6801_v44, %v6801_v44  ;;  %v2955_v62 = vpack.c.b16 %v2941_v25, %v2941_v25 }
 0x2b8   : > { %vm2823_vm11 = vcmp.gt.f32.partialorder %v2807_v28, 0.0  ;;  %v2831_v43 = vmul.f32 0.1, %v2807_v28 }
 0x2b9   : > { %v2866_v55 = vor.u32 %v2864_v15, %v2863_v60  ;;  %v2750_v52 = vpop.f32.mrf.mxu3  ;;  %v2969_v5 = vshrl.u32 %v2954_v61, 16  ;;  %v2972_v16 = vshll.u32 %v2954_v61, 16  ;;  %v2978_v32 = vshll.u32 %v2955_v62, 16 }
 0x2ba   : > { %v2839_v26 = vsel %vm2823_vm11, %v2807_v28, %v2831_v43  ;;  %v2751_v46 = vadd.f32 %v2750_v52, %v2722_v57  ;;  %v2779_v38 = vpop.f32.mrf.mxu0  ;;  %v4972_v37 = vrot.slane %v2954_v61, 9  ;;  %v3068_v4 = vrot.slane %v2955_v62, 5 }
 0x2bb   : > { %v2918_v12 = vsel %vm5565_vm3, 0, %v2866_v55  ;;  %v2847_v63 = vpack.c.bf16 %v2839_v26, %v2839_v26  ;;  %v2971_v42 = vrot.slane %v2969_v5, 4  ;;  %v2974_v18 = vrot.slane %v2972_v16, 5 }
 0x2bc   : > { %v2926_v39 = vsel %vm5570_vm5, %v2918_v12, 0  ;;  %v2780_v53 = vadd.f32 %v2779_v38, %v2751_v46  ;;  %v2980_v6 = vrot.slane %v2978_v32, 5  ;;  %v6814_v50 = vsel %vm6443_vm12, %v4972_v37, %v3068_v4 }
 0x2bd   : > { %v6810_v20 = vunpack.c.l.b16 %v2926_v39  ;;  %v2868_v29 = vshrl.u32 %v2847_v63, 16  ;;  %v2975_v45 = vor.u32 %v2974_v18, %v2971_v42  ;;  %v2943_v30 = vunpack.c.h.b16 %v2926_v39 }
 0x2be   : > { %v2809_v14 = vadd.f32 %v2808_v21, %v2780_v53  ;;  %v2871_v7 = vshll.u32 %v2847_v63, 16  ;;  %v3140_v37 = vunpack.c.l.b16 %v6814_v50  ;;  %v5356_v50 = vld [vmem:[%s7642_s8 + $0x80] sm:$0xff] }
 0x2bf   : > { %v2870_v58 = vrot.slane %v2868_v29, 7  ;;  %v2976_v9 = vrot.slane %v2975_v45, 4  ;;  %v2956_v19 = vpack.c.b16 %v6810_v20, %v6810_v20  ;;  %v2957_v31 = vpack.c.b16 %v2943_v30, %v2943_v30 }
 0x2c0   : > { %vm2824_vm4 = vcmp.gt.f32.partialorder %v2809_v14, 0.0  ;;  %v2832_v56 = vmul.f32 0.1, %v2809_v14 }
 0x2c1   : > { %v2873_v59 = vor.u32 %v2871_v7, %v2870_v58  ;;  %v2981_v40 = vsel %vm6520_vm9, %v2976_v9, %v2980_v6  ;;  %v2983_v17 = vshrl.u32 %v2956_v19, 16  ;;  %v2986_v41 = vshll.u32 %v2956_v19, 16 }
 0x2c2   : > { %v2840_v23 = vsel %vm2824_vm4, %v2809_v14, %v2832_v56  ;;  %v6820_v1 = vunpack.c.l.b16 %v2981_v40  ;;  %v2992_v54 = vshll.u32 %v2957_v31, 16  ;;  %v4973_v22 = vrot.slane %v2956_v19, 9 }
 0x2c3   : > { %v2919_v49 = vsel %vm5565_vm3, 0, %v2873_v59  ;;  %v2848_v47 = vpack.c.bf16 %v2840_v23, %v2840_v23  ;;  %v2985_v48 = vrot.slane %v2983_v17, 4  ;;  %v2988_v13 = vrot.slane %v2986_v41, 5 }
 0x2c4   : > { %v2927_v8 = vsel %vm5570_vm5, %v2919_v49, 0  ;;  %v3128_v33 = vpack.c.b16 %v6820_v1, %v6574_v34  ;;  %v3072_v60 = vrot.slane %v2957_v31, 5  ;;  %v2994_v55 = vrot.slane %v2992_v54, 5 }
 0x2c5   : > { %v6828_v0 = vunpack.c.l.b16 %v2927_v8  ;;  %v2875_v24 = vshrl.u32 %v2848_v47, 16  ;;  %v2945_v11 = vunpack.c.h.b16 %v2927_v8  ;;  %v2878_v25 = vshll.u32 %v2848_v47, 16 }
 0x2c6   : > { %3132 = vrot.lane.b32.xlu2 %v3128_v33, %s5478_s16  ;;  %v2989_v28 = vor.u32 %v2988_v13, %v2985_v48  ;;  %v3073_v52 = vsel %vm6443_vm12, %v4973_v22, %v3072_v60 }
 0x2c7   : > { %v2877_v15 = vrot.slane %v2875_v24, 7  ;;  %v2958_v61 = vpack.c.b16 %v6828_v0, %v6828_v0  ;;  %v2959_v62 = vpack.c.b16 %v2945_v11, %v2945_v11  ;;  %v3118_v57 = vpack.c.b16 %v6828_v0, %v6810_v20 }
 0x2c8   : > { %v2990_v43 = vrot.slane %v2989_v28, 4  ;;  %v3141_v21 = vunpack.c.l.b16 %v3073_v52  ;;  %v5344_v52 = vld [vmem:[%s7642_s8 + $0x20] sm:$0xff] }
 0x2c9   : > { %v2880_v5 = vor.u32 %v2878_v25, %v2877_v15  ;;  %v2997_v16 = vshrl.u32 %v2958_v61, 16  ;;  %v3000_v26 = vshll.u32 %v2958_v61, 16  ;;  %v4974_v38 = vrot.slane %v2958_v61, 9 }
 0x2ca   : > { %v2995_v46 = vsel %vm6520_vm9, %v2990_v43, %v2994_v55  ;;  %v3076_v32 = vrot.slane %v2959_v62, 5  ;;  %v3006_v18 = vshll.u32 %v2959_v62, 16  ;;  %v6852_v30 = vpack.c.b16 %v3141_v21, %v3140_v37  ;;  %v5347_v62 = vld [vmem:[%s7642_s8 + $0x38] sm:$0xff]  ;;  %v5346_v43 = vld [vmem:[%s7642_s8 + $0x30] sm:$0xff]  ;;  %v5345_v55 = vld [vmem:[%s7642_s8 + $0x28] sm:$0xff] }
 0x2cb   : > { %v2920_v12 = vsel %vm5565_vm3, 0, %v2880_v5  ;;  %v2999_v63 = vrot.slane %v2997_v16, 4  ;;  %v3002_v42 = vrot.slane %v3000_v26, 5  ;;  %v6842_v39 = vunpack.c.l.b16 %v2995_v46  ;;  %3539 = vmatpush.bf16.msrb.mxu2 %v5347_v62  ;;  %v2724_v5 = vpop.f32.mrf.mxu2  ;;  %v2753_v16 = vpop.f32.mrf.mxu3  ;;  %v5343_v46 = vld [vmem:[%s7642_s8 + $0x18] sm:$0xff] }
 0x2cc   : > { %v2928_v53 = vsel %vm5570_vm5, %v2920_v12, 0  ;;  %v3077_v4 = vsel %vm6443_vm12, %v4974_v38, %v3076_v32  ;;  %v3008_v9 = vrot.slane %v3006_v18, 5  ;;  %v3151_v25 = vpack.c.b16 %v6810_v20, %v6801_v44  ;;  %v2811_v38 = vpop.f32.mrf.mxu1  ;;  %v5358_v20 = vld [vmem:[%s7642_s8 + $0x90] sm:$0xff] }
 0x2cd   : > { %v3003_v29 = vor.u32 %v3002_v42, %v2999_v63  ;;  %v6848_v45 = vunpack.c.l.b16 %v2928_v53  ;;  %v2947_v14 = vunpack.c.h.b16 %v2928_v53  ;;  %v3142_v6 = vunpack.c.l.b16 %v3077_v4  ;;  %v5342_v63 = vld [vmem:[%s7642_s8 + $0x10] sm:$0xff] }
 0x2ce   : > { %v3164_v58 = vpack.c.b16 %v6842_v39, %v6820_v1  ;;  %v2725_v26 = vadd.f32 %v6792_v35, %v2724_v5 }
 0x2cf   : > { %v3004_v7 = vrot.slane %v3003_v29, 4  ;;  %v2960_v19 = vpack.c.b16 %v6848_v45, %v6848_v45  ;;  %v2961_v56 = vpack.c.b16 %v2947_v14, %v2947_v14  ;;  %v6858_v31 = vpack.c.b16 %v3142_v6, %v3141_v21  ;;  %3540 = vmatpush.bf16.msrb.mxu2 %v5346_v43  ;;  %v5341_v14 = vld [vmem:[%s7642_s8 + $0x8] sm:$0xff]  ;;  %v5355_v43 = vld [vmem:[%s7642_s8 + $0x78] sm:$0xff] }
 0x2d0   : > { %v2754_v32 = vadd.f32 %v2753_v16, %v2725_v26  ;;  %3568 = vmatpush.bf16.msrb.mxu3 %v5355_v43 }
 0x2d1   : > { %v3009_v59 = vsel %vm6520_vm9, %v3004_v7, %v3008_v9  ;;  %v3011_v40 = vshrl.u32 %v2960_v19, 16  ;;  %v3014_v41 = vshll.u32 %v2960_v19, 16  ;;  %v3020_v48 = vshll.u32 %v2961_v56, 16 }
 0x2d2   : > { %v6862_v17 = vunpack.c.l.b16 %v3009_v59  ;;  %v4975_v54 = vrot.slane %v2960_v19, 9  ;;  %v3080_v22 = vrot.slane %v2961_v56, 5  ;;  %v5340_v59 = vld [vmem:[%s7642_s8] sm:$0xff] }
 0x2d3   : > { %v3013_v23 = vrot.slane %v3011_v40, 4  ;;  %v3016_v47 = vrot.slane %v3014_v41, 5  ;;  %v3022_v33 = vrot.slane %v3020_v48, 5  ;;  %3541 = vmatpush.bf16.msrb.mxu2 %v5345_v55  ;;  %v2726_v18 = vpop.f32.mrf.mxu2  ;;  %v2755_v4 = vpop.f32.mrf.mxu3  ;;  %v5371_v40 = vld [vmem:[%s7642_s8 + $0xf8] sm:$0xff]  ;;  %v5370_v48 = vld [vmem:[%s7642_s8 + $0xf0] sm:$0xff]  ;;  %v5369_v55 = vld [vmem:[%s7642_s8 + $0xe8] sm:$0xff] }
 0x2d4   : > { %v3129_v49 = vpack.c.b16 %v6862_v17, %v6842_v39  ;;  %v6875_v28 = vsel %vm6443_vm12, %v4975_v54, %v3080_v22  ;;  %v2727_v21 = vadd.f32 %v6792_v35, %v2726_v18  ;;  %v2813_v9 = vpop.f32.mrf.mxu1  ;;  %3626 = vmatpush.bf16.msra.mxu1 %v5371_v40  ;;  %v5367_v40 = vld [vmem:[%s7642_s8 + $0xd8] sm:$0xff] }
 0x2d5   : > { %v3017_v13 = vor.u32 %v3016_v47, %v3013_v23  ;;  %v3143_v15 = vunpack.c.l.b16 %v6875_v28 }
 0x2d6   : > { %3134 = vrot.lane.b32.xlu1 %v3129_v49, %s5478_s16 }
 0x2d7   : > { %v3018_v8 = vrot.slane %v3017_v13, 4  ;;  %v3170_v61 = vpack.c.b16 %v3143_v15, %v3142_v6  ;;  %3542 = vmatpush.bf16.msrb.mxu2 %v5344_v52  ;;  %v2756_v6 = vadd.f32 %v2755_v4, %v2727_v21 }
 0x2d8   : > { %3627 = vmatpush.bf16.msra.mxu1 %v5370_v48 }
 0x2d9   : > { %v3023_v24 = vsel %vm6520_vm9, %v3018_v8, %v3022_v33 }
 0x2da   : > { %v6869_v11 = vunpack.c.l.b16 %v3023_v24 }
 0x2db   : > { %3543 = vmatpush.bf16.msrb.mxu2 %v5343_v46 }
 0x2dc   : > { %v3165_v60 = vpack.c.b16 %v6869_v11, %v6862_v17  ;;  %v2816_v26 = vpop.f32.mrf.mxu1  ;;  %3628 = vmatpush.bf16.msra.mxu1 %v5369_v55 }
 0x2de   : > { %3155 = vrot.lane.b32.xlu1 %v3151_v25, %s5478_s16 }
 0x2df   : > { %3544 = vmatpush.bf16.msrb.mxu2 %v5342_v63 }
 0x2e3   : > { %3545 = vmatpush.bf16.msrb.mxu2 %v5341_v14  ;;  %v5368_v14 = vld [vmem:[%s7642_s8 + $0xe0] sm:$0xff] }
 0x2e4   : > { %3629 = vmatpush.bf16.msra.mxu1 %v5368_v14 }
 0x2e6   : > { %3175 = vrot.lane.b32.xlu1 %v3170_v61, %s5478_s16 }
 0x2e7   : > { %3546 = vmatpush.bf16.msrb.mxu2 %v5340_v59  ;;  %v5353_v59 = vld [vmem:[%s7642_s8 + $0x68] sm:$0xff] }
 0x2e8   : > { %3630 = vmatpush.bf16.msra.mxu1 %v5367_v40 }
 0x2fc   : > { %v2782_v12 = vpop.f32.mrf.mxu0 }
 0x2fd   : > { %v2783_v42 = vadd.f32 %v2782_v12, %v2754_v32 }
 0x2ff   : > { %v2812_v53 = vadd.f32 %v2811_v38, %v2783_v42 }
 0x301   : > { %vm2825_vm2 = vcmp.gt.f32.partialorder %v2812_v53, 0.0  ;;  %v2833_v29 = vmul.f32 0.1, %v2812_v53 }
 0x303   : > { %v2841_v7 = vsel %vm2825_vm2, %v2812_v53, %v2833_v29  ;;  %v2729_v49 = vpop.f32.mrf.mxu2  ;;  %v5354_v29 = vld [vmem:[%s7642_s8 + $0x70] sm:$0xff] }
 0x304   : > { %v2849_v19 = vpack.c.bf16 %v2841_v7, %v2841_v7  ;;  %v2784_v56 = vpop.f32.mrf.mxu0  ;;  %v2730_v22 = vadd.f32 %v6792_v35, %v2729_v49  ;;  %3569 = vmatpush.bf16.msrb.mxu3 %v5354_v29 }
 0x305   : > { %v2785_v41 = vadd.f32 %v2784_v56, %v2756_v6 }
 0x306   : > { %v2882_v23 = vshrl.u32 %v2849_v19, 16  ;;  %v2885_v8 = vshll.u32 %v2849_v19, 16 }
 0x307   : > { %v2814_v47 = vadd.f32 %v2813_v9, %v2785_v41 }
 0x308   : > { %v2884_v13 = vrot.slane %v2882_v23, 7  ;;  %3570 = vmatpush.bf16.msrb.mxu3 %v5353_v59  ;;  %v5365_v59 = vld [vmem:[%s7642_s8 + $0xc8] sm:$0xff] }
 0x309   : > { %vm2826_vm6 = vcmp.gt.f32.partialorder %v2814_v47, 0.0  ;;  %v2834_v33 = vmul.f32 0.1, %v2814_v47 }
 0x30a   : > { %v2887_v54 = vor.u32 %v2885_v8, %v2884_v13 }
 0x30b   : > { %v2842_v24 = vsel %vm2826_vm6, %v2814_v47, %v2834_v33  ;;  %v2731_v18 = vpop.f32.mrf.mxu2 }
 0x30c   : > { %v2921_v25 = vsel %vm5565_vm3, 0, %v2887_v54  ;;  %v2850_v61 = vpack.c.bf16 %v2842_v24, %v2842_v24  ;;  %v2758_v62 = vpop.f32.mrf.mxu3  ;;  %v2732_v19 = vadd.f32 %v6792_v35, %v2731_v18 }
 0x30d   : > { %v2929_v52 = vsel %vm5570_vm5, %v2921_v25, 0  ;;  %v2759_v5 = vadd.f32 %v2758_v62, %v2730_v22  ;;  %v2787_v16 = vpop.f32.mrf.mxu0  ;;  %v2818_v62 = vpop.f32.mrf.mxu1 }
 0x30e   : > { %v6927_v46 = vunpack.c.l.b16 %v2929_v52  ;;  %v2889_v38 = vshrl.u32 %v2850_v61, 16  ;;  %v2949_v32 = vunpack.c.h.b16 %v2929_v52  ;;  %v2892_v42 = vshll.u32 %v2850_v61, 16 }
 0x30f   : > { %v2788_v12 = vadd.f32 %v2787_v16, %v2759_v5 }
 0x310   : > { %v2891_v63 = vrot.slane %v2889_v38, 7  ;;  %v6931_v53 = vpack.c.b16 %v6927_v46, %v6927_v46  ;;  %v6933_v4 = vpack.c.b16 %v2949_v32, %v2949_v32  ;;  %v5352_v32 = vld [vmem:[%s7642_s8 + $0x60] sm:$0xff] }
 0x311   : > { %v2817_v21 = vadd.f32 %v2816_v26, %v2788_v12  ;;  %v5366_v12 = vld [vmem:[%s7642_s8 + $0xd0] sm:$0xff]  ;;  %3571 = vmatpush.bf16.msrb.mxu3 %v5352_v32 }
 0x312   : > { %v2894_v6 = vor.u32 %v2892_v42, %v2891_v63  ;;  %v3025_v7 = vshrl.u32 %v6931_v53, 16  ;;  %v3028_v9 = vshll.u32 %v6931_v53, 16  ;;  %v3034_v47 = vshll.u32 %v6933_v4, 16  ;;  %3631 = vmatpush.bf16.msra.mxu1 %v5366_v12 }
 0x313   : > { %vm2827_vm7 = vcmp.gt.f32.partialorder %v2817_v21, 0.0  ;;  %v2835_v56 = vmul.f32 0.1, %v2817_v21 }
 0x314   : > { %v2760_v41 = vpop.f32.mrf.mxu3  ;;  %v3027_v23 = vrot.slane %v3025_v7, 4  ;;  %v3030_v49 = vrot.slane %v3028_v9, 5  ;;  %v2922_v35 = vsel %vm5565_vm3, 0, %v2894_v6  ;;  %v3036_v52 = vrot.slane %v3034_v47, 5  ;;  %v5351_v6 = vld [vmem:[%s7642_s8 + $0x58] sm:$0xff] }
 0x315   : > { %v2843_v48 = vsel %vm2827_vm7, %v2817_v21, %v2835_v56  ;;  %v2761_v13 = vadd.f32 %v2760_v41, %v2732_v19  ;;  %v2789_v8 = vpop.f32.mrf.mxu0  ;;  %v2930_v33 = vsel %vm5570_vm5, %v2922_v35, 0  ;;  %v3117_v35 = vpack.c.b16 %v6801_v44, %v6417_v36  ;;  %3572 = vmatpush.bf16.msrb.mxu3 %v5351_v6 }
 0x316   : > { %v2851_v54 = vpack.c.bf16 %v2843_v48, %v2843_v48  ;;  %v3031_v22 = vor.u32 %v3030_v49, %v3027_v23  ;;  %v6955_v24 = vunpack.c.l.b16 %v2930_v33  ;;  %v2951_v25 = vunpack.c.h.b16 %v2930_v33  ;;  %3632 = vmatpush.bf16.msra.mxu1 %v5365_v59 }
 0x317   : > { %v2790_v61 = vadd.f32 %v2789_v8, %v2761_v13 }
 0x318   : > { %v2896_v43 = vshrl.u32 %v2851_v54, 16  ;;  %v3032_v55 = vrot.slane %v3031_v22, 4  ;;  %v6959_v5 = vpack.c.b16 %v6955_v24, %v6955_v24  ;;  %v2899_v16 = vshll.u32 %v2851_v54, 16 }
 0x319   : > { %v2819_v26 = vadd.f32 %v2818_v62, %v2790_v61  ;;  %v2965_v38 = vpack.c.b16 %v2951_v25, %v2951_v25 }
 0x31a   : > { %v2898_v63 = vrot.slane %v2896_v43, 7  ;;  %v3037_v42 = vsel %vm6520_vm9, %v3032_v55, %v3036_v52  ;;  %v3039_v18 = vshrl.u32 %v6959_v5, 16  ;;  %v3042_v21 = vshll.u32 %v6959_v5, 16  ;;  %v5350_v55 = vld [vmem:[%s7642_s8 + $0x50] sm:$0xff]  ;;  %v5364_v52 = vld [vmem:[%s7642_s8 + $0xc0] sm:$0xff] }
 0x31b   : > { %vm2828_vm0 = vcmp.gt.f32.partialorder %v2819_v26, 0.0  ;;  %v2836_v29 = vmul.f32 0.1, %v2819_v26  ;;  %v6971_v14 = vunpack.c.l.b16 %v3037_v42  ;;  %v3048_v56 = vshll.u32 %v2965_v38, 16  ;;  %3573 = vmatpush.bf16.msrb.mxu3 %v5350_v55  ;;  %3633 = vmatpush.bf16.msra.mxu1 %v5364_v52  ;;  %v5348_v52 = vld [vmem:[%s7642_s8 + $0x40] sm:$0xff] }
 0x31c   : > { %v2901_v7 = vor.u32 %v2899_v16, %v2898_v63  ;;  %v3041_v9 = vrot.slane %v3039_v18, 4  ;;  %v3044_v19 = vrot.slane %v3042_v21, 5  ;;  %v4977_v13 = vrot.slane %v6959_v5, 9 }
 0x31d   : > { %v2844_v40 = vsel %vm2828_vm0, %v2819_v26, %v2836_v29  ;;  %v3130_v41 = vpack.c.b16 %v6971_v14, %v6869_v11  ;;  %v3050_v25 = vrot.slane %v3048_v56, 5  ;;  %v3088_v44 = vrot.slane %v2965_v38, 5 }
 0x31e   : > { %v2852_v23 = vpack.c.bf16 %v2844_v40, %v2844_v40  ;;  %v2923_v49 = vsel %vm5565_vm3, 0, %v2901_v7  ;;  %v3045_v47 = vor.u32 %v3044_v19, %v3041_v9 }
 0x31f   : > { %3136 = vrot.lane.b32.xlu0 %v3130_v41, %s5478_s16  ;;  %v2931_v48 = vsel %vm5570_vm5, %v2923_v49, 0  ;;  %v3089_v56 = vsel %vm6443_vm12, %v4977_v13, %v3088_v44 }
 0x320   : > { %v2903_v8 = vshrl.u32 %v2852_v23, 16  ;;  %v3133_v33 = vpop.permute.xlu2 %3132  ;;  %v6989_v54 = vunpack.c.l.b16 %v2931_v48  ;;  %v2953_v22 = vunpack.c.h.b16 %v2931_v48  ;;  %v2906_v61 = vshll.u32 %v2852_v23, 16 }
 0x321   : > { %v3188_v62 = vsel %vm2430_vm14, %v3117_v35, %v3133_v33  ;;  %v3046_v43 = vrot.slane %v3045_v47, 4 }
 0x322   : > { %v2905_v5 = vrot.slane %v2903_v8, 7  ;;  %3547 = vmatmul.bf16.vlgmr.msrb.gmra.mxu2 %v3188_v62  ;;  %v2967_v16 = vpack.c.b16 %v2953_v22, %v2953_v22  ;;  %v2966_v26 = vpack.c.b16 %v6989_v54, %v6989_v54  ;;  %v3120_v32 = vpack.c.b16 %v6989_v54, %v6955_v24 }
 0x323   : > { %v3051_v38 = vsel %vm6520_vm9, %v3046_v43, %v3050_v25  ;;  %v3145_v8 = vunpack.c.l.b16 %v3089_v56  ;;  %v5349_v25 = vld [vmem:[%s7642_s8 + $0x48] sm:$0xff] }
 0x324   : > { %v2908_v12 = vor.u32 %v2906_v61, %v2905_v5  ;;  %v3053_v63 = vshrl.u32 %v2966_v26, 16  ;;  %v3056_v42 = vshll.u32 %v2966_v26, 16  ;;  %v3062_v18 = vshll.u32 %v2967_v16, 16  ;;  %3574 = vmatpush.bf16.msrb.mxu3 %v5349_v25 }
 0x325   : > { %v7004_v21 = vunpack.c.l.b16 %v3051_v38  ;;  %v4978_v29 = vrot.slane %v2966_v26, 9  ;;  %v3092_v6 = vrot.slane %v2967_v16, 5  ;;  %v3153_v5 = vpack.c.b16 %v6955_v24, %v6927_v46 }
 0x326   : > { %v2924_v7 = vsel %vm5565_vm3, 0, %v2908_v12  ;;  %v3055_v9 = vrot.slane %v3053_v63, 4  ;;  %v3058_v19 = vrot.slane %v3056_v42, 5  ;;  %v3064_v48 = vrot.slane %v3062_v18, 5 }
 0x327   : > { %3173 = vrot.lane.b32.xlu0 %v6852_v30, %s5478_s16  ;;  %v2932_v59 = vsel %vm5570_vm5, %v2924_v7, 0  ;;  %v3093_v40 = vsel %vm6443_vm12, %v4978_v29, %v3092_v6  ;;  %v3166_v41 = vpack.c.b16 %v7004_v21, %v6971_v14 }
 0x328   : > { %v7018_v23 = vunpack.c.l.b16 %v2932_v59  ;;  %v3096_v49 = vunpack.c.h.b16 %v2932_v59  ;;  %v3059_v47 = vor.u32 %v3058_v19, %v3055_v9  ;;  %v3146_v35 = vunpack.c.l.b16 %v3093_v40  ;;  %3575 = vmatpush.bf16.msrb.mxu3 %v5348_v52  ;;  %v5359_v52 = vld [vmem:[%s7642_s8 + $0x98] sm:$0xff] }
 0x329   : > { %v4976_v59 = vrot.slane %v6931_v53, 9  ;;  %v3084_v40 = vrot.slane %v6933_v4, 5  ;;  %v5362_v4 = vld [vmem:[%s7642_s8 + $0xb0] sm:$0xff] }
 0x32a   : > { %v3097_v13 = vpack.c.b16 %v7018_v23, %v7018_v23  ;;  %v3098_v30 = vpack.c.b16 %v3096_v49, %v3096_v49  ;;  %v3154_v33 = vpack.c.b16 %v7018_v23, %v6989_v54  ;;  %v3060_v22 = vrot.slane %v3059_v47, 4 }
 0x32b   : > { %v7027_v61 = vpack.c.b16 %v3146_v35, %v3145_v8  ;;  %v3152_v47 = vpack.c.b16 %v6848_v45, %v6828_v0  ;;  %v3085_v53 = vsel %vm6443_vm12, %v4976_v59, %v3084_v40  ;;  %v5357_v0 = vld [vmem:[%s7642_s8 + $0x88] sm:$0xff] }
 0x32c   : > { %3161 = vrot.lane.b32.xlu1 %v3154_v33, %s5478_s16  ;;  %v3065_v62 = vsel %vm6520_vm9, %v3060_v22, %v3064_v48  ;;  %v4979_v43 = vrot.slane %v3097_v13, 9  ;;  %v3115_v44 = vrot.slane %v3098_v30, 5  ;;  %v3100_v55 = vshrl.u32 %v3097_v13, 16  ;;  %v5363_v48 = vld [vmem:[%s7642_s8 + $0xb8] sm:$0xff]  ;;  %v5360_v22 = vld [vmem:[%s7642_s8 + $0xa0] sm:$0xff] }
 0x32d   : > { %v7037_v16 = vunpack.c.l.b16 %v3065_v62  ;;  %v3103_v26 = vshll.u32 %v3097_v13, 16  ;;  %v3109_v18 = vshll.u32 %v3098_v30, 16  ;;  %3597 = vmatpush.bf16.msra.mxu0 %v5363_v48  ;;  %v3144_v13 = vunpack.c.l.b16 %v3085_v53  ;;  %v5361_v30 = vld [vmem:[%s7642_s8 + $0xa8] sm:$0xff] }
 0x32e   : > { %v7041_v38 = vsel %vm6443_vm12, %v4979_v43, %v3115_v44  ;;  %v3102_v12 = vrot.slane %v3100_v55, 4 }
 0x32f   : > { %3159 = vrot.lane.b32.xlu0 %v3153_v5, %s5478_s16  ;;  %v3131_v63 = vpack.c.b16 %v7037_v16, %v7004_v21  ;;  %v3105_v42 = vrot.slane %v3103_v26, 5  ;;  %v3168_v29 = vunpack.c.l.b16 %v7041_v38  ;;  %v3111_v9 = vrot.slane %v3109_v18, 5  ;;  %v5374_v5 = vld [vmem:[%s7642_s8 + $0x110] sm:$0xff] }
 0x330   : > { %v3171_v33 = vpack.c.b16 %v3145_v8, %v3144_v13  ;;  %v3147_v8 = vpack.c.b16 %v3140_v37, %v6473_v10  ;;  %v3119_v26 = vpack.c.b16 %v6927_v46, %v6848_v45 }
 0x331   : > { %3138 = vrot.lane.b32.xlu2 %v3131_v63, %s5478_s16  ;;  %v3106_v6 = vor.u32 %v3105_v42, %v3102_v12  ;;  %v3172_v19 = vpack.c.b16 %v3168_v29, %v3146_v35  ;;  %3598 = vmatpush.bf16.msra.mxu0 %v5362_v4  ;;  %v5373_v12 = vld [vmem:[%s7642_s8 + $0x108] sm:$0xff] }
 0x333   : > { %v3107_v7 = vrot.slane %v3106_v6, 4 }
 0x335   : > { %v3112_v56 = vsel %vm6520_vm9, %v3107_v7, %v3111_v9  ;;  %3599 = vmatpush.bf16.msra.mxu0 %v5361_v30  ;;  %v5372_v7 = vld [vmem:[%s7642_s8 + $0x100] sm:$0xff] }
 0x336   : > { %v7054_v49 = vunpack.c.l.b16 %v3112_v56  ;;  %v3149_v56 = vpack.c.b16 %v3144_v13, %v3143_v15 }
 0x337   : > { %3179 = vrot.lane.b32.xlu0 %v3172_v19, %s5478_s16 }
 0x338   : > { %v3167_v35 = vpack.c.b16 %v7054_v49, %v7037_v16  ;;  %v3182_v25 = vpack.c.b16 %v6574_v34, %v7054_v49 }
 0x339   : > { %3157 = vrot.lane.b32.xlu2 %v3152_v47, %s5478_s16  ;;  %3600 = vmatpush.bf16.msra.mxu0 %v5360_v22 }
 0x33d   : > { %3601 = vmatpush.bf16.msra.mxu0 %v5359_v52 }
 0x341   : > { %3177 = vrot.lane.b32.xlu2 %v3171_v33, %s5478_s16  ;;  %3602 = vmatpush.bf16.msra.mxu0 %v5358_v20 }
 0x345   : > { %3603 = vmatpush.bf16.msra.mxu0 %v5357_v0 }
 0x348   : > { %v3135_v62 = vpop.permute.xlu1 %3134 }
 0x349   : > { %v3192_v43 = vsel %vm2430_vm14, %v3118_v57, %v3135_v62  ;;  %3183 = vrot.lane.b32.xlu2 %v3182_v25, %s5478_s16  ;;  %3604 = vmatpush.bf16.msra.mxu0 %v5356_v50  ;;  %v5375_v57 = vld [vmem:[%s7642_s8 + $0x118] sm:$0xff] }
 0x34a   : > { %3552 = vmatmul.bf16.gmra.mxu2 %v3192_v43  ;;  %3634 = vmatmul.bf16.vlgmr.msra.gmra.mxu1 %v3192_v43 }
 0x34b   : > { %3659 = vmatpush.bf16.msra.mxu2 %v5375_v57 }
 0x34f   : > { %3660 = vmatpush.bf16.msra.mxu2 %v5374_v5 }
 0x350   : > { %v3156_v44 = vpop.permute.xlu1 %3155 }
 0x351   : > { %v3204_v55 = vsel %vm2430_vm14, %v3147_v8, %v3156_v44 }
 0x352   : > { %3576 = vmatmul.bf16.vlgmr.msrb.gmra.mxu3 %v3204_v55 }
 0x353   : > { %3661 = vmatpush.bf16.msra.mxu2 %v5373_v12 }
 0x357   : > { %3662 = vmatpush.bf16.msra.mxu2 %v5372_v7 }
 0x358   : > { %v3176_v47 = vpop.permute.xlu1 %3175 }
 0x359   : > { %v3224_v1 = vsel %vm2430_vm14, %v3165_v60, %v3176_v47 }
 0x38b   : > { %v3139_v37 = vpop.permute.xlu2 %3138 }
 0x38c   : > { %v3200_v19 = vsel %vm2430_vm14, %v3120_v32, %v3139_v37 }
 0x391   : > { %v3137_v63 = vpop.permute.xlu0 %3136 }
 0x392   : > { %v3196_v42 = vsel %vm2430_vm14, %v3119_v26, %v3137_v63 }
 0x393   : > { %v3158_v18 = vpop.permute.xlu2 %3157  ;;  %3557 = vmatmul.bf16.gmra.mxu2 %v3196_v42  ;;  %3639 = vmatmul.bf16.gmra.mxu1 %v3196_v42 }
 0x394   : > { %v3208_v6 = vsel %vm2430_vm14, %v6858_v31, %v3158_v18 }
 0x395   : > { %3581 = vmatmul.bf16.gmra.mxu3 %v3208_v6 }
 0x399   : > { %v3174_v45 = vpop.permute.xlu0 %3173 }
 0x39a   : > { %v3220_v46 = vsel %vm2430_vm14, %v3164_v58, %v3174_v45  ;;  %v3181_v58 = vpack.c.b16 %v6417_v36, %v7018_v23 }
 0x39b   : > { %3605 = vmatmul.bf16.vlgmr.msra.gmra.mxu0 %v3220_v46  ;;  %v3178_v40 = vpop.permute.xlu2 %3177 }
 0x39c   : > { %v3228_v17 = vsel %vm2430_vm14, %v3166_v41, %v3178_v40 }
 0x39e   : > { %v3162_v24 = vpop.permute.xlu1 %3161 }
 0x39f   : > { %v3216_v15 = vsel %vm2430_vm14, %v7027_v61, %v3162_v24 }
 0x3a1   : > { %v3160_v9 = vpop.permute.xlu0 %3159 }
 0x3a2   : > { %v3212_v59 = vsel %vm2430_vm14, %v3149_v56, %v3160_v9 }
 0x3a3   : > { %3562 = vmatmul.bf16.gmra.mxu2 %v3200_v19  ;;  %3644 = vmatmul.bf16.gmra.mxu1 %v3200_v19  ;;  %v3184_v39 = vpop.permute.xlu2 %3183 }
 0x3a4   : > { %v3236_v28 = vsel %vm2430_vm14, %v3181_v58, %v3184_v39 }
 0x3a5   : > { %3586 = vmatmul.bf16.gmra.mxu3 %v3212_v59  ;;  %v3548_v14 = vpop.f32.mrf.mxu2 }
 0x3a9   : > { %v3180_v11 = vpop.permute.xlu0 %3179 }
 0x3aa   : > { %v3232_v60 = vsel %vm2430_vm14, %v3167_v35, %v3180_v11 }
 0x3ab   : > { %3610 = vmatmul.bf16.gmra.mxu0 %v3224_v1 }
 0x3ad   : > { %v3550_v54 = vpop.f32.mrf.mxu2 }
 0x3b3   : > { %3649 = vmatmul.bf16.gmra.mxu1 %v3236_v28  ;;  %5124 = vmatmul.msk.bf16.vlgmr.msra.gmra.mxu2 %vm2430_vm14, %v6858_v31  ;;  %v3185_v31 = vpack.c.b16 %v6473_v10, %v3168_v29  ;;  %v7159_v29 = vld [vmem:[%s7643_s9] ss:$0 sm:$0xff] }
 0x3b4   : > { %v3549_v22 = vadd.f32 %v7159_v29, %v3548_v14  ;;  %v3551_v52 = vadd.f32 %v7159_v29, %v3550_v54 }
 0x3b5   : > { %3591 = vmatmul.bf16.gmra.mxu3 %v3216_v15 }
 0x3bb   : > { %3615 = vmatmul.bf16.gmra.mxu0 %v3228_v17 }
 0x3c3   : > { %5125 = vmatmul.msk.bf16.gmra.mxu2 %vm2430_vm14, %v3149_v56 }
 0x3c7   : > { %v3635_v16 = vpop.f32.mrf.mxu1 }
 0x3cb   : > { %3620 = vmatmul.bf16.gmra.mxu0 %v3232_v60 }
 0x3cd   : > { %v3553_v32 = vpop.f32.mrf.mxu2 }
 0x3ce   : > { %v3554_v18 = vadd.f32 %v7159_v29, %v3553_v32 }
 0x3cf   : > { %v3637_v13 = vpop.f32.mrf.mxu1 }
 0x3d3   : > { %5126 = vmatmul.msk.bf16.gmra.mxu2 %vm2430_vm14, %v7027_v61 }
 0x3d5   : > { %v3577_v21 = vpop.f32.mrf.mxu3  ;;  %v3555_v41 = vpop.f32.mrf.mxu2 }
 0x3d6   : > { %v3578_v43 = vadd.f32 %v3577_v21, %v3549_v22  ;;  %v3556_v24 = vadd.f32 %v7159_v29, %v3555_v41 }
 0x3dd   : > { %v3579_v23 = vpop.f32.mrf.mxu3 }
 0x3de   : > { %v3580_v50 = vadd.f32 %v3579_v23, %v3551_v52 }
 0x3e3   : > { %5127 = vmatmul.msk.bf16.gmra.mxu2 %vm2430_vm14, %v3185_v31 }
 0x410   : > { %v3640_v33 = vpop.f32.mrf.mxu1 }
 0x416   : > { %v3558_v48 = vpop.f32.mrf.mxu2 }
 0x417   : > { %v3559_v11 = vadd.f32 %v7159_v29, %v3558_v48 }
 0x418   : > { %v3606_v49 = vpop.f32.mrf.mxu0  ;;  %v3582_v35 = vpop.f32.mrf.mxu3 }
 0x419   : > { %v3607_v44 = vadd.f32 %v3606_v49, %v3578_v43  ;;  %v7162_v55 = vpop.f32.mrf.mxu1  ;;  %v3583_v9 = vadd.f32 %v3582_v35, %v3554_v18 }
 0x41b   : > { %v3636_v20 = vadd.f32 %v3635_v16, %v3607_v44 }
 0x41e   : > { %v3560_v53 = vpop.f32.mrf.mxu2 }
 0x41f   : > { %v3561_v54 = vadd.f32 %v7159_v29, %v3560_v53 }
 0x420   : > { %v3608_v4 = vpop.f32.mrf.mxu0  ;;  %v3584_v61 = vpop.f32.mrf.mxu3 }
 0x421   : > { %v3609_v26 = vadd.f32 %v3608_v4, %v3580_v50  ;;  %v3645_v7 = vpop.f32.mrf.mxu1  ;;  %v3585_v60 = vadd.f32 %v3584_v61, %v3556_v24 }
 0x423   : > { %v3638_v6 = vadd.f32 %v3637_v13, %v3609_v26 }
 0x426   : > { %v7154_v30 = vpop.f32.mrf.mxu2 }
 0x427   : > { %v3564_v44 = vadd.f32 %v7159_v29, %v7154_v30 }
 0x428   : > { %v3611_v38 = vpop.f32.mrf.mxu0  ;;  %v3587_v25 = vpop.f32.mrf.mxu3 }
 0x429   : > { %v3612_v47 = vadd.f32 %v3611_v38, %v3583_v9  ;;  %v3588_v41 = vadd.f32 %v3587_v25, %v3559_v11  ;;  %v3647_v4 = vpop.f32.mrf.mxu1 }
 0x42b   : > { %v3641_v14 = vadd.f32 %v3640_v33, %v3612_v47 }
 0x42e   : > { %v3565_v62 = vpop.f32.mrf.mxu2 }
 0x430   : > { %v3613_v8 = vpop.f32.mrf.mxu0  ;;  %v3589_v57 = vpop.f32.mrf.mxu3 }
 0x431   : > { %v3614_v49 = vadd.f32 %v3613_v8, %v3585_v60  ;;  %v3590_v13 = vadd.f32 %v3589_v57, %v3561_v54 }
 0x436   : > { %v3664_v0 = vpop.f32.mrf.mxu2 }
 0x437   : > { %v3665_v37 = vadd.f32 %v3664_v0, %v3636_v20  ;;  %v3566_v20 = vadd.f32 %v7159_v29, %v3565_v62 }
 0x438   : > { %v3616_v5 = vpop.f32.mrf.mxu0  ;;  %v3592_v1 = vpop.f32.mrf.mxu3 }
 0x439   : > { %vm3684_vm10 = vcmp.gt.f32.partialorder %v3665_v37, 0.0  ;;  %v3692_v12 = vmul.f32 0.1, %v3665_v37  ;;  %v3617_v33 = vadd.f32 %v3616_v5, %v3588_v41 }
 0x43b   : > { %v3700_v63 = vsel %vm3684_vm10, %v3665_v37, %v3692_v12  ;;  %v3643_v37 = vadd.f32 %v7162_v55, %v3614_v49  ;;  %v3646_v18 = vadd.f32 %v3645_v7, %v3617_v33 }
 0x43c   : > { %v3708_v42 = vpack.c.bf16 %v3700_v63, %v3700_v63 }
 0x43e   : > { %v3717_v45 = vshrl.u32 %v3708_v42, 16  ;;  %v3666_v46 = vpop.f32.mrf.mxu2  ;;  %v3720_v59 = vshll.u32 %v3708_v42, 16  ;;  %v3593_v42 = vadd.f32 %v3592_v1, %v3564_v44 }
 0x43f   : > { %v3667_v19 = vadd.f32 %v3666_v46, %v3638_v6 }
 0x440   : > { %v3719_v56 = vrot.slane %v3717_v45, 7  ;;  %v3618_v40 = vpop.f32.mrf.mxu0  ;;  %v3594_v0 = vpop.f32.mrf.mxu3 }
 0x441   : > { %vm3685_vm11 = vcmp.gt.f32.partialorder %v3667_v19, 0.0  ;;  %v3693_v39 = vmul.f32 0.1, %v3667_v19  ;;  %v3619_v50 = vadd.f32 %v3618_v40, %v3590_v13  ;;  %v3595_v62 = vadd.f32 %v3594_v0, %v3566_v20 }
 0x442   : > { %v3722_v58 = vor.u32 %v3720_v59, %v3719_v56 }
 0x443   : > { %v3701_v28 = vsel %vm3685_vm11, %v3667_v19, %v3693_v39  ;;  %v7194_v59 = vadd.f32 %v3647_v4, %v3619_v50 }
 0x444   : > { %v3780_v15 = vsel %vm5565_vm3, 0, %v3722_v58  ;;  %v3709_v17 = vpack.c.bf16 %v3701_v28, %v3701_v28  ;;  %v3650_v28 = vpop.f32.mrf.mxu1 }
 0x445   : > { %v3788_v31 = vsel %vm5570_vm5, %v3780_v15, 0 }
 0x446   : > { %v7173_v32 = vunpack.c.l.b16 %v3788_v31  ;;  %v3804_v21 = vunpack.c.h.b16 %v3788_v31  ;;  %v3724_v23 = vshrl.u32 %v3709_v17, 16  ;;  %v3669_v16 = vpop.f32.mrf.mxu2  ;;  %v3727_v38 = vshll.u32 %v3709_v17, 16 }
 0x447   : > { %v3670_v35 = vadd.f32 %v3669_v16, %v3641_v14 }
 0x448   : > { %v7177_v48 = vpack.c.b16 %v7173_v32, %v7173_v32  ;;  %v3726_v61 = vrot.slane %v3724_v23, 7  ;;  %v3621_v22 = vpop.f32.mrf.mxu0  ;;  %v7179_v43 = vpack.c.b16 %v3804_v21, %v3804_v21 }
 0x449   : > { %vm3686_vm4 = vcmp.gt.f32.partialorder %v3670_v35, 0.0  ;;  %v3694_v53 = vmul.f32 0.1, %v3670_v35  ;;  %v3622_v55 = vadd.f32 %v3621_v22, %v3593_v42 }
 0x44a   : > { %v3729_v25 = vor.u32 %v3727_v38, %v3726_v61  ;;  %v3832_v8 = vshrl.u32 %v7177_v48, 16  ;;  %v3835_v52 = vshll.u32 %v7177_v48, 16  ;;  %v3841_v6 = vshll.u32 %v7179_v43, 16 }
 0x44b   : > { %v3702_v57 = vsel %vm3686_vm4, %v3670_v35, %v3694_v53  ;;  %v7207_v21 = vadd.f32 %v3650_v28, %v3622_v55  ;;  %v5128_v23 = vrot.slane %v7177_v48, 9 }
 0x44c   : > { %v3781_v5 = vsel %vm5565_vm3, 0, %v3729_v25  ;;  %v3710_v26 = vpack.c.bf16 %v3702_v57, %v3702_v57  ;;  %v3834_v12 = vrot.slane %v3832_v8, 4  ;;  %v3837_v63 = vrot.slane %v3835_v52, 5  ;;  %v3652_v55 = vpop.f32.mrf.mxu1 }
 0x44d   : > { %v3789_v30 = vsel %vm5570_vm5, %v3781_v5, 0  ;;  %v3843_v24 = vrot.slane %v3841_v6, 5 }
 0x44e   : > { %v7192_v45 = vunpack.c.l.b16 %v3789_v30  ;;  %v3806_v29 = vunpack.c.h.b16 %v3789_v30  ;;  %v3731_v46 = vshrl.u32 %v3710_v26, 16  ;;  %v3671_v9 = vpop.f32.mrf.mxu2  ;;  %v3838_v56 = vor.u32 %v3837_v63, %v3834_v12 }
 0x44f   : > { %v3672_v19 = vadd.f32 %v3671_v9, %v3643_v37  ;;  %v3734_v1 = vshll.u32 %v3710_v26, 16 }
 0x450   : > { %v7198_v40 = vpack.c.b16 %v7192_v45, %v7192_v45  ;;  %v3733_v47 = vrot.slane %v3731_v46, 7  ;;  %v7200_v7 = vpack.c.b16 %v3806_v29, %v3806_v29  ;;  %v3839_v58 = vrot.slane %v3838_v56, 4  ;;  %v3623_v17 = vpop.f32.mrf.mxu0 }
 0x451   : > { %vm3687_vm2 = vcmp.gt.f32.partialorder %v3672_v19, 0.0  ;;  %v3695_v39 = vmul.f32 0.1, %v3672_v19  ;;  %v3624_v13 = vadd.f32 %v3623_v17, %v3595_v62 }
 0x452   : > { %v3736_v15 = vor.u32 %v3734_v1, %v3733_v47  ;;  %v3846_v11 = vshrl.u32 %v7198_v40, 16  ;;  %v3849_v60 = vshll.u32 %v7198_v40, 16  ;;  %v3855_v31 = vshll.u32 %v7200_v7, 16 }
 0x453   : > { %v3703_v14 = vsel %vm3687_vm2, %v3672_v19, %v3695_v39  ;;  %v3844_v54 = vsel %vm6520_vm9, %v3839_v58, %v3843_v24  ;;  %v5129_v38 = vrot.slane %v7198_v40, 9  ;;  %v3935_v0 = vrot.slane %v7200_v7, 5 }
 0x454   : > { %v3782_v16 = vsel %vm5565_vm3, 0, %v3736_v15  ;;  %v3711_v41 = vpack.c.bf16 %v3703_v14, %v3703_v14  ;;  %v7212_v49 = vunpack.c.l.b16 %v3844_v54  ;;  %v3848_v35 = vrot.slane %v3846_v11, 4 }
 0x455   : > { %v3790_v4 = vsel %vm5570_vm5, %v3782_v16, 0  ;;  %v3851_v61 = vrot.slane %v3849_v60, 5  ;;  %v3857_v25 = vrot.slane %v3855_v31, 5  ;;  %v7235_v39 = vadd.f32 %v3652_v55, %v3624_v13 }
 0x456   : > { %v7217_v22 = vunpack.c.l.b16 %v3790_v4  ;;  %v3808_v33 = vunpack.c.h.b16 %v3790_v4  ;;  %v3738_v53 = vshrl.u32 %v3711_v41, 16  ;;  %v3674_v44 = vpop.f32.mrf.mxu2  ;;  %v3991_v52 = vpack.c.b16 %v7212_v49, %v6574_v34 }
 0x457   : > { %v3675_v8 = vadd.f32 %v3674_v44, %v3646_v18  ;;  %v3852_v20 = vor.u32 %v3851_v61, %v3848_v35  ;;  %v3741_v37 = vshll.u32 %v3711_v41, 16  ;;  %v4014_v58 = vpack.c.b16 %v7192_v45, %v7173_v32 }
 0x458   : > { %v3821_v50 = vpack.c.b16 %v7217_v22, %v7217_v22  ;;  %v3740_v57 = vrot.slane %v3738_v53, 7  ;;  %v3822_v5 = vpack.c.b16 %v3808_v33, %v3808_v33  ;;  %3995 = vrot.lane.b32.xlu1 %v3991_v52, %s5478_s16  ;;  %v3981_v63 = vpack.c.b16 %v7217_v22, %v7192_v45 }
 0x459   : > { %vm3688_vm6 = vcmp.gt.f32.partialorder %v3675_v8, 0.0  ;;  %v3696_v26 = vmul.f32 0.1, %v3675_v8  ;;  %v3853_v12 = vrot.slane %v3852_v20, 4  ;;  %v7243_v11 = vsel %vm6443_vm12, %v5129_v38, %v3935_v0 }
 0x45a   : > { %v3743_v42 = vor.u32 %v3741_v37, %v3740_v57  ;;  %v3860_v30 = vshrl.u32 %v3821_v50, 16  ;;  %v3863_v18 = vshll.u32 %v3821_v50, 16  ;;  %v3869_v6 = vshll.u32 %v3822_v5, 16 }
 0x45b   : > { %v3704_v29 = vsel %vm3688_vm6, %v3675_v8, %v3696_v26  ;;  %v3858_v62 = vsel %vm6520_vm9, %v3853_v12, %v3857_v25  ;;  %v5130_v46 = vrot.slane %v3821_v50, 9  ;;  %v3939_v9 = vrot.slane %v3822_v5, 5 }
 0x45c   : > { %v3783_v19 = vsel %vm5565_vm3, 0, %v3743_v42  ;;  %v3712_v56 = vpack.c.bf16 %v3704_v29, %v3704_v29  ;;  %v3862_v40 = vrot.slane %v3860_v30, 4  ;;  %v3865_v47 = vrot.slane %v3863_v18, 5 }
 0x45d   : > { %v3791_v1 = vsel %vm5570_vm5, %v3783_v19, 0  ;;  %v7233_v7 = vunpack.c.l.b16 %v3858_v62  ;;  %v3871_v31 = vrot.slane %v3869_v6, 5  ;;  %v7248_v54 = vsel %vm6443_vm12, %v5130_v46, %v3939_v9 }
 0x45e   : > { %v7239_v24 = vunpack.c.l.b16 %v3791_v1  ;;  %v3745_v28 = vshrl.u32 %v3712_v56, 16  ;;  %v3676_v15 = vpop.f32.mrf.mxu2  ;;  %v3866_v17 = vor.u32 %v3865_v47, %v3862_v40  ;;  %v3810_v14 = vunpack.c.h.b16 %v3791_v1 }
 0x45f   : > { %v3677_v60 = vadd.f32 %v3676_v15, %v7194_v59  ;;  %v3748_v41 = vshll.u32 %v3712_v56, 16  ;;  %v4027_v38 = vpack.c.b16 %v7233_v7, %v7212_v49  ;;  %v4004_v62 = vunpack.c.l.b16 %v7243_v11 }
 0x460   : > { %v3747_v16 = vrot.slane %v3745_v28, 7  ;;  %v3867_v35 = vrot.slane %v3866_v17, 4  ;;  %v3823_v4 = vpack.c.b16 %v7239_v24, %v7239_v24  ;;  %v3824_v61 = vpack.c.b16 %v3810_v14, %v3810_v14 }
 0x461   : > { %vm3689_vm7 = vcmp.gt.f32.partialorder %v3677_v60, 0.0  ;;  %v3697_v13 = vmul.f32 0.1, %v3677_v60  ;;  %v4005_v55 = vunpack.c.l.b16 %v7248_v54 }
 0x462   : > { %v3750_v33 = vor.u32 %v3748_v41, %v3747_v16  ;;  %v3872_v59 = vsel %vm6520_vm9, %v3867_v35, %v3871_v31  ;;  %v5131_v53 = vrot.slane %v3823_v4, 9  ;;  %v3874_v44 = vshrl.u32 %v3823_v4, 16 }
 0x463   : > { %v3705_v25 = vsel %vm3689_vm7, %v3677_v60, %v3697_v13  ;;  %v7256_v8 = vunpack.c.l.b16 %v3872_v59  ;;  %v3943_v52 = vrot.slane %v3824_v61, 5  ;;  %v3877_v20 = vshll.u32 %v3823_v4, 16 }
 0x464   : > { %v3784_v0 = vsel %vm5565_vm3, 0, %v3750_v33  ;;  %v3713_v50 = vpack.c.bf16 %v3705_v25, %v3705_v25  ;;  %v3876_v57 = vrot.slane %v3874_v44, 4  ;;  %v3883_v37 = vshll.u32 %v3824_v61, 16 }
 0x465   : > { %v3792_v5 = vsel %vm5570_vm5, %v3784_v0, 0  ;;  %v3992_v26 = vpack.c.b16 %v7256_v8, %v7233_v7  ;;  %v7266_v12 = vsel %vm6443_vm12, %v5131_v53, %v3943_v52  ;;  %v3879_v42 = vrot.slane %v3877_v20, 5 }
 0x466   : > { %v7268_v30 = vunpack.c.l.b16 %v3792_v5  ;;  %v3812_v18 = vunpack.c.h.b16 %v3792_v5  ;;  %v3752_v6 = vshrl.u32 %v3713_v50, 16  ;;  %v3679_v29 = vpop.f32.mrf.mxu2  ;;  %v3755_v46 = vshll.u32 %v3713_v50, 16 }
 0x467   : > { %v3680_v9 = vadd.f32 %v3679_v29, %v7207_v21  ;;  %3997 = vrot.lane.b32.xlu0 %v3992_v26, %s5478_s16  ;;  %v3880_v19 = vor.u32 %v3879_v42, %v3876_v57  ;;  %v4006_v47 = vunpack.c.l.b16 %v7266_v12  ;;  %v3885_v17 = vrot.slane %v3883_v37, 5 }
 0x468   : > { %v3825_v56 = vpack.c.b16 %v7268_v30, %v7268_v30  ;;  %v3754_v40 = vrot.slane %v3752_v6, 7  ;;  %v3826_v1 = vpack.c.b16 %v3812_v18, %v3812_v18  ;;  %v3982_v25 = vpack.c.b16 %v7268_v30, %v7239_v24 }
 0x469   : > { %vm3690_vm0 = vcmp.gt.f32.partialorder %v3680_v9, 0.0  ;;  %v3698_v28 = vmul.f32 0.1, %v3680_v9  ;;  %v3881_v15 = vrot.slane %v3880_v19, 4  ;;  %v7303_v29 = vpack.c.b16 %v4005_v55, %v4004_v62 }
 0x46a   : > { %v3757_v60 = vor.u32 %v3755_v46, %v3754_v40  ;;  %v3888_v31 = vshrl.u32 %v3825_v56, 16  ;;  %v3891_v14 = vshll.u32 %v3825_v56, 16  ;;  %v3897_v21 = vshll.u32 %v3826_v1, 16 }
 0x46b   : > { %v3706_v16 = vsel %vm3690_vm0, %v3680_v9, %v3698_v28  ;;  %v3886_v54 = vsel %vm6520_vm9, %v3881_v15, %v3885_v17  ;;  %v5132_v41 = vrot.slane %v3825_v56, 9  ;;  %v3947_v35 = vrot.slane %v3826_v1, 5 }
 0x46c   : > { %v3714_v4 = vpack.c.bf16 %v3706_v16, %v3706_v16  ;;  %v3890_v13 = vrot.slane %v3888_v31, 4  ;;  %v3893_v61 = vrot.slane %v3891_v14, 5  ;;  %v3899_v33 = vrot.slane %v3897_v21, 5 }
 0x46d   : > { %v7279_v59 = vunpack.c.l.b16 %v3886_v54  ;;  %v3785_v53 = vsel %vm5565_vm3, 0, %v3757_v60  ;;  %v7285_v44 = vsel %vm6443_vm12, %v5132_v41, %v3947_v35  ;;  %v3931_v56 = vrot.slane %v7179_v43, 5 }
 0x46e   : > { %v3759_v52 = vshrl.u32 %v3714_v4, 16  ;;  %v3762_v20 = vshll.u32 %v3714_v4, 16  ;;  %v3681_v0 = vpop.f32.mrf.mxu2  ;;  %v3894_v50 = vor.u32 %v3893_v61, %v3890_v13  ;;  %v3793_v57 = vsel %vm5570_vm5, %v3785_v53, 0 }
 0x46f   : > { %v3682_v37 = vadd.f32 %v3681_v0, %v7235_v39  ;;  %4018 = vrot.lane.b32.xlu0 %v4014_v58, %s5478_s16  ;;  %v7296_v5 = vunpack.c.l.b16 %v3793_v57  ;;  %v3814_v26 = vunpack.c.h.b16 %v3793_v57  ;;  %v4007_v12 = vunpack.c.l.b16 %v7285_v44  ;;  %v5376_v44 = vld [vmem:[%s7644_s10] sm:$0xff] }
 0x470   : > { %v3761_v42 = vrot.slane %v3759_v52, 7  ;;  %v3895_v18 = vrot.slane %v3894_v50, 4  ;;  %v4028_v6 = vpack.c.b16 %v7279_v59, %v7256_v8  ;;  %v4033_v14 = vpack.c.b16 %v4006_v47, %v4005_v55 }
 0x471   : > { %vm3691_vm10 = vcmp.gt.f32.partialorder %v3682_v37, 0.0  ;;  %v3699_v39 = vmul.f32 0.1, %v3682_v37  ;;  %v3827_v46 = vpack.c.b16 %v7296_v5, %v7296_v5  ;;  %v3828_v58 = vpack.c.b16 %v3814_v26, %v3814_v26 }
 0x472   : > { %v3764_v9 = vor.u32 %v3762_v20, %v3761_v42  ;;  %v3900_v19 = vsel %vm6520_vm9, %v3895_v18, %v3899_v33  ;;  %v7312_v40 = vpack.c.b16 %v4007_v12, %v4006_v47  ;;  %v7328_v61 = vsel %vm6443_vm12, %v5128_v23, %v3931_v56 }
 0x473   : > { %v3707_v1 = vsel %vm3691_vm10, %v3682_v37, %v3699_v39  ;;  %v7314_v28 = vunpack.c.l.b16 %v3900_v19  ;;  %v3902_v15 = vshrl.u32 %v3827_v46, 16  ;;  %v3905_v17 = vshll.u32 %v3827_v46, 16 }
 0x474   : > { %v3786_v60 = vsel %vm5565_vm3, 0, %v3764_v9  ;;  %v3715_v31 = vpack.c.bf16 %v3707_v1, %v3707_v1  ;;  %v3911_v21 = vshll.u32 %v3828_v58, 16  ;;  %v5133_v33 = vrot.slane %v3827_v46, 9 }
 0x475   : > { %v3794_v16 = vsel %vm5570_vm5, %v3786_v60, 0  ;;  %v3993_v43 = vpack.c.b16 %v7314_v28, %v7279_v59  ;;  %v3904_v54 = vrot.slane %v3902_v15, 4  ;;  %v3907_v41 = vrot.slane %v3905_v17, 5 }
 0x476   : > { %v7322_v35 = vunpack.c.l.b16 %v3794_v16  ;;  %v3816_v4 = vunpack.c.h.b16 %v3794_v16  ;;  %v3766_v13 = vshrl.u32 %v3715_v31, 16  ;;  %v3769_v55 = vshll.u32 %v3715_v31, 16 }
 0x477   : > { %4038 = vrot.lane.b32.xlu0 %v4033_v14, %s5478_s16  ;;  %3999 = vrot.lane.b32.xlu2 %v3993_v43, %s5478_s16  ;;  %v3908_v47 = vor.u32 %v3907_v41, %v3904_v54  ;;  %v3951_v53 = vrot.slane %v3828_v58, 5  ;;  %v3913_v57 = vrot.slane %v3911_v21, 5  ;;  %v4003_v37 = vunpack.c.l.b16 %v7328_v61 }
 0x478   : > { %v3829_v52 = vpack.c.b16 %v7322_v35, %v7322_v35  ;;  %v3768_v20 = vrot.slane %v3766_v13, 7  ;;  %v3830_v0 = vpack.c.b16 %v3816_v4, %v3816_v4  ;;  %v3983_v48 = vpack.c.b16 %v7322_v35, %v7296_v5  ;;  %v5383_v4 = vld [vmem:[%s7644_s10 + $0x38] sm:$0xff] }
 0x479   : > { %v3909_v50 = vrot.slane %v3908_v47, 4  ;;  %v7341_v39 = vsel %vm6443_vm12, %v5133_v33, %v3951_v53  ;;  %v4032_v17 = vpack.c.b16 %v4004_v62, %v4003_v37  ;;  %v5399_v13 = vld [vmem:[%s7644_s10 + $0xb8] sm:$0xff]  ;;  %4402 = vmatpush.bf16.msra.mxu3 %v5383_v4  ;;  %v5396_v4 = vld [vmem:[%s7644_s10 + $0xa0] sm:$0xff]  ;;  %v4010_v49 = vpack.c.b16 %v4003_v37, %v6473_v10 }
 0x47a   : > { %v3771_v23 = vor.u32 %v3769_v55, %v3768_v20  ;;  %v3916_v26 = vshrl.u32 %v3829_v52, 16  ;;  %v3919_v42 = vshll.u32 %v3829_v52, 16  ;;  %v5134_v46 = vrot.slane %v3829_v52, 9  ;;  %v5382_v52 = vld [vmem:[%s7644_s10 + $0x30] sm:$0xff]  ;;  %v5407_v20 = vld [vmem:[%s7644_s10 + $0xf8] sm:$0xff]  ;;  %4460 = vmatpush.bf16.msrb.mxu1 %v5399_v13 }
 0x47b   : > { %v3914_v18 = vsel %vm6520_vm9, %v3909_v50, %v3913_v57  ;;  %v3955_v58 = vrot.slane %v3830_v0, 5  ;;  %v3925_v1 = vshll.u32 %v3830_v0, 16  ;;  %v4008_v3 = vunpack.c.l.b16 %v7341_v39  ;;  %v5391_v50 = vld [vmem:[%s7644_s10 + $0x78] sm:$0xff]  ;;  %4489 = vmatpush.bf16.msrb.mxu2 %v5407_v20 }
 0x47c   : > { %v3787_v9 = vsel %vm5565_vm3, 0, %v3771_v23  ;;  %v3918_v19 = vrot.slane %v3916_v26, 4  ;;  %v3921_v56 = vrot.slane %v3919_v42, 5  ;;  %v7351_v60 = vunpack.c.l.b16 %v3914_v18  ;;  %v5398_v42 = vld [vmem:[%s7644_s10 + $0xb0] sm:$0xff]  ;;  %4431 = vmatpush.bf16.msrb.mxu0 %v5391_v50  ;;  %v5395_v39 = vld [vmem:[%s7644_s10 + $0x98] sm:$0xff] }
 0x47d   : > { %v3795_v15 = vsel %vm5570_vm5, %v3787_v9, 0  ;;  %v7355_v31 = vsel %vm6443_vm12, %v5134_v46, %v3955_v58  ;;  %v3927_v54 = vrot.slane %v3925_v1, 5  ;;  %v5406_v18 = vld [vmem:[%s7644_s10 + $0xf0] sm:$0xff]  ;;  %v4016_v46 = vpack.c.b16 %v7296_v5, %v7268_v30  ;;  %4403 = vmatpush.bf16.msra.mxu3 %v5382_v52  ;;  %v5379_v52 = vld [vmem:[%s7644_s10 + $0x18] sm:$0xff] }
 0x47e   : > { %v7357_v14 = vunpack.c.l.b16 %v3795_v15  ;;  %v3959_v2 = vunpack.c.h.b16 %v3795_v15  ;;  %v3922_v21 = vor.u32 %v3921_v56, %v3918_v19  ;;  %v4009_v16 = vunpack.c.l.b16 %v7355_v31  ;;  %v5390_v9 = vld [vmem:[%s7644_s10 + $0x70] sm:$0xff]  ;;  %v5381_v56 = vld [vmem:[%s7644_s10 + $0x28] sm:$0xff]  ;;  %4461 = vmatpush.bf16.msrb.mxu1 %v5398_v42  ;;  %v5388_v31 = vld [vmem:[%s7644_s10 + $0x60] sm:$0xff] }
 0x47f   : > { %4036 = vrot.lane.b32.xlu2 %v4032_v17, %s5478_s16  ;;  %v4029_v11 = vpack.c.b16 %v7351_v60, %v7314_v28  ;;  %4490 = vmatpush.bf16.msrb.mxu2 %v5406_v18  ;;  %v5397_v17 = vld [vmem:[%s7644_s10 + $0xa8] sm:$0xff]  ;;  %v5387_v42 = vld [vmem:[%s7644_s10 + $0x58] sm:$0xff]  ;;  %vm4573_vm3 = vcmask 1047556   ;;  %vm4672_vm0 = vcmask 122880  }
 0x480   : > { %v7366_v62 = vpack.c.b16 %v7357_v14, %v7357_v14  ;;  %v3923_v43 = vrot.slane %v3922_v21, 4  ;;  %v7368_v41 = vpack.c.b16 %v3959_v2, %v3959_v2  ;;  %v7380_v55 = vpack.c.b16 %v4009_v16, %v4008_v3  ;;  %v5405_v2 = vld [vmem:[%s7644_s10 + $0xe8] sm:$0xff]  ;;  %4432 = vmatpush.bf16.msrb.mxu0 %v5390_v9  ;;  %v5392_v9 = vld [vmem:[%s7644_s10 + $0x80] sm:$0xff] }
 0x481   : > { %4404 = vmatpush.bf16.msra.mxu3 %v5381_v56  ;;  %v4017_v51 = vpack.c.b16 %v7357_v14, %v7322_v35  ;;  %v5393_v18 = vld [vmem:[%s7644_s10 + $0x88] sm:$0xff]  ;;  %v4044_v59 = vpack.c.b16 %v6417_v36, %v7357_v14 }
 0x482   : > { %v3928_v47 = vsel %vm6520_vm9, %v3923_v43, %v3927_v54  ;;  %v3963_v33 = vshrl.u32 %v7366_v62, 16  ;;  %v3966_v53 = vshll.u32 %v7366_v62, 16  ;;  %v3972_v26 = vshll.u32 %v7368_v41, 16  ;;  %v5380_v43 = vld [vmem:[%s7644_s10 + $0x20] sm:$0xff]  ;;  %4462 = vmatpush.bf16.msrb.mxu1 %v5397_v17  ;;  %v5385_v56 = vld [vmem:[%s7644_s10 + $0x48] sm:$0xff] }
 0x483   : > { %v7392_v0 = vunpack.c.l.b16 %v3928_v47  ;;  %4491 = vmatpush.bf16.msrb.mxu2 %v5405_v2  ;;  %v5404_v47 = vld [vmem:[%s7644_s10 + $0xe0] sm:$0xff]  ;;  %v5135_v20 = vrot.slane %v7366_v62, 9  ;;  %v3978_v50 = vrot.slane %v7368_v41, 5  ;;  %v5402_v41 = vld [vmem:[%s7644_s10 + $0xd0] sm:$0xff] }
 0x484   : > { %v3965_v57 = vrot.slane %v3963_v33, 4  ;;  %v3968_v23 = vrot.slane %v3966_v53, 5  ;;  %v3974_v15 = vrot.slane %v3972_v26, 5  ;;  %v4015_v53 = vpack.c.b16 %v7239_v24, %v7217_v22  ;;  %4433 = vmatpush.bf16.msrb.mxu0 %v5389_v27  ;;  %v5409_v22 = vld [vmem:[%s7644_s10 + $0x108] sm:$0xff] }
 0x485   : > { %v3994_v58 = vpack.c.b16 %v7392_v0, %v7351_v60  ;;  %4405 = vmatpush.bf16.msra.mxu3 %v5380_v43  ;;  %v7463_v26 = vsel %vm6443_vm12, %v5135_v20, %v3978_v50 }
 0x486   : > { %v3969_v19 = vor.u32 %v3968_v23, %v3965_v57  ;;  %4463 = vmatpush.bf16.msrb.mxu1 %v5396_v4  ;;  %v4034_v57 = vpack.c.b16 %v4008_v3, %v4007_v12  ;;  %v5377_v23 = vld [vmem:[%s7644_s10 + $0x8] sm:$0xff]  ;;  %v4031_v62 = vunpack.c.l.b16 %v7463_v26  ;;  %v5403_v3 = vld [vmem:[%s7644_s10 + $0xd8] sm:$0xff] }
 0x487   : > { %4022 = vrot.lane.b32.xlu2 %v4016_v46, %s5478_s16  ;;  %4001 = vrot.lane.b32.xlu1 %v3994_v58, %s5478_s16  ;;  %v5401_v46 = vld [vmem:[%s7644_s10 + $0xc8] sm:$0xff]  ;;  %v5386_v58 = vld [vmem:[%s7644_s10 + $0x50] sm:$0xff] }
 0x488   : > { %v3970_v1 = vrot.slane %v3969_v19, 4  ;;  %4492 = vmatpush.bf16.msrb.mxu2 %v5404_v47  ;;  %v4035_v12 = vpack.c.b16 %v4031_v62, %v4009_v16  ;;  %v5394_v16 = vld [vmem:[%s7644_s10 + $0x90] sm:$0xff]  ;;  %4434 = vmatpush.bf16.msrb.mxu0 %v5388_v31  ;;  %v5400_v19 = vld [vmem:[%s7644_s10 + $0xc0] sm:$0xff] }
 0x489   : > { %4406 = vmatpush.bf16.msra.mxu3 %v5379_v52  ;;  %v5410_v47 = vld [vmem:[%s7644_s10 + $0x110] sm:$0xff] }
 0x48a   : > { %v3975_v21 = vsel %vm6520_vm9, %v3970_v1, %v3974_v15  ;;  %4464 = vmatpush.bf16.msrb.mxu1 %v5395_v39  ;;  %v5384_v1 = vld [vmem:[%s7644_s10 + $0x40] sm:$0xff]  ;;  %v3980_v15 = vpack.c.b16 %v7173_v32, %v6417_v36  ;;  %v5411_v32 = vld [vmem:[%s7644_s10 + $0x118] sm:$0xff]  ;;  %vm4641_vm9 = vcmask 195584  }
 0x48b   : > { %v7427_v54 = vunpack.c.l.b16 %v3975_v21 }
 0x48c   : > { %4493 = vmatpush.bf16.msrb.mxu2 %v5403_v3  ;;  %4435 = vmatpush.bf16.msrb.mxu0 %v5387_v42 }
 0x48d   : > { %v4045_v13 = vpack.c.b16 %v6574_v34, %v7427_v54  ;;  %v4030_v33 = vpack.c.b16 %v7427_v54, %v7392_v0  ;;  %v5378_v34 = vld [vmem:[%s7644_s10 + $0x10] sm:$0xff]  ;;  %v5481_v54 = vmov 1934713408  }
 0x48e   : > { %4407 = vmatpush.bf16.msra.mxu3 %v5378_v34  ;;  %4465 = vmatpush.bf16.msrb.mxu1 %v5394_v16 }
 0x48f   : > { %4046 = vrot.lane.b32.xlu0 %v4045_v13, %s5478_s16  ;;  %4024 = vrot.lane.b32.xlu2 %v4017_v51, %s5478_s16 }
 0x490   : > { %4020 = vrot.lane.b32.xlu1 %v4015_v53, %s5478_s16  ;;  %4494 = vmatpush.bf16.msrb.mxu2 %v5402_v41 }
 0x491   : > { %4436 = vmatpush.bf16.msrb.mxu0 %v5386_v58 }
 0x492   : > { %4408 = vmatpush.bf16.msra.mxu3 %v5377_v23  ;;  %4466 = vmatpush.bf16.msrb.mxu1 %v5393_v18 }
 0x494   : > { %4495 = vmatpush.bf16.msrb.mxu2 %v5401_v46 }
 0x495   : > { %4437 = vmatpush.bf16.msrb.mxu0 %v5385_v56 }
 0x496   : > { %4409 = vmatpush.bf16.msra.mxu3 %v5376_v44  ;;  %4467 = vmatpush.bf16.msrb.mxu1 %v5392_v9 }
 0x498   : > { %4040 = vrot.lane.b32.xlu1 %v4034_v57, %s5478_s16  ;;  %4496 = vmatpush.bf16.msrb.mxu2 %v5400_v19  ;;  %v5448_v19 = vld [vmem:[%s7645_s11] ss:$0 sm:$0xff] }
 0x499   : > { %4438 = vmatpush.bf16.msrb.mxu0 %v5384_v1 }
 0x49a   : > { %4522 = vmatpush.bf16.msrb.mxu3 %v5411_v32 }
 0x49e   : > { %4523 = vmatpush.bf16.msrb.mxu3 %v5410_v47 }
 0x4a0   : > { %4042 = vrot.lane.b32.xlu1 %v4035_v12, %s5478_s16 }
 0x4a2   : > { %4524 = vmatpush.bf16.msrb.mxu3 %v5409_v22 }
 0x4ca   : > { %v3996_v17 = vpop.permute.xlu1 %3995 }
 0x4cb   : > { %v4051_v2 = vsel %vm2430_vm14, %v3980_v15, %v3996_v17 }
 0x4cc   : > { %4410 = vmatmul.bf16.vlgmr.msra.gmra.mxu3 %v4051_v2 }
 0x4d1   : > { %v4000_v21 = vpop.permute.xlu2 %3999 }
 0x4d2   : > { %v4059_v61 = vsel %vm2430_vm14, %v3982_v25, %v4000_v21 }
 0x4d9   : > { %v4037_v43 = vpop.permute.xlu2 %4036  ;;  %v3998_v4 = vpop.permute.xlu0 %3997 }
 0x4da   : > { %v4083_v13 = vsel %vm2430_vm14, %v4027_v38, %v4037_v43  ;;  %v4055_v51 = vsel %vm2430_vm14, %v3981_v63, %v3998_v4  ;;  %v5408_v63 = vld [vmem:[%s7644_s10 + $0x100] sm:$0xff] }
 0x4db   : > { %4468 = vmatmul.bf16.vlgmr.msrb.gmra.mxu1 %v4083_v13  ;;  %4497 = vmatmul.bf16.vlgmr.msrb.gmra.mxu2 %v4055_v51 }
 0x4dc   : > { %4415 = vmatmul.bf16.gmra.mxu3 %v4055_v51 }
 0x4dd   : > { %4525 = vmatpush.bf16.msrb.mxu3 %v5408_v63 }
 0x4e1   : > { %v4019_v7 = vpop.permute.xlu0 %4018  ;;  %v4023_v35 = vpop.permute.xlu2 %4022 }
 0x4e2   : > { %v4067_v45 = vsel %vm2430_vm14, %v4010_v49, %v4019_v7 }
 0x4e3   : > { %4439 = vmatmul.bf16.vlgmr.msrb.gmra.mxu0 %v4067_v45 }
 0x4e9   : > { %v4039_v38 = vpop.permute.xlu0 %4038  ;;  %v4025_v60 = vpop.permute.xlu2 %4024 }
 0x4ea   : > { %v4087_v37 = vsel %vm2430_vm14, %v4028_v6, %v4039_v38  ;;  %v4079_v14 = vsel %vm2430_vm14, %v7380_v55, %v4025_v60 }
 0x4eb   : > { %4473 = vmatmul.bf16.gmra.mxu1 %v4087_v37  ;;  %4502 = vmatmul.bf16.gmra.mxu2 %v4059_v61 }
 0x4ec   : > { %4420 = vmatmul.bf16.gmra.mxu3 %v4059_v61 }
 0x4f9   : > { %v4002_v53 = vpop.permute.xlu1 %4001 }
 0x4fa   : > { %v4063_v52 = vsel %vm2430_vm14, %v3983_v48, %v4002_v53  ;;  %v4075_v48 = vsel %vm2430_vm14, %v7312_v40, %v4023_v35 }
 0x4fb   : > { %4507 = vmatmul.bf16.gmra.mxu2 %v4063_v52 }
 0x4fc   : > { %4425 = vmatmul.bf16.gmra.mxu3 %v4063_v52 }
 0x501   : > { %v4047_v8 = vpop.permute.xlu0 %4046 }
 0x502   : > { %v4021_v24 = vpop.permute.xlu1 %4020  ;;  %v4099_v6 = vsel %vm2430_vm14, %v4044_v59, %v4047_v8 }
 0x503   : > { %v4071_v30 = vsel %vm2430_vm14, %v7303_v29, %v4021_v24 }
 0x504   : > { %4444 = vmatmul.bf16.gmra.mxu0 %v4071_v30 }
 0x50a   : > { %v4041_v25 = vpop.permute.xlu1 %4040 }
 0x50b   : > { %v4091_v5 = vsel %vm2430_vm14, %v4029_v11, %v4041_v25  ;;  %4512 = vmatmul.bf16.gmra.mxu2 %v4099_v6 }
 0x50c   : > { %4478 = vmatmul.bf16.gmra.mxu1 %v4091_v5  ;;  %5280 = vmatmul.msk.bf16.vlgmr.msrb.gmra.mxu3 %vm2430_vm14, %v7303_v29  ;;  %v4048_v29 = vpack.c.b16 %v6473_v10, %v4031_v62 }
 0x512   : > { %v4043_v36 = vpop.permute.xlu1 %4042 }
 0x513   : > { %v4095_v28 = vsel %vm2430_vm14, %v4030_v33, %v4043_v36  ;;  %v4571_v33 = vld [vmem:[%s446_s18] sm:$0xff] }
 0x514   : > { %4449 = vmatmul.bf16.gmra.mxu0 %v4075_v48  ;;  %v4572_v62 = vrot.slane %v4571_v33, 4 }
 0x516   : > { %v4574_v12 = vsel %vm4573_vm3, 0.0, %v4572_v62 }
 0x51c   : > { %4483 = vmatmul.bf16.gmra.mxu1 %v4095_v28  ;;  %5281 = vmatmul.msk.bf16.gmra.mxu3 %vm2430_vm14, %v7312_v40  ;;  %v5480_v40 = vmov 1983009808  }
 0x51d   : > { %v4576_v11 = vunpack.c.l.s4 %v5480_v40 }
 0x51f   : > { %v4577_v0 = vunpack.c.0.s8 %v4576_v11 }
 0x521   : > { %v4578_v34 = vperm.slane %v4571_v33, %v4577_v0  ;;  %v4582_v39 = vperm.slane %v4574_v12, %v4577_v0 }
 0x523   : > { %v4583_v23 = vrot.slane %v4578_v34, 4  ;;  %v4593_v16 = vrot.slane %v4582_v39, 4 }
 0x524   : > { %4454 = vmatmul.bf16.gmra.mxu0 %v4079_v14 }
 0x525   : > { %v4584_v26 = vsel %vm4573_vm3, 0.0, %v4583_v23  ;;  %v4594_v42 = vsel %vm4573_vm3, 0.0, %v4593_v16 }
 0x52c   : > { %5282 = vmatmul.msk.bf16.gmra.mxu3 %vm2430_vm14, %v7380_v55  ;;  %v4586_v55 = vunpack.c.l.s4 %v5481_v54 }
 0x52e   : > { %v4587_v20 = vunpack.c.0.s8 %v4586_v55 }
 0x530   : > { %v7591_v50 = vperm.slane %v4578_v34, %v4587_v20  ;;  %v4592_v44 = vperm.slane %v4584_v26, %v4587_v20  ;;  %v4598_v31 = vperm.slane %v4582_v39, %v4587_v20  ;;  %v4602_v18 = vperm.slane %v4594_v42, %v4587_v20 }
 0x532   : > { %v4603_v57 = vrot.slane %v7591_v50, 4  ;;  %v4605_v27 = vrot.slane %v4592_v44, 4  ;;  %4616 = vrot.lane.b32.xlu2 %v4592_v44, %s5474_s29  ;;  %v4609_v46 = vrot.slane %v4602_v18, 4  ;;  %v4607_v51 = vrot.slane %v4598_v31, 4 }
 0x534   : > { %v4604_v10 = vsel %vm4573_vm3, 0.0, %v4603_v57  ;;  %v4606_v3 = vsel %vm4573_vm3, 0.0, %v4605_v27  ;;  %v4610_v58 = vsel %vm4573_vm3, 0.0, %v4609_v46  ;;  %v4608_v32 = vsel %vm4573_vm3, 0.0, %v4607_v51 }
 0x535   : > { %4612 = vrot.lane.b32.xlu0 %v4604_v10, %s5482_s19  ;;  %4620 = vrot.lane.b32.xlu1 %v4606_v3, %s5483_s21 }
 0x53c   : > { %5283 = vmatmul.msk.bf16.gmra.mxu3 %vm2430_vm14, %v4048_v29 }
 0x53d   : > { %4624 = vrot.lane.b32.xlu0 %v4598_v31, %s5473_s20  ;;  %4632 = vrot.lane.b32.xlu1 %v4602_v18, %s5477_s15  ;;  %s5485_s20 = smov 40  }
 0x53e   : > { %4628 = vrot.lane.b32.xlu2 %v4608_v32, %s5485_s20 }
 0x545   : > { %4636 = vrot.lane.b32.xlu0 %v4610_v58, %s5484_s22 }
 0x54f   : > { %v4411_v41 = vpop.f32.mrf.mxu3 }
 0x550   : > { %v4412_v56 = vadd.f32 %v5448_v19, %v4411_v41 }
 0x557   : > { %v4413_v9 = vpop.f32.mrf.mxu3 }
 0x558   : > { %v4469_v2 = vpop.f32.mrf.mxu1  ;;  %v4414_v42 = vadd.f32 %v5448_v19, %v4413_v9 }
 0x55e   : > { %v4498_v43 = vpop.f32.mrf.mxu2 }
 0x55f   : > { %v4416_v1 = vpop.f32.mrf.mxu3 }
 0x560   : > { %v4440_v15 = vpop.f32.mrf.mxu0  ;;  %v4471_v22 = vpop.f32.mrf.mxu1  ;;  %v4417_v39 = vadd.f32 %v5448_v19, %v4416_v1 }
 0x561   : > { %v4441_v17 = vadd.f32 %v4440_v15, %v4412_v56 }
 0x563   : > { %v4470_v21 = vadd.f32 %v4469_v2, %v4441_v17 }
 0x565   : > { %v4499_v4 = vadd.f32 %v4498_v43, %v4470_v21 }
 0x566   : > { %v7607_v38 = vpop.f32.mrf.mxu2 }
 0x567   : > { %v4418_v13 = vpop.f32.mrf.mxu3 }
 0x568   : > { %v4442_v45 = vpop.f32.mrf.mxu0  ;;  %v4474_v52 = vpop.f32.mrf.mxu1  ;;  %v4419_v62 = vadd.f32 %v5448_v19, %v4418_v13 }
 0x569   : > { %v4443_v15 = vadd.f32 %v4442_v45, %v4414_v42 }
 0x56e   : > { %v4503_v24 = vpop.f32.mrf.mxu2 }
 0x56f   : > { %v4421_v47 = vpop.f32.mrf.mxu3 }
 0x570   : > { %v4476_v59 = vpop.f32.mrf.mxu1  ;;  %v4422_v10 = vadd.f32 %v5448_v19, %v4421_v47 }
 0x576   : > { %v4505_v25 = vpop.f32.mrf.mxu2 }
 0x577   : > { %v4423_v49 = vpop.f32.mrf.mxu3 }
 0x578   : > { %v4424_v34 = vadd.f32 %v5448_v19, %v4423_v49 }
 0x57e   : > { %v4508_v48 = vpop.f32.mrf.mxu2 }
 0x57f   : > { %v4426_v7 = vpop.f32.mrf.mxu3 }
 0x580   : > { %v4427_v54 = vadd.f32 %v5448_v19, %v4426_v7  ;;  %v4472_v7 = vadd.f32 %v4471_v22, %v4443_v15 }
 0x581   : > { %v4445_v61 = vpop.f32.mrf.mxu0 }
 0x582   : > { %v4446_v18 = vadd.f32 %v4445_v61, %v4417_v39  ;;  %v4501_v22 = vadd.f32 %v7607_v38, %v4472_v7 }
 0x584   : > { %v4475_v13 = vadd.f32 %v4474_v52, %v4446_v18 }
 0x586   : > { %v4510_v29 = vpop.f32.mrf.mxu2 }
 0x587   : > { %v4428_v63 = vpop.f32.mrf.mxu3 }
 0x588   : > { %v4429_v20 = vadd.f32 %v5448_v19, %v4428_v63 }
 0x589   : > { %v4447_v30 = vpop.f32.mrf.mxu0  ;;  %v4479_v35 = vpop.f32.mrf.mxu1 }
 0x58a   : > { %v4448_v3 = vadd.f32 %v4447_v30, %v4419_v62 }
 0x58c   : > { %v4477_v17 = vadd.f32 %v4476_v59, %v4448_v3  ;;  %v4617_v49 = vpop.permute.xlu2 %4616 }
 0x58e   : > { %v4513_v55 = vpop.f32.mrf.mxu2  ;;  %v4506_v63 = vadd.f32 %v4505_v25, %v4477_v17 }
 0x58f   : > { %v4527_v37 = vpop.f32.mrf.mxu3 }
 0x590   : > { %v7609_v53 = vadd.f32 %v4527_v37, %v4499_v4  ;;  %v4504_v37 = vadd.f32 %v4503_v24, %v4475_v13 }
 0x591   : > { %v4450_v6 = vpop.f32.mrf.mxu0  ;;  %v4481_v60 = vpop.f32.mrf.mxu1 }
 0x592   : > { %v4451_v12 = vadd.f32 %v4450_v6, %v4422_v10  ;;  %vm4547_vm7 = vcmp.gt.f32.partialorder %v7609_v53, 0.0 }
 0x594   : > { %v4480_v46 = vadd.f32 %v4479_v35, %v4451_v12 }
 0x596   : > { %v4515_v2 = vpop.f32.mrf.mxu2  ;;  %v4509_v32 = vadd.f32 %v4508_v48, %v4480_v46 }
 0x597   : > { %v7611_v8 = vpop.f32.mrf.mxu3 }
 0x598   : > { %v4629_v38 = vpop.permute.xlu2 %4628 }
 0x599   : > { %v4452_v36 = vpop.f32.mrf.mxu0  ;;  %v4484_v11 = vpop.f32.mrf.mxu1 }
 0x59a   : > { %v4453_v23 = vadd.f32 %v4452_v36, %v4424_v34 }
 0x59c   : > { %v4482_v16 = vadd.f32 %v4481_v60, %v4453_v23 }
 0x59e   : > { %v4511_v21 = vadd.f32 %v4510_v29, %v4482_v16 }
 0x59f   : > { %v7613_v5 = vpop.f32.mrf.mxu3 }
 0x5a0   : > { %v4533_v25 = vadd.f32 %v7613_v5, %v4504_v37 }
 0x5a1   : > { %v4455_v40 = vpop.f32.mrf.mxu0  ;;  %v4486_v31 = vpop.f32.mrf.mxu1 }
 0x5a2   : > { %v4456_v57 = vadd.f32 %v4455_v40, %v4427_v54  ;;  %v4557_v29 = vmul.f32 0.1, %v4533_v25  ;;  %vm4549_vm2 = vcmp.gt.f32.partialorder %v4533_v25, 0.0 }
 0x5a4   : > { %v4485_v27 = vadd.f32 %v4484_v11, %v4456_v57 }
 0x5a6   : > { %v4514_v58 = vadd.f32 %v4513_v55, %v4485_v27 }
 0x5a7   : > { %v4534_v28 = vpop.f32.mrf.mxu3  ;;  %v4613_v56 = vpop.permute.xlu0 %4612 }
 0x5a8   : > { %v4639_v9 = vsel %vm1656_vm15, %v7591_v50, %v4613_v56  ;;  %v4535_v30 = vadd.f32 %v4534_v28, %v4506_v63  ;;  %v4621_v59 = vpop.permute.xlu1 %4620  ;;  %v4530_v28 = vadd.f32 %v7611_v8, %v4501_v22  ;;  %v4555_v8 = vmul.f32 0.1, %v7609_v53 }
 0x5a9   : > { %v4457_v33 = vpop.f32.mrf.mxu0  ;;  %v4640_v35 = vsel %vm2421_vm13, %v4639_v9, %v4617_v49  ;;  %vm4644_vm13 = vcmask 326656  }
 0x5aa   : > { %v4458_v26 = vadd.f32 %v4457_v33, %v4429_v20  ;;  %v4642_v24 = vsel %vm4641_vm9, %v4640_v35, %v4621_v59  ;;  %v4558_v60 = vmul.f32 0.1, %v4535_v30  ;;  %vm4550_vm4 = vcmp.gt.f32.partialorder %v4535_v30, 0.0 }
 0x5ab   : > { %v4556_v5 = vmul.f32 0.1, %v4530_v28  ;;  %vm4548_vm6 = vcmp.gt.f32.partialorder %v4530_v28, 0.0  ;;  %v4565_v33 = vsel %vm4549_vm2, %v4533_v25, %v4557_v29  ;;  %v4563_v10 = vsel %vm4547_vm7, %v7609_v53, %v4555_v8 }
 0x5ac   : > { %v4487_v41 = vadd.f32 %v4486_v31, %v4458_v26 }
 0x5ad   : > { %v4564_v34 = vsel %vm4548_vm6, %v4530_v28, %v4556_v5 }
 0x5ae   : > { %v4516_v4 = vadd.f32 %v4515_v2, %v4487_v41 }
 0x5af   : > { %v4537_v14 = vpop.f32.mrf.mxu3  ;;  %v4625_v36 = vpop.permute.xlu0 %4624 }
 0x5b0   : > { %v4538_v19 = vadd.f32 %v4537_v14, %v4509_v32  ;;  %v4643_v11 = vsel %vm1975_vm8, %v4642_v24, %v4625_v36  ;;  %v4633_v55 = vpop.permute.xlu1 %4632  ;;  %vm4647_vm8 = vcmask 457728  }
 0x5b1   : > { %v4645_v54 = vsel %vm4644_vm13, %v4643_v11, %v4629_v38 }
 0x5b2   : > { %v4559_v50 = vmul.f32 0.1, %v4538_v19  ;;  %vm4551_vm15 = vcmp.gt.f32.partialorder %v4538_v19, 0.0  ;;  %v4646_v20 = vsel %vm2395_vm1, %v4645_v54, %v4633_v55 }
 0x5b4   : > { %v4567_v40 = vsel %vm4551_vm15, %v4538_v19, %v4559_v50 }
 0x5b7   : > { %v4539_v0 = vpop.f32.mrf.mxu3  ;;  %v4637_v57 = vpop.permute.xlu0 %4636 }
 0x5b8   : > { %v4540_v47 = vadd.f32 %v4539_v0, %v4511_v21  ;;  %v4566_v0 = vsel %vm4550_vm4, %v4535_v30, %v4558_v60  ;;  %v4648_v23 = vsel %vm4647_vm8, %v4646_v20, %v4637_v57 }
 0x5ba   : > { %v4560_v6 = vmul.f32 0.1, %v4540_v47  ;;  %vm4552_vm11 = vcmp.gt.f32.partialorder %v4540_v47, 0.0 }
 0x5bc   : > { %v4568_v14 = vsel %vm4552_vm11, %v4540_v47, %v4560_v6 }
 0x5bf   : > { %v4542_v44 = vpop.f32.mrf.mxu3 }
 0x5c0   : > { %v4543_v43 = vadd.f32 %v4542_v44, %v4514_v58 }
 0x5c2   : > { %v4561_v61 = vmul.f32 0.1, %v4543_v43  ;;  %vm4553_vm12 = vcmp.gt.f32.partialorder %v4543_v43, 0.0 }
 0x5c4   : > { %v4569_v48 = vsel %vm4553_vm12, %v4543_v43, %v4561_v61 }
 0x5c7   : > { %v4544_v51 = vpop.f32.mrf.mxu3 }
 0x5c8   : > { %v4545_v1 = vadd.f32 %v4544_v51, %v4516_v4 }
 0x5ca   : > { %vm4554_vm5 = vcmp.gt.f32.partialorder %v4545_v1, 0.0  ;;  %v4562_v45 = vmul.f32 0.1, %v4545_v1 }
 0x5cc   : > { %v4570_v52 = vsel %vm4554_vm5, %v4545_v1, %v4562_v45 }
 0x5cd   : > { %4660 = vmatpush.msra.mxu0 %v4570_v52 }
 0x5cf   : > { %4661 = vmatpush.msra.mxu0 %v4569_v48 }
 0x5d1   : > { %4662 = vmatpush.msra.mxu0 %v4568_v14 }
 0x5d3   : > { %4663 = vmatpush.msra.mxu0 %v4567_v40 }
 0x5d5   : > { %4664 = vmatpush.msra.mxu0 %v4566_v0 }
 0x5d7   : > { %4665 = vmatpush.msra.mxu0 %v4565_v33 }
 0x5d9   : > { %4666 = vmatpush.msra.mxu0 %v4564_v34 }
 0x5db   : > { %4667 = vmatpush.msra.mxu0 %v4563_v10 }
 0x5dc   : > { %5284 = vmatmul.msk.f32.vlgmr.msra.gmra.mxu0 %vm2430_vm14, %v4648_v23 }
 0x659   : > { %v4669_v26 = vpop.f32.mrf.mxu0 }
 0x65a   : > { %4673 = vst.msk [vmem:[%s449_s24] sm:$0x1] %vm4672_vm0, %v4669_v26 }
 0x65b PF: > { %s30_s25 = sadd.s32 1, %s5469_s25  }
 0x65c   : > { %p27_p6 = scmp.ge.s32.totalorder %s30_s25, 8  }
 0x65e   :  { %29 = sbr.rel (!%p27_p6) target bundleno = 7 (0x7), region = 100 }

</bundles_post_ra>
